<compile_context>
chip_gen: v5e
topology: v5e:2x2
jax: 0.10.0
libtpu: 0.0.40
codegen_flags: <defaults>
</compile_context>

<pallas_src>
import functools
import math

import jax
import jax.numpy as jnp
from jax import lax
from jax.experimental import pallas as pl
from jax.experimental.pallas import tpu as pltpu


# ----------------------------------------------------------------------------
# Fused conv kernel (stride 1, in-kernel im2col, bf16 x bf16 -> f32, bias+act)
# ----------------------------------------------------------------------------
def _conv_kernel(x_ref, w_ref, b_ref, o_ref, *, kh, kw, ho, wo, wp, cin, act):
    """Fused stride-1 conv for one batch element.

    x_ref : (1, Hp*Wp + kw - 1, cin)  bf16  flattened zero-padded image
    w_ref : (kh*kw*cin, cout)         bf16  taps stacked along K (resident)
    b_ref : (1, cout)                 f32
    o_ref : (1, ho*wo, cout)

    "Flat shifted window" trick: tap (ki, kj) of the conv is a plain matmul over
    rows [ki*wp + kj, ki*wp + kj + ho*wp) of the flattened image.  The wo..wp-1
    wrap-around columns of each output row are junk and are dropped when the
    valid rows are written out (compute overhead wp/wo ~= 1.4x, in exchange for
    zero HBM im2col traffic and no in-kernel reshapes/relayouts).
    """
    cout = o_ref.shape[-1]
    m_full = ho * wp
    acc = jnp.zeros((m_full, cout), jnp.float32)
    for ki in range(kh):
        for kj in range(kw):
            a = x_ref[0, pl.ds(ki * wp + kj, m_full), :]          # (m_full, cin) bf16
            wt = w_ref[pl.ds((ki * kw + kj) * cin, cin), :]       # (cin, cout)  bf16
            acc = acc + jnp.dot(a, wt, preferred_element_type=jnp.float32)
    acc = acc + b_ref[...]
    if act == "lrelu":
        acc = jnp.where(acc >= 0, acc, 0.1 * acc)
    acc = acc.astype(o_ref.dtype)
    for r in range(ho):                                           # drop junk columns
        o_ref[0, pl.ds(r * wo, wo), :] = acc[r * wp:r * wp + wo, :]


def _fit(x, axis, target):
    """Pad (zeros) or crop axis `axis` of x to length `target`."""
    cur = x.shape[axis]
    if cur < target:
        pads = [(0, 0)] * x.ndim
        pads[axis] = (0, target - cur)
        return jnp.pad(x, pads)
    if cur > target:
        return lax.slice_in_dim(x, 0, target, axis=axis)
    return x


def conv2d(x, w, b, *, stride=1, padding=0, act=None, out_dtype=jnp.float32):
    """NHWC conv via the fused Pallas kernel.  w: (KH, KW, Cin, Cout) f32."""
    x = x.astype(jnp.bfloat16)
    B, H, W, Cin = x.shape
    KH, KW, _, Cout = w.shape
    Ho = (H + 2 * padding - KH) // stride + 1
    Wo = (W + 2 * padding - KW) // stride + 1
    xp = jnp.pad(x, ((0, 0), (padding, padding), (padding, padding), (0, 0)))

    if stride == 1:
        xs, ws = xp, w
        kh, kw_, cin = KH, KW, Cin
    elif stride == 2:
        # Stride elimination: pixel-unshuffle the padded image (1x bytes) and
        # re-pack the weights so the kernel runs a stride-1 kh x kw_ conv.
        kh, kw_ = -(-KH // 2), -(-KW // 2)
        cin = 4 * Cin
        xp = _fit(xp, 1, 2 * (Ho + kh - 1))
        xp = _fit(xp, 2, 2 * (Wo + kw_ - 1))
        Hs, Ws = xp.shape[1] // 2, xp.shape[2] // 2
        xs = xp.reshape(B, Hs, 2, Ws, 2, Cin).transpose(0, 1, 3, 2, 4, 5)
        xs = xs.reshape(B, Hs, Ws, cin)
        w8 = jnp.pad(w, ((0, 2 * kh - KH), (0, 2 * kw_ - KW), (0, 0), (0, 0)))
        ws = w8.reshape(kh, 2, kw_, 2, Cin, Cout).transpose(0, 2, 1, 3, 4, 5)
        ws = ws.reshape(kh, kw_, cin, Cout)
    else:
        raise NotImplementedError("stride must be 1 or 2")

    _, Hp, Wp, _ = xs.shape
    assert Hp == Ho + kh - 1 and Wp == Wo + kw_ - 1
    # Flatten spatial dims; kw_-1 extra zero rows keep every shifted window in-bounds.
    xf = jnp.pad(xs.reshape(B, Hp * Wp, cin), ((0, 0), (0, kw_ - 1), (0, 0)))
    n_rows = Hp * Wp + kw_ - 1
    w_flat = ws.reshape(kh * kw_ * cin, Cout).astype(jnp.bfloat16)
    bias = b.reshape(1, Cout).astype(jnp.float32)

    kern = functools.partial(_conv_kernel, kh=kh, kw=kw_, ho=Ho, wo=Wo,
                             wp=Wp, cin=cin, act=act)
    out = pl.pallas_call(
        kern,
        out_shape=jax.ShapeDtypeStruct((B, Ho * Wo, Cout), out_dtype),
        grid=(B,),
        in_specs=[
            pl.BlockSpec((1, n_rows, cin), lambda i: (i, 0, 0)),
            pl.BlockSpec((kh * kw_ * cin, Cout), lambda i: (0, 0)),
            pl.BlockSpec((1, Cout), lambda i: (0, 0)),
        ],
        out_specs=pl.BlockSpec((1, Ho * Wo, Cout), lambda i: (i, 0, 0)),
        compiler_params=pltpu.CompilerParams(
            dimension_semantics=("parallel",),
            vmem_limit_bytes=32 * 1024 * 1024),
    )(xf, w_flat, bias)
    return out.reshape(B, Ho, Wo, Cout)


# ----------------------------------------------------------------------------
# MaxPool2d(3, stride=2, padding=1) as a Pallas kernel (space-to-depth input).
# ----------------------------------------------------------------------------
def _maxpool_kernel(x_ref, o_ref, *, ho, wo, c):
    """x_ref: (1, ho+1, wo+1, 4*c) pixel-unshuffled -inf-padded input;
       o_ref: (1, ho, wo, c)."""
    acc = jnp.full((ho, wo, c), -jnp.inf, jnp.float32)
    for ki in range(3):
        qi, di = divmod(ki, 2)
        for kj in range(3):
            qj, dj = divmod(kj, 2)
            g = (di * 2 + dj) * c
            win = x_ref[0, pl.ds(qi, ho), pl.ds(qj, wo), pl.ds(g, c)]
            acc = jnp.maximum(acc, win.astype(jnp.float32))
    o_ref[0] = acc.astype(o_ref.dtype)


def max_pool_3s2p1(y):
    """PyTorch nn.MaxPool2d(3, stride=2, padding=1) on NHWC."""
    B, H, W, C = y.shape
    Ho = (H + 2 - 3) // 2 + 1
    Wo = (W + 2 - 3) // 2 + 1
    yp = jnp.pad(
        y,
        ((0, 0), (1, 2 * (Ho + 1) - H - 1), (1, 2 * (Wo + 1) - W - 1), (0, 0)),
        constant_values=-jnp.inf)
    Hs, Ws = Ho + 1, Wo + 1
    ys = yp.reshape(B, Hs, 2, Ws, 2, C).transpose(0, 1, 3, 2, 4, 5)
    ys = ys.reshape(B, Hs, Ws, 4 * C)
    return pl.pallas_call(
        functools.partial(_maxpool_kernel, ho=Ho, wo=Wo, c=C),
        out_shape=jax.ShapeDtypeStruct((B, Ho, Wo, C), y.dtype),
        grid=(B,),
        in_specs=[pl.BlockSpec((1, Hs, Ws, 4 * C), lambda i: (i, 0, 0, 0))],
        out_specs=pl.BlockSpec((1, Ho, Wo, C), lambda i: (i, 0, 0, 0)),
        compiler_params=pltpu.CompilerParams(
            dimension_semantics=("parallel",),
            vmem_limit_bytes=32 * 1024 * 1024),
    )(ys)


# ----------------------------------------------------------------------------
# DownSample forward
# ----------------------------------------------------------------------------
def downsample_forward(params, x_nchw, scale=2):
    """DownSample.forward.  x: (B, 64, H, W) f32 NCHW -> (B, 64, H/4, W/4)."""
    x = jnp.transpose(x_nchw, (0, 2, 3, 1))                        # NHWC
    stride = 1 if scale == 1 else 2
    pad = params["convD_w"].shape[0] // 2                          # 7 // 2 = 3
    y = conv2d(x, params["convD_w"], params["convD_b"], stride=stride,
               padding=pad, act=None, out_dtype=jnp.bfloat16)      # convD
    y = max_pool_3s2p1(y)                                          # pool
    y = conv2d(y, params["conv_w"], params["conv_b"], stride=1, padding=1,
               act="lrelu", out_dtype=jnp.float32)                 # lrelu(conv)
    return jnp.transpose(y, (0, 3, 1, 2))                          # NCHW


# ----------------------------------------------------------------------------
# Deterministic parameter init (PyTorch Conv2d default: U(-1/sqrt(fan_in), ...))
# ----------------------------------------------------------------------------
def init_params(key, ch=64, kd=7):
    ks = jax.random.split(key, 4)

    def u(k, shape, fan_in):
        bound = 1.0 / math.sqrt(fan_in)
        return jax.random.uniform(k, shape, jnp.float32, -bound, bound)

    return {
        "convD_w": u(ks[0], (kd, kd, ch, ch), ch * kd * kd),
        "convD_b": u(ks[1], (ch,), ch * kd * kd),
        "conv_w": u(ks[2], (3, 3, ch, ch), ch * 9),
        "conv_b": u(ks[3], (ch,), ch * 9),
    }


# ----------------------------------------------------------------------------
# Plain-JAX f32 reference (for a loose numerical self-check).
# ----------------------------------------------------------------------------
def downsample_ref(params, x_nchw, scale=2):
    stride = 1 if scale == 1 else 2
    pad = params["convD_w"].shape[0] // 2
    wD = jnp.transpose(params["convD_w"], (3, 2, 0, 1))
    y = lax.conv_general_dilated(x_nchw, wD, (stride, stride),
                                 [(pad, pad), (pad, pad)],
                                 dimension_numbers=("NCHW", "OIHW", "NCHW"))
    y = y + params["convD_b"][None, :, None, None]
    y = lax.reduce_window(y, -jnp.inf, lax.max, (1, 1, 3, 3), (1, 1, 2, 2),
                          [(0, 0), (0, 0), (1, 1), (1, 1)])
    w2 = jnp.transpose(params["conv_w"], (3, 2, 0, 1))
    y = lax.conv_general_dilated(y, w2, (1, 1), [(1, 1), (1, 1)],
                                 dimension_numbers=("NCHW", "OIHW", "NCHW"))
    y = y + params["conv_b"][None, :, None, None]
    return jnp.where(y >= 0, y, 0.1 * y)


# ----------------------------------------------------------------------------
if __name__ == "__main__":
    key = jax.random.PRNGKey(0)
    kp, kx = jax.random.split(key)
    params = init_params(kp)

    B, C, H, W = 2, 64, 16, 16           # channel count fixed at 64 by the module
    x = jax.random.normal(kx, (B, C, H, W), dtype=jnp.float32)

    fwd = jax.jit(downsample_forward, static_argnames=("scale",))
    out = fwd(params, x)
    jax.block_until_ready(out)

    assert out.shape == (B, C, H // 4, W // 4), out.shape
    assert out.dtype == jnp.float32

    # Loose check vs. a plain-JAX f32 reference (bf16 MXU operands -> small diff).
    ref = downsample_ref(params, x)
    err = float(jnp.max(jnp.abs(out - ref)))
    lim = 1e-1 * (1.0 + float(jnp.max(jnp.abs(ref))))
    assert err < lim, f"max abs err {err} exceeds {lim}"

    print("KERNEL_OK")
</pallas_src>

<mosaic_0001>
module attributes {stable_mosaic.version = 11 : i64} {
  func.func @_conv_kernel(%arg0: i32, %arg1: memref<1x124x256xbf16, #tpu.memory_space<vmem>>, %arg2: memref<4096x64xbf16, #tpu.memory_space<vmem>>, %arg3: memref<1x64xf32, #tpu.memory_space<vmem>>, %arg4: memref<1x64x64xbf16, #tpu.memory_space<vmem>>) attributes {dimension_semantics = [#tpu.dimension_semantics<parallel>], iteration_bounds = array<i64: 2>, scalar_prefetch = 0 : i64, scratch_operands = 0 : i64, tpu.core_type = #tpu.core_type<tc>, window_params = [{transform_indices = @transform_0, window_bounds = array<i64: 1, 124, 256>}, {pipeline_mode = #tpu.pipeline_mode<synchronous>, transform_indices = @transform_1, window_bounds = array<i64: 4096, 64>}, {pipeline_mode = #tpu.pipeline_mode<synchronous>, transform_indices = @transform_2, window_bounds = array<i64: 1, 64>}, {transform_indices = @transform_3, window_bounds = array<i64: 1, 64, 64>}]} {
    %cst = arith.constant 0.000000e+00 : f32
    %0 = vector.broadcast %cst : f32 to vector<88x64xf32>
    %c0 = arith.constant 0 : index
    %c0_0 = arith.constant 0 : index
    %c0_1 = arith.constant 0 : index
    %1 = vector.load %arg1[%c0, %c0_0, %c0_1] : memref<1x124x256xbf16, #tpu.memory_space<vmem>>, vector<1x88x256xbf16>
    %2 = vector.shape_cast %1 : vector<1x88x256xbf16> to vector<88x256xbf16>
    %c0_2 = arith.constant 0 : index
    %c0_3 = arith.constant 0 : index
    %3 = vector.load %arg2[%c0_2, %c0_3] : memref<4096x64xbf16, #tpu.memory_space<vmem>>, vector<256x64xbf16>
    %cst_4 = arith.constant dense<0.000000e+00> : vector<88x64xf32>
    %4 = tpu.matmul %2, %3, %cst_4 {dimension_numbers = #tpu.dot_dimension_numbers<[1], [0], [0], [1], [0, 0, 1, 1], [], []>} : vector<88x256xbf16>, vector<256x64xbf16>, vector<88x64xf32> -> vector<88x64xf32>
    %5 = arith.addf %0, %4 : vector<88x64xf32>
    %c0_5 = arith.constant 0 : index
    %c1 = arith.constant 1 : index
    %c0_6 = arith.constant 0 : index
    %6 = vector.load %arg1[%c0_5, %c1, %c0_6] : memref<1x124x256xbf16, #tpu.memory_space<vmem>>, vector<1x88x256xbf16>
    %7 = vector.shape_cast %6 : vector<1x88x256xbf16> to vector<88x256xbf16>
    %c256 = arith.constant 256 : index
    %c0_7 = arith.constant 0 : index
    %8 = vector.load %arg2[%c256, %c0_7] : memref<4096x64xbf16, #tpu.memory_space<vmem>>, vector<256x64xbf16>
    %cst_8 = arith.constant dense<0.000000e+00> : vector<88x64xf32>
    %9 = tpu.matmul %7, %8, %cst_8 {dimension_numbers = #tpu.dot_dimension_numbers<[1], [0], [0], [1], [0, 0, 1, 1], [], []>} : vector<88x256xbf16>, vector<256x64xbf16>, vector<88x64xf32> -> vector<88x64xf32>
    %10 = arith.addf %5, %9 : vector<88x64xf32>
    %c0_9 = arith.constant 0 : index
    %c2 = arith.constant 2 : index
    %c0_10 = arith.constant 0 : index
    %11 = vector.load %arg1[%c0_9, %c2, %c0_10] : memref<1x124x256xbf16, #tpu.memory_space<vmem>>, vector<1x88x256xbf16>
    %12 = vector.shape_cast %11 : vector<1x88x256xbf16> to vector<88x256xbf16>
    %c512 = arith.constant 512 : index
    %c0_11 = arith.constant 0 : index
    %13 = vector.load %arg2[%c512, %c0_11] : memref<4096x64xbf16, #tpu.memory_space<vmem>>, vector<256x64xbf16>
    %cst_12 = arith.constant dense<0.000000e+00> : vector<88x64xf32>
    %14 = tpu.matmul %12, %13, %cst_12 {dimension_numbers = #tpu.dot_dimension_numbers<[1], [0], [0], [1], [0, 0, 1, 1], [], []>} : vector<88x256xbf16>, vector<256x64xbf16>, vector<88x64xf32> -> vector<88x64xf32>
    %15 = arith.addf %10, %14 : vector<88x64xf32>
    %c0_13 = arith.constant 0 : index
    %c3 = arith.constant 3 : index
    %c0_14 = arith.constant 0 : index
    %16 = vector.load %arg1[%c0_13, %c3, %c0_14] : memref<1x124x256xbf16, #tpu.memory_space<vmem>>, vector<1x88x256xbf16>
    %17 = vector.shape_cast %16 : vector<1x88x256xbf16> to vector<88x256xbf16>
    %c768 = arith.constant 768 : index
    %c0_15 = arith.constant 0 : index
    %18 = vector.load %arg2[%c768, %c0_15] : memref<4096x64xbf16, #tpu.memory_space<vmem>>, vector<256x64xbf16>
    %cst_16 = arith.constant dense<0.000000e+00> : vector<88x64xf32>
    %19 = tpu.matmul %17, %18, %cst_16 {dimension_numbers = #tpu.dot_dimension_numbers<[1], [0], [0], [1], [0, 0, 1, 1], [], []>} : vector<88x256xbf16>, vector<256x64xbf16>, vector<88x64xf32> -> vector<88x64xf32>
    %20 = arith.addf %15, %19 : vector<88x64xf32>
    %c0_17 = arith.constant 0 : index
    %c11 = arith.constant 11 : index
    %c0_18 = arith.constant 0 : index
    %21 = vector.load %arg1[%c0_17, %c11, %c0_18] : memref<1x124x256xbf16, #tpu.memory_space<vmem>>, vector<1x88x256xbf16>
    %22 = vector.shape_cast %21 : vector<1x88x256xbf16> to vector<88x256xbf16>
    %c1024 = arith.constant 1024 : index
    %c0_19 = arith.constant 0 : index
    %23 = vector.load %arg2[%c1024, %c0_19] : memref<4096x64xbf16, #tpu.memory_space<vmem>>, vector<256x64xbf16>
    %cst_20 = arith.constant dense<0.000000e+00> : vector<88x64xf32>
    %24 = tpu.matmul %22, %23, %cst_20 {dimension_numbers = #tpu.dot_dimension_numbers<[1], [0], [0], [1], [0, 0, 1, 1], [], []>} : vector<88x256xbf16>, vector<256x64xbf16>, vector<88x64xf32> -> vector<88x64xf32>
    %25 = arith.addf %20, %24 : vector<88x64xf32>
    %c0_21 = arith.constant 0 : index
    %c12 = arith.constant 12 : index
    %c0_22 = arith.constant 0 : index
    %26 = vector.load %arg1[%c0_21, %c12, %c0_22] : memref<1x124x256xbf16, #tpu.memory_space<vmem>>, vector<1x88x256xbf16>
    %27 = vector.shape_cast %26 : vector<1x88x256xbf16> to vector<88x256xbf16>
    %c1280 = arith.constant 1280 : index
    %c0_23 = arith.constant 0 : index
    %28 = vector.load %arg2[%c1280, %c0_23] : memref<4096x64xbf16, #tpu.memory_space<vmem>>, vector<256x64xbf16>
    %cst_24 = arith.constant dense<0.000000e+00> : vector<88x64xf32>
    %29 = tpu.matmul %27, %28, %cst_24 {dimension_numbers = #tpu.dot_dimension_numbers<[1], [0], [0], [1], [0, 0, 1, 1], [], []>} : vector<88x256xbf16>, vector<256x64xbf16>, vector<88x64xf32> -> vector<88x64xf32>
    %30 = arith.addf %25, %29 : vector<88x64xf32>
    %c0_25 = arith.constant 0 : index
    %c13 = arith.constant 13 : index
    %c0_26 = arith.constant 0 : index
    %31 = vector.load %arg1[%c0_25, %c13, %c0_26] : memref<1x124x256xbf16, #tpu.memory_space<vmem>>, vector<1x88x256xbf16>
    %32 = vector.shape_cast %31 : vector<1x88x256xbf16> to vector<88x256xbf16>
    %c1536 = arith.constant 1536 : index
    %c0_27 = arith.constant 0 : index
    %33 = vector.load %arg2[%c1536, %c0_27] : memref<4096x64xbf16, #tpu.memory_space<vmem>>, vector<256x64xbf16>
    %cst_28 = arith.constant dense<0.000000e+00> : vector<88x64xf32>
    %34 = tpu.matmul %32, %33, %cst_28 {dimension_numbers = #tpu.dot_dimension_numbers<[1], [0], [0], [1], [0, 0, 1, 1], [], []>} : vector<88x256xbf16>, vector<256x64xbf16>, vector<88x64xf32> -> vector<88x64xf32>
    %35 = arith.addf %30, %34 : vector<88x64xf32>
    %c0_29 = arith.constant 0 : index
    %c14 = arith.constant 14 : index
    %c0_30 = arith.constant 0 : index
    %36 = vector.load %arg1[%c0_29, %c14, %c0_30] : memref<1x124x256xbf16, #tpu.memory_space<vmem>>, vector<1x88x256xbf16>
    %37 = vector.shape_cast %36 : vector<1x88x256xbf16> to vector<88x256xbf16>
    %c1792 = arith.constant 1792 : index
    %c0_31 = arith.constant 0 : index
    %38 = vector.load %arg2[%c1792, %c0_31] : memref<4096x64xbf16, #tpu.memory_space<vmem>>, vector<256x64xbf16>
    %cst_32 = arith.constant dense<0.000000e+00> : vector<88x64xf32>
    %39 = tpu.matmul %37, %38, %cst_32 {dimension_numbers = #tpu.dot_dimension_numbers<[1], [0], [0], [1], [0, 0, 1, 1], [], []>} : vector<88x256xbf16>, vector<256x64xbf16>, vector<88x64xf32> -> vector<88x64xf32>
    %40 = arith.addf %35, %39 : vector<88x64xf32>
    %c0_33 = arith.constant 0 : index
    %c22 = arith.constant 22 : index
    %c0_34 = arith.constant 0 : index
    %41 = vector.load %arg1[%c0_33, %c22, %c0_34] : memref<1x124x256xbf16, #tpu.memory_space<vmem>>, vector<1x88x256xbf16>
    %42 = vector.shape_cast %41 : vector<1x88x256xbf16> to vector<88x256xbf16>
    %c2048 = arith.constant 2048 : index
    %c0_35 = arith.constant 0 : index
    %43 = vector.load %arg2[%c2048, %c0_35] : memref<4096x64xbf16, #tpu.memory_space<vmem>>, vector<256x64xbf16>
    %cst_36 = arith.constant dense<0.000000e+00> : vector<88x64xf32>
    %44 = tpu.matmul %42, %43, %cst_36 {dimension_numbers = #tpu.dot_dimension_numbers<[1], [0], [0], [1], [0, 0, 1, 1], [], []>} : vector<88x256xbf16>, vector<256x64xbf16>, vector<88x64xf32> -> vector<88x64xf32>
    %45 = arith.addf %40, %44 : vector<88x64xf32>
    %c0_37 = arith.constant 0 : index
    %c23 = arith.constant 23 : index
    %c0_38 = arith.constant 0 : index
    %46 = vector.load %arg1[%c0_37, %c23, %c0_38] : memref<1x124x256xbf16, #tpu.memory_space<vmem>>, vector<1x88x256xbf16>
    %47 = vector.shape_cast %46 : vector<1x88x256xbf16> to vector<88x256xbf16>
    %c2304 = arith.constant 2304 : index
    %c0_39 = arith.constant 0 : index
    %48 = vector.load %arg2[%c2304, %c0_39] : memref<4096x64xbf16, #tpu.memory_space<vmem>>, vector<256x64xbf16>
    %cst_40 = arith.constant dense<0.000000e+00> : vector<88x64xf32>
    %49 = tpu.matmul %47, %48, %cst_40 {dimension_numbers = #tpu.dot_dimension_numbers<[1], [0], [0], [1], [0, 0, 1, 1], [], []>} : vector<88x256xbf16>, vector<256x64xbf16>, vector<88x64xf32> -> vector<88x64xf32>
    %50 = arith.addf %45, %49 : vector<88x64xf32>
    %c0_41 = arith.constant 0 : index
    %c24 = arith.constant 24 : index
    %c0_42 = arith.constant 0 : index
    %51 = vector.load %arg1[%c0_41, %c24, %c0_42] : memref<1x124x256xbf16, #tpu.memory_space<vmem>>, vector<1x88x256xbf16>
    %52 = vector.shape_cast %51 : vector<1x88x256xbf16> to vector<88x256xbf16>
    %c2560 = arith.constant 2560 : index
    %c0_43 = arith.constant 0 : index
    %53 = vector.load %arg2[%c2560, %c0_43] : memref<4096x64xbf16, #tpu.memory_space<vmem>>, vector<256x64xbf16>
    %cst_44 = arith.constant dense<0.000000e+00> : vector<88x64xf32>
    %54 = tpu.matmul %52, %53, %cst_44 {dimension_numbers = #tpu.dot_dimension_numbers<[1], [0], [0], [1], [0, 0, 1, 1], [], []>} : vector<88x256xbf16>, vector<256x64xbf16>, vector<88x64xf32> -> vector<88x64xf32>
    %55 = arith.addf %50, %54 : vector<88x64xf32>
    %c0_45 = arith.constant 0 : index
    %c25 = arith.constant 25 : index
    %c0_46 = arith.constant 0 : index
    %56 = vector.load %arg1[%c0_45, %c25, %c0_46] : memref<1x124x256xbf16, #tpu.memory_space<vmem>>, vector<1x88x256xbf16>
    %57 = vector.shape_cast %56 : vector<1x88x256xbf16> to vector<88x256xbf16>
    %c2816 = arith.constant 2816 : index
    %c0_47 = arith.constant 0 : index
    %58 = vector.load %arg2[%c2816, %c0_47] : memref<4096x64xbf16, #tpu.memory_space<vmem>>, vector<256x64xbf16>
    %cst_48 = arith.constant dense<0.000000e+00> : vector<88x64xf32>
    %59 = tpu.matmul %57, %58, %cst_48 {dimension_numbers = #tpu.dot_dimension_numbers<[1], [0], [0], [1], [0, 0, 1, 1], [], []>} : vector<88x256xbf16>, vector<256x64xbf16>, vector<88x64xf32> -> vector<88x64xf32>
    %60 = arith.addf %55, %59 : vector<88x64xf32>
    %c0_49 = arith.constant 0 : index
    %c33 = arith.constant 33 : index
    %c0_50 = arith.constant 0 : index
    %61 = vector.load %arg1[%c0_49, %c33, %c0_50] : memref<1x124x256xbf16, #tpu.memory_space<vmem>>, vector<1x88x256xbf16>
    %62 = vector.shape_cast %61 : vector<1x88x256xbf16> to vector<88x256xbf16>
    %c3072 = arith.constant 3072 : index
    %c0_51 = arith.constant 0 : index
    %63 = vector.load %arg2[%c3072, %c0_51] : memref<4096x64xbf16, #tpu.memory_space<vmem>>, vector<256x64xbf16>
    %cst_52 = arith.constant dense<0.000000e+00> : vector<88x64xf32>
    %64 = tpu.matmul %62, %63, %cst_52 {dimension_numbers = #tpu.dot_dimension_numbers<[1], [0], [0], [1], [0, 0, 1, 1], [], []>} : vector<88x256xbf16>, vector<256x64xbf16>, vector<88x64xf32> -> vector<88x64xf32>
    %65 = arith.addf %60, %64 : vector<88x64xf32>
    %c0_53 = arith.constant 0 : index
    %c34 = arith.constant 34 : index
    %c0_54 = arith.constant 0 : index
    %66 = vector.load %arg1[%c0_53, %c34, %c0_54] : memref<1x124x256xbf16, #tpu.memory_space<vmem>>, vector<1x88x256xbf16>
    %67 = vector.shape_cast %66 : vector<1x88x256xbf16> to vector<88x256xbf16>
    %c3328 = arith.constant 3328 : index
    %c0_55 = arith.constant 0 : index
    %68 = vector.load %arg2[%c3328, %c0_55] : memref<4096x64xbf16, #tpu.memory_space<vmem>>, vector<256x64xbf16>
    %cst_56 = arith.constant dense<0.000000e+00> : vector<88x64xf32>
    %69 = tpu.matmul %67, %68, %cst_56 {dimension_numbers = #tpu.dot_dimension_numbers<[1], [0], [0], [1], [0, 0, 1, 1], [], []>} : vector<88x256xbf16>, vector<256x64xbf16>, vector<88x64xf32> -> vector<88x64xf32>
    %70 = arith.addf %65, %69 : vector<88x64xf32>
    %c0_57 = arith.constant 0 : index
    %c35 = arith.constant 35 : index
    %c0_58 = arith.constant 0 : index
    %71 = vector.load %arg1[%c0_57, %c35, %c0_58] : memref<1x124x256xbf16, #tpu.memory_space<vmem>>, vector<1x88x256xbf16>
    %72 = vector.shape_cast %71 : vector<1x88x256xbf16> to vector<88x256xbf16>
    %c3584 = arith.constant 3584 : index
    %c0_59 = arith.constant 0 : index
    %73 = vector.load %arg2[%c3584, %c0_59] : memref<4096x64xbf16, #tpu.memory_space<vmem>>, vector<256x64xbf16>
    %cst_60 = arith.constant dense<0.000000e+00> : vector<88x64xf32>
    %74 = tpu.matmul %72, %73, %cst_60 {dimension_numbers = #tpu.dot_dimension_numbers<[1], [0], [0], [1], [0, 0, 1, 1], [], []>} : vector<88x256xbf16>, vector<256x64xbf16>, vector<88x64xf32> -> vector<88x64xf32>
    %75 = arith.addf %70, %74 : vector<88x64xf32>
    %c0_61 = arith.constant 0 : index
    %c36 = arith.constant 36 : index
    %c0_62 = arith.constant 0 : index
    %76 = vector.load %arg1[%c0_61, %c36, %c0_62] : memref<1x124x256xbf16, #tpu.memory_space<vmem>>, vector<1x88x256xbf16>
    %77 = vector.shape_cast %76 : vector<1x88x256xbf16> to vector<88x256xbf16>
    %c3840 = arith.constant 3840 : index
    %c0_63 = arith.constant 0 : index
    %78 = vector.load %arg2[%c3840, %c0_63] : memref<4096x64xbf16, #tpu.memory_space<vmem>>, vector<256x64xbf16>
    %cst_64 = arith.constant dense<0.000000e+00> : vector<88x64xf32>
    %79 = tpu.matmul %77, %78, %cst_64 {dimension_numbers = #tpu.dot_dimension_numbers<[1], [0], [0], [1], [0, 0, 1, 1], [], []>} : vector<88x256xbf16>, vector<256x64xbf16>, vector<88x64xf32> -> vector<88x64xf32>
    %80 = arith.addf %75, %79 : vector<88x64xf32>
    %c0_65 = arith.constant 0 : index
    %c0_66 = arith.constant 0 : index
    %81 = vector.load %arg3[%c0_65, %c0_66] : memref<1x64xf32, #tpu.memory_space<vmem>>, vector<1x64xf32>
    %82 = vector.broadcast %81 : vector<1x64xf32> to vector<88x64xf32>
    %83 = arith.addf %80, %82 : vector<88x64xf32>
    %84 = arith.truncf %83 : vector<88x64xf32> to vector<88x64xbf16>
    %85 = vector.extract_strided_slice %84 {offsets = [0, 0], sizes = [8, 64], strides = [1, 1]} : vector<88x64xbf16> to vector<8x64xbf16>
    %c0_67 = arith.constant 0 : index
    %c0_68 = arith.constant 0 : index
    %c0_69 = arith.constant 0 : index
    %86 = vector.load %arg4[%c0_67, %c0_68, %c0_69] : memref<1x64x64xbf16, #tpu.memory_space<vmem>>, vector<1x8x64xbf16>
    %87 = vector.shape_cast %86 : vector<1x8x64xbf16> to vector<8x64xbf16>
    %88 = vector.shape_cast %85 : vector<8x64xbf16> to vector<1x8x64xbf16>
    tpu.vector_store %arg4[%c0_67, %c0_68, %c0_69], %88 {strides = array<i32>} : memref<1x64x64xbf16, #tpu.memory_space<vmem>>, vector<1x8x64xbf16>,
    %89 = vector.extract_strided_slice %84 {offsets = [11, 0], sizes = [8, 64], strides = [1, 1]} : vector<88x64xbf16> to vector<8x64xbf16>
    %c0_70 = arith.constant 0 : index
    %c8 = arith.constant 8 : index
    %c0_71 = arith.constant 0 : index
    %90 = vector.load %arg4[%c0_70, %c8, %c0_71] : memref<1x64x64xbf16, #tpu.memory_space<vmem>>, vector<1x8x64xbf16>
    %91 = vector.shape_cast %90 : vector<1x8x64xbf16> to vector<8x64xbf16>
    %92 = vector.shape_cast %89 : vector<8x64xbf16> to vector<1x8x64xbf16>
    tpu.vector_store %arg4[%c0_70, %c8, %c0_71], %92 {strides = array<i32>} : memref<1x64x64xbf16, #tpu.memory_space<vmem>>, vector<1x8x64xbf16>,
    %93 = vector.extract_strided_slice %84 {offsets = [22, 0], sizes = [8, 64], strides = [1, 1]} : vector<88x64xbf16> to vector<8x64xbf16>
    %c0_72 = arith.constant 0 : index
    %c16 = arith.constant 16 : index
    %c0_73 = arith.constant 0 : index
    %94 = vector.load %arg4[%c0_72, %c16, %c0_73] : memref<1x64x64xbf16, #tpu.memory_space<vmem>>, vector<1x8x64xbf16>
    %95 = vector.shape_cast %94 : vector<1x8x64xbf16> to vector<8x64xbf16>
    %96 = vector.shape_cast %93 : vector<8x64xbf16> to vector<1x8x64xbf16>
    tpu.vector_store %arg4[%c0_72, %c16, %c0_73], %96 {strides = array<i32>} : memref<1x64x64xbf16, #tpu.memory_space<vmem>>, vector<1x8x64xbf16>,
    %97 = vector.extract_strided_slice %84 {offsets = [33, 0], sizes = [8, 64], strides = [1, 1]} : vector<88x64xbf16> to vector<8x64xbf16>
    %c0_74 = arith.constant 0 : index
    %c24_75 = arith.constant 24 : index
    %c0_76 = arith.constant 0 : index
    %98 = vector.load %arg4[%c0_74, %c24_75, %c0_76] : memref<1x64x64xbf16, #tpu.memory_space<vmem>>, vector<1x8x64xbf16>
    %99 = vector.shape_cast %98 : vector<1x8x64xbf16> to vector<8x64xbf16>
    %100 = vector.shape_cast %97 : vector<8x64xbf16> to vector<1x8x64xbf16>
    tpu.vector_store %arg4[%c0_74, %c24_75, %c0_76], %100 {strides = array<i32>} : memref<1x64x64xbf16, #tpu.memory_space<vmem>>, vector<1x8x64xbf16>,
    %101 = vector.extract_strided_slice %84 {offsets = [44, 0], sizes = [8, 64], strides = [1, 1]} : vector<88x64xbf16> to vector<8x64xbf16>
    %c0_77 = arith.constant 0 : index
    %c32 = arith.constant 32 : index
    %c0_78 = arith.constant 0 : index
    %102 = vector.load %arg4[%c0_77, %c32, %c0_78] : memref<1x64x64xbf16, #tpu.memory_space<vmem>>, vector<1x8x64xbf16>
    %103 = vector.shape_cast %102 : vector<1x8x64xbf16> to vector<8x64xbf16>
    %104 = vector.shape_cast %101 : vector<8x64xbf16> to vector<1x8x64xbf16>
    tpu.vector_store %arg4[%c0_77, %c32, %c0_78], %104 {strides = array<i32>} : memref<1x64x64xbf16, #tpu.memory_space<vmem>>, vector<1x8x64xbf16>,
    %105 = vector.extract_strided_slice %84 {offsets = [55, 0], sizes = [8, 64], strides = [1, 1]} : vector<88x64xbf16> to vector<8x64xbf16>
    %c0_79 = arith.constant 0 : index
    %c40 = arith.constant 40 : index
    %c0_80 = arith.constant 0 : index
    %106 = vector.load %arg4[%c0_79, %c40, %c0_80] : memref<1x64x64xbf16, #tpu.memory_space<vmem>>, vector<1x8x64xbf16>
    %107 = vector.shape_cast %106 : vector<1x8x64xbf16> to vector<8x64xbf16>
    %108 = vector.shape_cast %105 : vector<8x64xbf16> to vector<1x8x64xbf16>
    tpu.vector_store %arg4[%c0_79, %c40, %c0_80], %108 {strides = array<i32>} : memref<1x64x64xbf16, #tpu.memory_space<vmem>>, vector<1x8x64xbf16>,
    %109 = vector.extract_strided_slice %84 {offsets = [66, 0], sizes = [8, 64], strides = [1, 1]} : vector<88x64xbf16> to vector<8x64xbf16>
    %c0_81 = arith.constant 0 : index
    %c48 = arith.constant 48 : index
    %c0_82 = arith.constant 0 : index
    %110 = vector.load %arg4[%c0_81, %c48, %c0_82] : memref<1x64x64xbf16, #tpu.memory_space<vmem>>, vector<1x8x64xbf16>
    %111 = vector.shape_cast %110 : vector<1x8x64xbf16> to vector<8x64xbf16>
    %112 = vector.shape_cast %109 : vector<8x64xbf16> to vector<1x8x64xbf16>
    tpu.vector_store %arg4[%c0_81, %c48, %c0_82], %112 {strides = array<i32>} : memref<1x64x64xbf16, #tpu.memory_space<vmem>>, vector<1x8x64xbf16>,
    %113 = vector.extract_strided_slice %84 {offsets = [77, 0], sizes = [8, 64], strides = [1, 1]} : vector<88x64xbf16> to vector<8x64xbf16>
    %c0_83 = arith.constant 0 : index
    %c56 = arith.constant 56 : index
    %c0_84 = arith.constant 0 : index
    %114 = vector.load %arg4[%c0_83, %c56, %c0_84] : memref<1x64x64xbf16, #tpu.memory_space<vmem>>, vector<1x8x64xbf16>
    %115 = vector.shape_cast %114 : vector<1x8x64xbf16> to vector<8x64xbf16>
    %116 = vector.shape_cast %113 : vector<8x64xbf16> to vector<1x8x64xbf16>
    tpu.vector_store %arg4[%c0_83, %c56, %c0_84], %116 {strides = array<i32>} : memref<1x64x64xbf16, #tpu.memory_space<vmem>>, vector<1x8x64xbf16>,
    return
  }
  func.func @transform_0(%arg0: i32) -> (i32, i32, i32) {
    %c0_i32 = arith.constant 0 : i32
    %c0_i32_0 = arith.constant 0 : i32
    %c0_i32_1 = arith.constant 0 : i32
    return %arg0, %c0_i32, %c0_i32_0 : i32, i32, i32
  }
  func.func @transform_1(%arg0: i32) -> (i32, i32) {
    %c0_i32 = arith.constant 0 : i32
    %c0_i32_0 = arith.constant 0 : i32
    %c0_i32_1 = arith.constant 0 : i32
    return %c0_i32, %c0_i32_0 : i32, i32
  }
  func.func @transform_2(%arg0: i32) -> (i32, i32) {
    %c0_i32 = arith.constant 0 : i32
    %c0_i32_0 = arith.constant 0 : i32
    %c0_i32_1 = arith.constant 0 : i32
    return %c0_i32, %c0_i32_0 : i32, i32
  }
  func.func @transform_3(%arg0: i32) -> (i32, i32, i32) {
    %c0_i32 = arith.constant 0 : i32
    %c0_i32_0 = arith.constant 0 : i32
    %c0_i32_1 = arith.constant 0 : i32
    return %arg0, %c0_i32, %c0_i32_0 : i32, i32, i32
  }
}

module attributes {stable_mosaic.version = 11 : i64} {
  func.func @_maxpool_kernel(%arg0: i32, %arg1: memref<1x5x5x256xbf16, #tpu.memory_space<vmem>>, %arg2: memref<1x4x4x64xbf16, #tpu.memory_space<vmem>>) attributes {dimension_semantics = [#tpu.dimension_semantics<parallel>], iteration_bounds = array<i64: 2>, scalar_prefetch = 0 : i64, scratch_operands = 0 : i64, tpu.core_type = #tpu.core_type<tc>, window_params = [{transform_indices = @transform_0, window_bounds = array<i64: 1, 5, 5, 256>}, {transform_indices = @transform_1, window_bounds = array<i64: 1, 4, 4, 64>}]} {
    %cst = arith.constant 0xFF800000 : f32
    %0 = vector.broadcast %cst : f32 to vector<4x4x64xf32>
    %c0 = arith.constant 0 : index
    %c0_0 = arith.constant 0 : index
    %c0_1 = arith.constant 0 : index
    %c0_2 = arith.constant 0 : index
    %1 = vector.load %arg1[%c0, %c0_0, %c0_1, %c0_2] : memref<1x5x5x256xbf16, #tpu.memory_space<vmem>>, vector<1x4x4x64xbf16>
    %2 = vector.shape_cast %1 : vector<1x4x4x64xbf16> to vector<4x4x64xbf16>
    %3 = arith.extf %2 : vector<4x4x64xbf16> to vector<4x4x64xf32>
    %4 = arith.maximumf %0, %3 : vector<4x4x64xf32>
    %c0_3 = arith.constant 0 : index
    %c0_4 = arith.constant 0 : index
    %c0_5 = arith.constant 0 : index
    %c64 = arith.constant 64 : index
    %5 = vector.load %arg1[%c0_3, %c0_4, %c0_5, %c64] : memref<1x5x5x256xbf16, #tpu.memory_space<vmem>>, vector<1x4x4x64xbf16>
    %6 = vector.shape_cast %5 : vector<1x4x4x64xbf16> to vector<4x4x64xbf16>
    %7 = arith.extf %6 : vector<4x4x64xbf16> to vector<4x4x64xf32>
    %8 = arith.maximumf %4, %7 : vector<4x4x64xf32>
    %c0_6 = arith.constant 0 : index
    %c0_7 = arith.constant 0 : index
    %c1 = arith.constant 1 : index
    %c0_8 = arith.constant 0 : index
    %9 = vector.load %arg1[%c0_6, %c0_7, %c1, %c0_8] : memref<1x5x5x256xbf16, #tpu.memory_space<vmem>>, vector<1x4x4x64xbf16>
    %10 = vector.shape_cast %9 : vector<1x4x4x64xbf16> to vector<4x4x64xbf16>
    %11 = arith.extf %10 : vector<4x4x64xbf16> to vector<4x4x64xf32>
    %12 = arith.maximumf %8, %11 : vector<4x4x64xf32>
    %c0_9 = arith.constant 0 : index
    %c0_10 = arith.constant 0 : index
    %c0_11 = arith.constant 0 : index
    %c128 = arith.constant 128 : index
    %13 = vector.load %arg1[%c0_9, %c0_10, %c0_11, %c128] : memref<1x5x5x256xbf16, #tpu.memory_space<vmem>>, vector<1x4x4x64xbf16>
    %14 = vector.shape_cast %13 : vector<1x4x4x64xbf16> to vector<4x4x64xbf16>
    %15 = arith.extf %14 : vector<4x4x64xbf16> to vector<4x4x64xf32>
    %16 = arith.maximumf %12, %15 : vector<4x4x64xf32>
    %c0_12 = arith.constant 0 : index
    %c0_13 = arith.constant 0 : index
    %c0_14 = arith.constant 0 : index
    %c192 = arith.constant 192 : index
    %17 = vector.load %arg1[%c0_12, %c0_13, %c0_14, %c192] : memref<1x5x5x256xbf16, #tpu.memory_space<vmem>>, vector<1x4x4x64xbf16>
    %18 = vector.shape_cast %17 : vector<1x4x4x64xbf16> to vector<4x4x64xbf16>
    %19 = arith.extf %18 : vector<4x4x64xbf16> to vector<4x4x64xf32>
    %20 = arith.maximumf %16, %19 : vector<4x4x64xf32>
    %c0_15 = arith.constant 0 : index
    %c0_16 = arith.constant 0 : index
    %c1_17 = arith.constant 1 : index
    %c128_18 = arith.constant 128 : index
    %21 = vector.load %arg1[%c0_15, %c0_16, %c1_17, %c128_18] : memref<1x5x5x256xbf16, #tpu.memory_space<vmem>>, vector<1x4x4x64xbf16>
    %22 = vector.shape_cast %21 : vector<1x4x4x64xbf16> to vector<4x4x64xbf16>
    %23 = arith.extf %22 : vector<4x4x64xbf16> to vector<4x4x64xf32>
    %24 = arith.maximumf %20, %23 : vector<4x4x64xf32>
    %c0_19 = arith.constant 0 : index
    %c1_20 = arith.constant 1 : index
    %c0_21 = arith.constant 0 : index
    %c0_22 = arith.constant 0 : index
    %25 = vector.load %arg1[%c0_19, %c1_20, %c0_21, %c0_22] : memref<1x5x5x256xbf16, #tpu.memory_space<vmem>>, vector<1x4x4x64xbf16>
    %26 = vector.shape_cast %25 : vector<1x4x4x64xbf16> to vector<4x4x64xbf16>
    %27 = arith.extf %26 : vector<4x4x64xbf16> to vector<4x4x64xf32>
    %28 = arith.maximumf %24, %27 : vector<4x4x64xf32>
    %c0_23 = arith.constant 0 : index
    %c1_24 = arith.constant 1 : index
    %c0_25 = arith.constant 0 : index
    %c64_26 = arith.constant 64 : index
    %29 = vector.load %arg1[%c0_23, %c1_24, %c0_25, %c64_26] : memref<1x5x5x256xbf16, #tpu.memory_space<vmem>>, vector<1x4x4x64xbf16>
    %30 = vector.shape_cast %29 : vector<1x4x4x64xbf16> to vector<4x4x64xbf16>
    %31 = arith.extf %30 : vector<4x4x64xbf16> to vector<4x4x64xf32>
    %32 = arith.maximumf %28, %31 : vector<4x4x64xf32>
    %c0_27 = arith.constant 0 : index
    %c1_28 = arith.constant 1 : index
    %c1_29 = arith.constant 1 : index
    %c0_30 = arith.constant 0 : index
    %33 = vector.load %arg1[%c0_27, %c1_28, %c1_29, %c0_30] : memref<1x5x5x256xbf16, #tpu.memory_space<vmem>>, vector<1x4x4x64xbf16>
    %34 = vector.shape_cast %33 : vector<1x4x4x64xbf16> to vector<4x4x64xbf16>
    %35 = arith.extf %34 : vector<4x4x64xbf16> to vector<4x4x64xf32>
    %36 = arith.maximumf %32, %35 : vector<4x4x64xf32>
    %37 = arith.truncf %36 : vector<4x4x64xf32> to vector<4x4x64xbf16>
    %c0_31 = arith.constant 0 : index
    %c0_32 = arith.constant 0 : index
    %c0_33 = arith.constant 0 : index
    %c0_34 = arith.constant 0 : index
    %38 = vector.load %arg2[%c0_31, %c0_32, %c0_33, %c0_34] : memref<1x4x4x64xbf16, #tpu.memory_space<vmem>>, vector<1x4x4x64xbf16>
    %39 = vector.shape_cast %38 : vector<1x4x4x64xbf16> to vector<4x4x64xbf16>
    %40 = vector.shape_cast %37 : vector<4x4x64xbf16> to vector<1x4x4x64xbf16>
    tpu.vector_store %arg2[%c0_31, %c0_32, %c0_33, %c0_34], %40 {strides = array<i32>} : memref<1x4x4x64xbf16, #tpu.memory_space<vmem>>, vector<1x4x4x64xbf16>,
    return
  }
  func.func @transform_0(%arg0: i32) -> (i32, i32, i32, i32) {
    %c0_i32 = arith.constant 0 : i32
    %c0_i32_0 = arith.constant 0 : i32
    %c0_i32_1 = arith.constant 0 : i32
    %c0_i32_2 = arith.constant 0 : i32
    return %arg0, %c0_i32, %c0_i32_0, %c0_i32_1 : i32, i32, i32, i32
  }
  func.func @transform_1(%arg0: i32) -> (i32, i32, i32, i32) {
    %c0_i32 = arith.constant 0 : i32
    %c0_i32_0 = arith.constant 0 : i32
    %c0_i32_1 = arith.constant 0 : i32
    %c0_i32_2 = arith.constant 0 : i32
    return %arg0, %c0_i32, %c0_i32_0, %c0_i32_1 : i32, i32, i32, i32
  }
}

module attributes {stable_mosaic.version = 11 : i64} {
  func.func @_conv_kernel(%arg0: i32, %arg1: memref<1x38x64xbf16, #tpu.memory_space<vmem>>, %arg2: memref<576x64xbf16, #tpu.memory_space<vmem>>, %arg3: memref<1x64xf32, #tpu.memory_space<vmem>>, %arg4: memref<1x16x64xf32, #tpu.memory_space<vmem>>) attributes {dimension_semantics = [#tpu.dimension_semantics<parallel>], iteration_bounds = array<i64: 2>, scalar_prefetch = 0 : i64, scratch_operands = 0 : i64, tpu.core_type = #tpu.core_type<tc>, window_params = [{transform_indices = @transform_0, window_bounds = array<i64: 1, 38, 64>}, {pipeline_mode = #tpu.pipeline_mode<synchronous>, transform_indices = @transform_1, window_bounds = array<i64: 576, 64>}, {pipeline_mode = #tpu.pipeline_mode<synchronous>, transform_indices = @transform_2, window_bounds = array<i64: 1, 64>}, {transform_indices = @transform_3, window_bounds = array<i64: 1, 16, 64>}]} {
    %cst = arith.constant 0.000000e+00 : f32
    %0 = vector.broadcast %cst : f32 to vector<24x64xf32>
    %c0 = arith.constant 0 : index
    %c0_0 = arith.constant 0 : index
    %c0_1 = arith.constant 0 : index
    %1 = vector.load %arg1[%c0, %c0_0, %c0_1] : memref<1x38x64xbf16, #tpu.memory_space<vmem>>, vector<1x24x64xbf16>
    %2 = vector.shape_cast %1 : vector<1x24x64xbf16> to vector<24x64xbf16>
    %c0_2 = arith.constant 0 : index
    %c0_3 = arith.constant 0 : index
    %3 = vector.load %arg2[%c0_2, %c0_3] : memref<576x64xbf16, #tpu.memory_space<vmem>>, vector<64x64xbf16>
    %cst_4 = arith.constant dense<0.000000e+00> : vector<24x64xf32>
    %4 = tpu.matmul %2, %3, %cst_4 {dimension_numbers = #tpu.dot_dimension_numbers<[1], [0], [0], [1], [0, 0, 1, 1], [], []>} : vector<24x64xbf16>, vector<64x64xbf16>, vector<24x64xf32> -> vector<24x64xf32>
    %5 = arith.addf %0, %4 : vector<24x64xf32>
    %c0_5 = arith.constant 0 : index
    %c1 = arith.constant 1 : index
    %c0_6 = arith.constant 0 : index
    %6 = vector.load %arg1[%c0_5, %c1, %c0_6] : memref<1x38x64xbf16, #tpu.memory_space<vmem>>, vector<1x24x64xbf16>
    %7 = vector.shape_cast %6 : vector<1x24x64xbf16> to vector<24x64xbf16>
    %c64 = arith.constant 64 : index
    %c0_7 = arith.constant 0 : index
    %8 = vector.load %arg2[%c64, %c0_7] : memref<576x64xbf16, #tpu.memory_space<vmem>>, vector<64x64xbf16>
    %cst_8 = arith.constant dense<0.000000e+00> : vector<24x64xf32>
    %9 = tpu.matmul %7, %8, %cst_8 {dimension_numbers = #tpu.dot_dimension_numbers<[1], [0], [0], [1], [0, 0, 1, 1], [], []>} : vector<24x64xbf16>, vector<64x64xbf16>, vector<24x64xf32> -> vector<24x64xf32>
    %10 = arith.addf %5, %9 : vector<24x64xf32>
    %c0_9 = arith.constant 0 : index
    %c2 = arith.constant 2 : index
    %c0_10 = arith.constant 0 : index
    %11 = vector.load %arg1[%c0_9, %c2, %c0_10] : memref<1x38x64xbf16, #tpu.memory_space<vmem>>, vector<1x24x64xbf16>
    %12 = vector.shape_cast %11 : vector<1x24x64xbf16> to vector<24x64xbf16>
    %c128 = arith.constant 128 : index
    %c0_11 = arith.constant 0 : index
    %13 = vector.load %arg2[%c128, %c0_11] : memref<576x64xbf16, #tpu.memory_space<vmem>>, vector<64x64xbf16>
    %cst_12 = arith.constant dense<0.000000e+00> : vector<24x64xf32>
    %14 = tpu.matmul %12, %13, %cst_12 {dimension_numbers = #tpu.dot_dimension_numbers<[1], [0], [0], [1], [0, 0, 1, 1], [], []>} : vector<24x64xbf16>, vector<64x64xbf16>, vector<24x64xf32> -> vector<24x64xf32>
    %15 = arith.addf %10, %14 : vector<24x64xf32>
    %c0_13 = arith.constant 0 : index
    %c6 = arith.constant 6 : index
    %c0_14 = arith.constant 0 : index
    %16 = vector.load %arg1[%c0_13, %c6, %c0_14] : memref<1x38x64xbf16, #tpu.memory_space<vmem>>, vector<1x24x64xbf16>
    %17 = vector.shape_cast %16 : vector<1x24x64xbf16> to vector<24x64xbf16>
    %c192 = arith.constant 192 : index
    %c0_15 = arith.constant 0 : index
    %18 = vector.load %arg2[%c192, %c0_15] : memref<576x64xbf16, #tpu.memory_space<vmem>>, vector<64x64xbf16>
    %cst_16 = arith.constant dense<0.000000e+00> : vector<24x64xf32>
    %19 = tpu.matmul %17, %18, %cst_16 {dimension_numbers = #tpu.dot_dimension_numbers<[1], [0], [0], [1], [0, 0, 1, 1], [], []>} : vector<24x64xbf16>, vector<64x64xbf16>, vector<24x64xf32> -> vector<24x64xf32>
    %20 = arith.addf %15, %19 : vector<24x64xf32>
    %c0_17 = arith.constant 0 : index
    %c7 = arith.constant 7 : index
    %c0_18 = arith.constant 0 : index
    %21 = vector.load %arg1[%c0_17, %c7, %c0_18] : memref<1x38x64xbf16, #tpu.memory_space<vmem>>, vector<1x24x64xbf16>
    %22 = vector.shape_cast %21 : vector<1x24x64xbf16> to vector<24x64xbf16>
    %c256 = arith.constant 256 : index
    %c0_19 = arith.constant 0 : index
    %23 = vector.load %arg2[%c256, %c0_19] : memref<576x64xbf16, #tpu.memory_space<vmem>>, vector<64x64xbf16>
    %cst_20 = arith.constant dense<0.000000e+00> : vector<24x64xf32>
    %24 = tpu.matmul %22, %23, %cst_20 {dimension_numbers = #tpu.dot_dimension_numbers<[1], [0], [0], [1], [0, 0, 1, 1], [], []>} : vector<24x64xbf16>, vector<64x64xbf16>, vector<24x64xf32> -> vector<24x64xf32>
    %25 = arith.addf %20, %24 : vector<24x64xf32>
    %c0_21 = arith.constant 0 : index
    %c8 = arith.constant 8 : index
    %c0_22 = arith.constant 0 : index
    %26 = vector.load %arg1[%c0_21, %c8, %c0_22] : memref<1x38x64xbf16, #tpu.memory_space<vmem>>, vector<1x24x64xbf16>
    %27 = vector.shape_cast %26 : vector<1x24x64xbf16> to vector<24x64xbf16>
    %c320 = arith.constant 320 : index
    %c0_23 = arith.constant 0 : index
    %28 = vector.load %arg2[%c320, %c0_23] : memref<576x64xbf16, #tpu.memory_space<vmem>>, vector<64x64xbf16>
    %cst_24 = arith.constant dense<0.000000e+00> : vector<24x64xf32>
    %29 = tpu.matmul %27, %28, %cst_24 {dimension_numbers = #tpu.dot_dimension_numbers<[1], [0], [0], [1], [0, 0, 1, 1], [], []>} : vector<24x64xbf16>, vector<64x64xbf16>, vector<24x64xf32> -> vector<24x64xf32>
    %30 = arith.addf %25, %29 : vector<24x64xf32>
    %c0_25 = arith.constant 0 : index
    %c12 = arith.constant 12 : index
    %c0_26 = arith.constant 0 : index
    %31 = vector.load %arg1[%c0_25, %c12, %c0_26] : memref<1x38x64xbf16, #tpu.memory_space<vmem>>, vector<1x24x64xbf16>
    %32 = vector.shape_cast %31 : vector<1x24x64xbf16> to vector<24x64xbf16>
    %c384 = arith.constant 384 : index
    %c0_27 = arith.constant 0 : index
    %33 = vector.load %arg2[%c384, %c0_27] : memref<576x64xbf16, #tpu.memory_space<vmem>>, vector<64x64xbf16>
    %cst_28 = arith.constant dense<0.000000e+00> : vector<24x64xf32>
    %34 = tpu.matmul %32, %33, %cst_28 {dimension_numbers = #tpu.dot_dimension_numbers<[1], [0], [0], [1], [0, 0, 1, 1], [], []>} : vector<24x64xbf16>, vector<64x64xbf16>, vector<24x64xf32> -> vector<24x64xf32>
    %35 = arith.addf %30, %34 : vector<24x64xf32>
    %c0_29 = arith.constant 0 : index
    %c13 = arith.constant 13 : index
    %c0_30 = arith.constant 0 : index
    %36 = vector.load %arg1[%c0_29, %c13, %c0_30] : memref<1x38x64xbf16, #tpu.memory_space<vmem>>, vector<1x24x64xbf16>
    %37 = vector.shape_cast %36 : vector<1x24x64xbf16> to vector<24x64xbf16>
    %c448 = arith.constant 448 : index
    %c0_31 = arith.constant 0 : index
    %38 = vector.load %arg2[%c448, %c0_31] : memref<576x64xbf16, #tpu.memory_space<vmem>>, vector<64x64xbf16>
    %cst_32 = arith.constant dense<0.000000e+00> : vector<24x64xf32>
    %39 = tpu.matmul %37, %38, %cst_32 {dimension_numbers = #tpu.dot_dimension_numbers<[1], [0], [0], [1], [0, 0, 1, 1], [], []>} : vector<24x64xbf16>, vector<64x64xbf16>, vector<24x64xf32> -> vector<24x64xf32>
    %40 = arith.addf %35, %39 : vector<24x64xf32>
    %c0_33 = arith.constant 0 : index
    %c14 = arith.constant 14 : index
    %c0_34 = arith.constant 0 : index
    %41 = vector.load %arg1[%c0_33, %c14, %c0_34] : memref<1x38x64xbf16, #tpu.memory_space<vmem>>, vector<1x24x64xbf16>
    %42 = vector.shape_cast %41 : vector<1x24x64xbf16> to vector<24x64xbf16>
    %c512 = arith.constant 512 : index
    %c0_35 = arith.constant 0 : index
    %43 = vector.load %arg2[%c512, %c0_35] : memref<576x64xbf16, #tpu.memory_space<vmem>>, vector<64x64xbf16>
    %cst_36 = arith.constant dense<0.000000e+00> : vector<24x64xf32>
    %44 = tpu.matmul %42, %43, %cst_36 {dimension_numbers = #tpu.dot_dimension_numbers<[1], [0], [0], [1], [0, 0, 1, 1], [], []>} : vector<24x64xbf16>, vector<64x64xbf16>, vector<24x64xf32> -> vector<24x64xf32>
    %45 = arith.addf %40, %44 : vector<24x64xf32>
    %c0_37 = arith.constant 0 : index
    %c0_38 = arith.constant 0 : index
    %46 = vector.load %arg3[%c0_37, %c0_38] : memref<1x64xf32, #tpu.memory_space<vmem>>, vector<1x64xf32>
    %47 = vector.broadcast %46 : vector<1x64xf32> to vector<24x64xf32>
    %48 = arith.addf %45, %47 : vector<24x64xf32>
    %cst_39 = arith.constant 0.000000e+00 : f32
    %49 = vector.broadcast %cst_39 : f32 to vector<24x64xf32>
    %50 = arith.cmpf oge, %48, %49 : vector<24x64xf32>
    %cst_40 = arith.constant 1.000000e-01 : f32
    %51 = vector.broadcast %cst_40 : f32 to vector<24x64xf32>
    %52 = arith.mulf %51, %48 : vector<24x64xf32>
    %53 = arith.select %50, %48, %52 : vector<24x64xi1>, vector<24x64xf32>
    %54 = vector.extract_strided_slice %53 {offsets = [0, 0], sizes = [4, 64], strides = [1, 1]} : vector<24x64xf32> to vector<4x64xf32>
    %c0_41 = arith.constant 0 : index
    %c0_42 = arith.constant 0 : index
    %c0_43 = arith.constant 0 : index
    %55 = vector.load %arg4[%c0_41, %c0_42, %c0_43] : memref<1x16x64xf32, #tpu.memory_space<vmem>>, vector<1x4x64xf32>
    %56 = vector.shape_cast %55 : vector<1x4x64xf32> to vector<4x64xf32>
    %57 = vector.shape_cast %54 : vector<4x64xf32> to vector<1x4x64xf32>
    tpu.vector_store %arg4[%c0_41, %c0_42, %c0_43], %57 {strides = array<i32>} : memref<1x16x64xf32, #tpu.memory_space<vmem>>, vector<1x4x64xf32>,
    %58 = vector.extract_strided_slice %53 {offsets = [6, 0], sizes = [4, 64], strides = [1, 1]} : vector<24x64xf32> to vector<4x64xf32>
    %c0_44 = arith.constant 0 : index
    %c4 = arith.constant 4 : index
    %c0_45 = arith.constant 0 : index
    %59 = vector.load %arg4[%c0_44, %c4, %c0_45] : memref<1x16x64xf32, #tpu.memory_space<vmem>>, vector<1x4x64xf32>
    %60 = vector.shape_cast %59 : vector<1x4x64xf32> to vector<4x64xf32>
    %61 = vector.shape_cast %58 : vector<4x64xf32> to vector<1x4x64xf32>
    tpu.vector_store %arg4[%c0_44, %c4, %c0_45], %61 {strides = array<i32>} : memref<1x16x64xf32, #tpu.memory_space<vmem>>, vector<1x4x64xf32>,
    %62 = vector.extract_strided_slice %53 {offsets = [12, 0], sizes = [4, 64], strides = [1, 1]} : vector<24x64xf32> to vector<4x64xf32>
    %c0_46 = arith.constant 0 : index
    %c8_47 = arith.constant 8 : index
    %c0_48 = arith.constant 0 : index
    %63 = vector.load %arg4[%c0_46, %c8_47, %c0_48] : memref<1x16x64xf32, #tpu.memory_space<vmem>>, vector<1x4x64xf32>
    %64 = vector.shape_cast %63 : vector<1x4x64xf32> to vector<4x64xf32>
    %65 = vector.shape_cast %62 : vector<4x64xf32> to vector<1x4x64xf32>
    tpu.vector_store %arg4[%c0_46, %c8_47, %c0_48], %65 {strides = array<i32>} : memref<1x16x64xf32, #tpu.memory_space<vmem>>, vector<1x4x64xf32>,
    %66 = vector.extract_strided_slice %53 {offsets = [18, 0], sizes = [4, 64], strides = [1, 1]} : vector<24x64xf32> to vector<4x64xf32>
    %c0_49 = arith.constant 0 : index
    %c12_50 = arith.constant 12 : index
    %c0_51 = arith.constant 0 : index
    %67 = vector.load %arg4[%c0_49, %c12_50, %c0_51] : memref<1x16x64xf32, #tpu.memory_space<vmem>>, vector<1x4x64xf32>
    %68 = vector.shape_cast %67 : vector<1x4x64xf32> to vector<4x64xf32>
    %69 = vector.shape_cast %66 : vector<4x64xf32> to vector<1x4x64xf32>
    tpu.vector_store %arg4[%c0_49, %c12_50, %c0_51], %69 {strides = array<i32>} : memref<1x16x64xf32, #tpu.memory_space<vmem>>, vector<1x4x64xf32>,
    return
  }
  func.func @transform_0(%arg0: i32) -> (i32, i32, i32) {
    %c0_i32 = arith.constant 0 : i32
    %c0_i32_0 = arith.constant 0 : i32
    %c0_i32_1 = arith.constant 0 : i32
    return %arg0, %c0_i32, %c0_i32_0 : i32, i32, i32
  }
  func.func @transform_1(%arg0: i32) -> (i32, i32) {
    %c0_i32 = arith.constant 0 : i32
    %c0_i32_0 = arith.constant 0 : i32
    %c0_i32_1 = arith.constant 0 : i32
    return %c0_i32, %c0_i32_0 : i32, i32
  }
  func.func @transform_2(%arg0: i32) -> (i32, i32) {
    %c0_i32 = arith.constant 0 : i32
    %c0_i32_0 = arith.constant 0 : i32
    %c0_i32_1 = arith.constant 0 : i32
    return %c0_i32, %c0_i32_0 : i32, i32
  }
  func.func @transform_3(%arg0: i32) -> (i32, i32, i32) {
    %c0_i32 = arith.constant 0 : i32
    %c0_i32_0 = arith.constant 0 : i32
    %c0_i32_1 = arith.constant 0 : i32
    return %arg0, %c0_i32, %c0_i32_0 : i32, i32, i32
  }
}

</mosaic_0001>

<bundles_post_ra>
// kernel: downsample_forward.4
= control target key start
LH: loop header
LB: loop body
LE: loop exit
PB: predicated region body
PF: predicated region fallthrough
CT: control target
= control target key end

     0   :  { %s424_s6 = smov 0   ;;  %s537_s0 = inlined_call_operand.vmem [shape: bf16[2,5,5,256], index: 0, kind: input, shape index: {}]   ;;  %s538_s1 = inlined_call_operand.vmem [shape: bf16[2,4,4,64], index: 1, kind: output, shape index: {}]  }
   0x1 LB: > { %s346_s7 = sadd.s32 4294967295, %s411_s6   ;;  %p350_p0 = scmp.ge.s32.totalorder %s411_s6, 1  ;;  %s411_s6 = sphi %s424_s6, %s11_s6  }
   0x2   : > { %p87_p1 = scmp.lt.s32.totalorder %s411_s6, 3 }
   0x4   : > { %p88_p2 = pnand %p350_p0, %p87_p1 }
   0x5   : > { %p107_p3 = scmp.lt.s32.totalorder (!%p88_p2), %s346_s7, 1  ;;  %s413_s12 = smov (!%p88_p2), 64  }
   0x6   : > { %91 = sbr.rel (%p88_p2) target bundleno = 165 (0xa5), region = 24 }
   0xb   : > { %s540_s7 = smov (!%p107_p3, %s346_s7), 1  ;;  %vm286_vm0 = vcmask 517120  }
   0xc   : > { %s365_s8 = smul.u32 40, %s540_s7  ;;  %s364_s13 = sshll.u32 %s540_s7, 3 }
   0xd   : > { %s116_s16 = scalar_lea.vmem %s538_s1, %s364_s13 }
   0xe   : > { %s438_s11 = scalar_lea.vmem %s537_s0, %s365_s8 }
   0xf   : > { %v117_v0 = vld [vmem:[%s438_s11] sm:$0x3]  ;;  %v118_v1 = vld [vmem:[%s438_s11 + $0x8] sm:$0x3]  ;;  %v443_v2 = vld [vmem:[%s438_s11 + $0x4] sm:$0x3] }
  0x10   : > { %v121_v3 = vunpack.c.l.bf16 %v117_v0  ;;  %v122_v4 = vunpack.c.l.bf16 %v118_v1  ;;  %v446_v5 = vld [vmem:[%s438_s11 + $0xc] sm:$0x3]  ;;  %v173_v6 = vunpack.c.l.bf16 %v443_v2  ;;  %v451_v8 = vld [vmem:[%s438_s11 + $0x10] sm:$0x3]  ;;  %v454_v9 = vld [vmem:[%s438_s11 + $0x18] sm:$0x3] }
  0x11   : > { %v174_v7 = vunpack.c.l.bf16 %v446_v5  ;;  %v457_v10 = vld [vmem:[%s438_s11 + $0x8] sm:$0x3]  ;;  %v460_v12 = vld [vmem:[%s438_s11 + $0x14] sm:$0x3]  ;;  %v463_v13 = vld [vmem:[%s438_s11 + $0x1c] sm:$0x3]  ;;  %v123_v18 = vunpack.c.l.bf16 %v451_v8  ;;  %v124_v19 = vunpack.c.l.bf16 %v454_v9 }
  0x12   : > { %v375_v11 = vpack.i.bf16 %v122_v4, %v121_v3  ;;  %v466_v14 = vld [vmem:[%s438_s11 + $0x10] sm:$0x3]  ;;  %v230_v15 = vunpack.c.l.bf16 %v457_v10  ;;  %v473_v20 = vld [vmem:[%s438_s11 + $0x18] sm:$0x3]  ;;  %v476_v21 = vld [vmem:[%s438_s11 + $0x20] sm:$0x3]  ;;  %v175_v22 = vunpack.c.l.bf16 %v460_v12  ;;  %v176_v23 = vunpack.c.l.bf16 %v463_v13 }
  0x13   : > { %v385_v16 = vpack.i.bf16 %v174_v7, %v173_v6  ;;  %v231_v17 = vunpack.c.l.bf16 %v466_v14  ;;  %v232_v25 = vunpack.c.l.bf16 %v473_v20  ;;  %v233_v26 = vunpack.c.l.bf16 %v476_v21  ;;  %v145_v30 = vld [vmem:[%s438_s11] sm:$0x7]  ;;  %v146_v31 = vld [vmem:[%s438_s11 + $0x8] sm:$0x7]  ;;  %v201_v35 = vld [vmem:[%s438_s11 + $0x4] sm:$0x7] }
  0x14   : > { %376 = vrot.lane.b32.xlu0 %v375_v11, %s413_s12  ;;  %v380_v27 = vpack.i.bf16 %v124_v19, %v123_v18  ;;  %v390_v28 = vpack.i.bf16 %v176_v23, %v175_v22  ;;  %v149_v32 = vunpack.c.l.bf16 %v145_v30  ;;  %v150_v33 = vunpack.c.l.bf16 %v146_v31  ;;  %v202_v36 = vld [vmem:[%s438_s11 + $0xc] sm:$0x7]  ;;  %v147_v42 = vld [vmem:[%s438_s11 + $0x10] sm:$0x7]  ;;  %v148_v43 = vld [vmem:[%s438_s11 + $0x18] sm:$0x7] }
  0x15   : > { %386 = vrot.lane.b32.xlu1 %v385_v16, %s413_s12  ;;  %v395_v24 = vpack.i.bf16 %v231_v17, %v230_v15  ;;  %v400_v29 = vpack.i.bf16 %v233_v26, %v232_v25  ;;  %v205_v46 = vunpack.c.l.bf16 %v201_v35  ;;  %v206_v47 = vunpack.c.l.bf16 %v202_v36  ;;  %v358_v54 = vld [vmem:[%s438_s11 + $0x8] sm:$0x7]  ;;  %v359_v55 = vld [vmem:[%s438_s11 + $0x10] sm:$0x7]  ;;  %v203_v61 = vld [vmem:[%s438_s11 + $0x14] sm:$0x7] }
  0x16   : > { %v157_v37 = vrot.slane %v149_v32, 1  ;;  %v158_v38 = vrot.slane %v150_v33, 1  ;;  %v151_v48 = vunpack.c.l.bf16 %v147_v42  ;;  %v152_v49 = vunpack.c.l.bf16 %v148_v43  ;;  %v204_v62 = vld [vmem:[%s438_s11 + $0x1c] sm:$0x7]  ;;  %v361_v42 = vld [vmem:[%s438_s11 + $0x20] sm:$0x7] }
  0x17   : > { %396 = vrot.lane.b32.xlu2 %v395_v24, %s413_s12  ;;  %v213_v57 = vrot.slane %v205_v46, 1  ;;  %v214_v58 = vrot.slane %v206_v47, 1  ;;  %v262_v2 = vunpack.c.l.bf16 %v358_v54  ;;  %v208_v30 = vunpack.c.l.bf16 %v204_v62 }
  0x18   : > { %v159_v63 = vrot.slane %v151_v48, 1  ;;  %v160_v0 = vrot.slane %v152_v49, 1  ;;  %v265_v10 = vunpack.c.l.bf16 %v361_v42 }
  0x19   : > { %v270_v33 = vrot.slane %v262_v2, 1  ;;  %v216_v9 = vrot.slane %v208_v30, 1 }
  0x1c   : > { %381 = vrot.lane.b32.xlu0 %v380_v27, %s413_s12 }
  0x1d   : > { %391 = vrot.lane.b32.xlu1 %v390_v28, %s413_s12 }
  0x1f   : > { %401 = vrot.lane.b32.xlu2 %v400_v29, %s413_s12  ;;  %v207_v29 = vunpack.c.l.bf16 %v203_v61 }
  0x21   : > { %v215_v43 = vrot.slane %v207_v29, 1 }
  0x71   : > { %v397_v56 = vpop.permute.xlu2 %396 }
  0x72   : > { %v399_v27 = vunpack.i.h.bf16 %v397_v56  ;;  %v398_v28 = vunpack.i.l.bf16 %v397_v56 }
  0x86   : > { %v377_v34 = vpop.permute.xlu0 %376 }
  0x87   : > { %v379_v39 = vunpack.i.h.bf16 %v377_v34  ;;  %v378_v40 = vunpack.i.l.bf16 %v377_v34  ;;  %v387_v41 = vpop.permute.xlu1 %386 }
  0x88   : > { %v389_v52 = vunpack.i.h.bf16 %v387_v41  ;;  %v388_v53 = vunpack.i.l.bf16 %v387_v41  ;;  %v360_v41 = vld [vmem:[%s438_s11 + $0x18] sm:$0x7] }
  0x89   : > { %v142_v44 = vmax.f32 %v122_v4, %v379_v39  ;;  %v141_v45 = vmax.f32 %v121_v3, %v378_v40  ;;  %v263_v3 = vunpack.c.l.bf16 %v359_v55  ;;  %v264_v46 = vunpack.c.l.bf16 %v360_v41 }
  0x8b   : > { %v166_v50 = vmax.f32 %v142_v44, %v158_v38  ;;  %v165_v51 = vmax.f32 %v141_v45, %v157_v37  ;;  %v271_v34 = vrot.slane %v263_v3, 1  ;;  %v402_v45 = vpop.permute.xlu2 %401  ;;  %v272_v13 = vrot.slane %v264_v46, 1 }
  0x8c   : > { %v404_v48 = vunpack.i.h.bf16 %v402_v45  ;;  %v403_v49 = vunpack.i.l.bf16 %v402_v45 }
  0x8d   : > { %v177_v59 = vmax.f32 %v165_v51, %v173_v6  ;;  %v178_v60 = vmax.f32 %v166_v50, %v174_v7 }
  0x8e   : > { %v382_v1 = vpop.permute.xlu0 %381 }
  0x8f   : > { %v197_v4 = vmax.f32 %v177_v59, %v388_v53  ;;  %v198_v5 = vmax.f32 %v178_v60, %v389_v52  ;;  %v384_v11 = vunpack.i.h.bf16 %v382_v1  ;;  %v383_v16 = vunpack.i.l.bf16 %v382_v1  ;;  %v392_v24 = vpop.permute.xlu1 %391 }
  0x90   : > { %v394_v35 = vunpack.i.h.bf16 %v392_v24  ;;  %v393_v36 = vunpack.i.l.bf16 %v392_v24 }
  0x91   : > { %v221_v6 = vmax.f32 %v197_v4, %v213_v57  ;;  %v222_v7 = vmax.f32 %v198_v5, %v214_v58  ;;  %v144_v31 = vmax.f32 %v124_v19, %v384_v11  ;;  %v143_v32 = vmax.f32 %v123_v18, %v383_v16 }
  0x93   : > { %v168_v37 = vmax.f32 %v144_v31, %v160_v0  ;;  %v167_v38 = vmax.f32 %v143_v32, %v159_v63  ;;  %v234_v39 = vmax.f32 %v221_v6, %v230_v15  ;;  %v235_v40 = vmax.f32 %v222_v7, %v231_v17 }
  0x95   : > { %v254_v19 = vmax.f32 %v234_v39, %v398_v28  ;;  %v255_v8 = vmax.f32 %v235_v40, %v399_v27  ;;  %v179_v18 = vmax.f32 %v167_v38, %v175_v22  ;;  %v180_v44 = vmax.f32 %v168_v37, %v176_v23 }
  0x96   : > { %v273_v23 = vrot.slane %v265_v10, 1 }
  0x97   : > { %v278_v15 = vmax.f32 %v254_v19, %v270_v33  ;;  %v279_v47 = vmax.f32 %v255_v8, %v271_v34  ;;  %v199_v14 = vmax.f32 %v179_v18, %v393_v36  ;;  %v200_v17 = vmax.f32 %v180_v44, %v394_v35 }
  0x99   : > { %v282_v50 = vpack.c.bf16 %v278_v15, %v278_v15  ;;  %v283_v12 = vpack.c.bf16 %v279_v47, %v279_v47  ;;  %v223_v22 = vmax.f32 %v199_v14, %v215_v43  ;;  %v224_v51 = vmax.f32 %v200_v17, %v216_v9 }
  0x9b   : > { %287 = vst.msk [vmem:[%s116_s16] sm:$0x3] %vm286_vm0, %v282_v50  ;;  %v236_v52 = vmax.f32 %v223_v22, %v232_v25  ;;  %v237_v53 = vmax.f32 %v224_v51, %v233_v26 }
  0x9c   : > { %288 = vst.msk [vmem:[%s116_s16 + $0x2] sm:$0x3] %vm286_vm0, %v283_v12 }
  0x9d   : > { %v256_v54 = vmax.f32 %v236_v52, %v403_v49  ;;  %v257_v55 = vmax.f32 %v237_v53, %v404_v48 }
  0x9f   : > { %v280_v56 = vmax.f32 %v256_v54, %v272_v13  ;;  %v281_v57 = vmax.f32 %v257_v55, %v273_v23 }
  0xa1   : > { %v284_v58 = vpack.c.bf16 %v280_v56, %v280_v56  ;;  %v285_v59 = vpack.c.bf16 %v281_v57, %v281_v57 }
  0xa3   : > { %289 = vst.msk [vmem:[%s116_s16 + $0x4] sm:$0x3] %vm286_vm0, %v284_v58 }
  0xa4   : > { %290 = vst.msk [vmem:[%s116_s16 + $0x6] sm:$0x3] %vm286_vm0, %v285_v59 }
  0xa5 PF: > { %s11_s6 = sadd.s32 1, %s411_s6  }
  0xa6   : > { %p8_p4 = scmp.ge.s32.totalorder %s11_s6, 4  }
  0xa8   :  { %10 = sbr.rel (!%p8_p4) target bundleno = 1 (0x1), region = 55 }

// kernel: downsample_forward.5
= control target key start
LH: loop header
LB: loop body
LE: loop exit
PB: predicated region body
PF: predicated region fallthrough
CT: control target
= control target key end

     0   :  { %8 = vsyncpa [#allocation3], 0  ;;  %s1562_s0 = inlined_call_operand.vmem [shape: bf16[2,38,64], index: 0, kind: input, shape index: {}]   ;;  %s1563_s1 = inlined_call_operand.vmem [shape: bf16[576,64], index: 1, kind: input, shape index: {}]   ;;  %s1564_s2 = inlined_call_operand.vmem [shape: f32[1,64], index: 2, kind: input, shape index: {}]   ;;  %s1565_s3 = inlined_call_operand.hbm [shape: f32[2,16,64], index: 3, kind: output, shape index: {}]  }
   0x1   :  { %10 = vsyncpa [#allocation3 + $0x1], 0  ;;  %s1273_s12 = smov 0   ;;  %s1275_s13 = smov 0  }
   0x2   :  { %s1277_s14 = smov 0   ;;  %s1279_s15 = smov 0  }
   0x3 LB: > { %s1294_s16 = sadd.s32 4294967295, %s1249_s15   ;;  %s921_s17 = sadd.s32 4294967294, %s1249_s15   ;;  %s1249_s15 = sphi %s1279_s15, %s1571_s15   ;;  %s1245_s14 = sphi %s1277_s14, %s1570_s14   ;;  %s1241_s13 = sphi %s1275_s13, %s1569_s13   ;;  %s1237_s12 = sphi %s1273_s12, %s1568_s12  }
   0x4   : > { %s1298_s18 = sadd.s32 1, %s1249_s15   ;;  %s91_s19 = sadd.s32 1, %s1245_s14 }
   0x5   : > { %s88_s20 = ssub.s32 %s1249_s15, %s1298_s18  ;;  %p101_p0 = scmp.ne.s32.totalorder %s1245_s14, %s1241_s13 }
   0x6   : > { %p89_p1 = scmp.eq.s32.totalorder %s88_s20, 0  ;;  %p102_p2 = scmp.eq.s32.totalorder %s1294_s16, 1 }
   0x7   : > { %p107_p3 = scmp.ne.s32.totalorder %s1241_s13, %s1237_s12  ;;  %p108_p4 = scmp.eq.s32.totalorder %s921_s17, 1 }
   0x8   : > { %s1309_s21 = scalar_select %p89_p1, %s1245_s14, %s91_s19  }
   0x9   : > { %p1311_p5 = por %p102_p2, %p101_p0  ;;  %p1315_p6 = por %p108_p4, %p107_p3 }
   0xa   : > { %p924_p7 = scmp.ge.s32.totalorder %s1249_s15, 1  ;;  %p140_p8 = scmp.lt.s32.totalorder %s1249_s15, 3 }
   0xc   : > { %p141_p9 = pnand %p924_p7, %p140_p8 }
   0xd   : > { %p164_p10 = scmp.lt.s32.totalorder (!%p141_p9), %s1294_s16, 1  ;;  %s1130_s9 = sshll.u32 (!%p141_p9), %s1294_s16, 4 }
   0xe   : > { %144 = sbr.rel (%p141_p9) target bundleno = 244 (0xf4), region = 32  ;;  %s855_s17 = scalar_lea.hbm (!%p141_p9), %s1565_s3, %s1130_s9 }
   0xf   : > { %s858_s19 = sshll.u32 (!%p141_p9), %s855_s17, 4  ;;  %s1207_s29 = scalar_lea.hbm (!%p141_p9), %s1565_s3, 32  ;;  %s859_s19 = int_to_ptr.hbm [resolvable:$true] %s858_s19 }
  0x10   : > { %s1201_s24 = sshra.s32 (!%p141_p9), %s859_s19, 4  ;;  %s1202_s24 = int_to_ptr.hbm [resolvable:$true] %s1201_s24 }
  0x11   : > { %s1203_s25 = scalar_lea.hbm (!%p141_p9), %s1202_s24, 16  ;;  %p1208_p0 = scmp.lt.s32.totalorder (!%p141_p9), %s1202_s24, %s1565_s3 }
  0x12   : > { %p1204_p11 = scmp.ne.s32.totalorder (!%p141_p9), %s1202_s24, %s1203_s25  ;;  %p1209_p1 = scmp.lt.s32.totalorder (!%p141_p9), %s1207_s29, %s1203_s25 }
  0x13   : > { %v1101_v0 = vld [vmem:[%s1563_s1 + $0x38] sm:$0xff]  ;;  %v1100_v3 = vld [vmem:[%s1563_s1 + $0x30] sm:$0xff]  ;;  %s165_s5 = scalar_select %p164_p10, %s1294_s16, 1  ;;  %v1099_v6 = vld [vmem:[%s1563_s1 + $0x28] sm:$0xff]  ;;  %vm325_vm0 = vcmask 1046528   ;;  %vm240_vm2 = vcmask 523264  }
  0x14   : > { %v1105_v1 = vld [vmem:[%s1563_s1 + $0x58] sm:$0xff]  ;;  %251 = vmatpush.bf16.msra.mxu0 %v1101_v0  ;;  %1140 = vmatpush.bf16.msra.mxu1 %v1101_v0  ;;  %v1104_v4 = vld [vmem:[%s1563_s1 + $0x50] sm:$0xff]  ;;  %v1103_v7 = vld [vmem:[%s1563_s1 + $0x48] sm:$0xff]  ;;  %vm200_vm1 = vsmask.f32 7424  ;;  %vm396_vm3 = vcmask 1044480   ;;  %p1205_p12 = pnand %p1204_p11, %p1311_p5  ;;  %p1210_p2 = por %p1209_p1, %p1208_p0 }
  0x15   : > { %v1109_v2 = vld [vmem:[%s1563_s1 + $0x78] sm:$0xff]  ;;  %363 = vmatpush.bf16.msra.mxu2 %v1105_v1  ;;  %v1108_v5 = vld [vmem:[%s1563_s1 + $0x70] sm:$0xff]  ;;  %s1144_s10 = smul.u32 20, %s165_s5  ;;  %v1107_v8 = vld [vmem:[%s1563_s1 + $0x68] sm:$0xff]  ;;  %vm463_vm4 = vsmask.f32 4352 }
  0x16   : > { %434 = vmatpush.bf16.msra.mxu3 %v1109_v2  ;;  %v1098_v22 = vld [vmem:[%s1563_s1 + $0x20] sm:$0xff]  ;;  %v1097_v27 = vld [vmem:[%s1563_s1 + $0x18] sm:$0xff]  ;;  %v1096_v42 = vld [vmem:[%s1563_s1 + $0x10] sm:$0xff]  ;;  %vm615_vm5 = vcmask 1045504   ;;  %vm682_vm6 = vsmask.f32 5376  ;;  %p1206_p13 = pneg %p1205_p12 }
  0x17   : > { %s1353_s28 = scalar_lea.vmem %s1562_s0, %s1144_s10  ;;  %v1102_v28 = vld [vmem:[%s1563_s1 + $0x40] sm:$0xff]  ;;  %v1113_v34 = vld [vmem:[%s1563_s1 + $0x98] sm:$0xff]  ;;  %v1112_v47 = vld [vmem:[%s1563_s1 + $0x90] sm:$0xff]  ;;  %vm833_vm7 = vcmask 519168   ;;  %vm835_vm9 = vcmask 523270   ;;  %vm837_vm11 = vcmask 517120  }
  0x18   : > { %252 = vmatpush.bf16.msra.mxu0 %v1100_v3  ;;  %1141 = vmatpush.bf16.msra.mxu1 %v1100_v3  ;;  %v1356_v9 = vld [vmem:[%s1353_s28] sm:$0xff]   ;;  %v1359_v10 = vld [vmem:[%s1353_s28 + $0x8] sm:$0xff]   ;;  %v1121_v40 = vld [vmem:[%s1563_s1 + $0xd8] sm:$0xff]  ;;  %vm839_vm12 = vcmask 523268   ;;  %vm841_vm14 = vcmask 521218   ;;  %p1211_p3 = pnand %p1210_p2, %p1206_p13 }
  0x19   : > { %364 = vmatpush.bf16.msra.mxu2 %v1104_v4  ;;  %v181_v11 = vld [vmem:[%s1353_s28 + $0xc] sm:$0x1]  ;;  %v1363_v12 = vunpack.c.l.b16 %v1359_v10  ;;  %v202_v14 = vshrl.u32 %v1356_v9, 16  ;;  %v204_v15 = vshll.u32 %v1356_v9, 16  ;;  %v313_v16 = vld [vmem:[%s1353_s28] sm:$0xe]  ;;  %v1370_v18 = vunpack.c.h.b16 %v1356_v9 }
  0x1a   : > { %435 = vmatpush.bf16.msra.mxu3 %v1108_v5  ;;  %v197_v13 = vunpack.c.l.b16 %v181_v11  ;;  %v380_v17 = vld [vmem:[%s1353_s28] sm:$0x8]  ;;  %v323_v19 = vunpack.c.l.b16 %v313_v16  ;;  %v381_v20 = vld [vmem:[%s1353_s28 + $0xc] sm:$0x7]  ;;  %v461_v26 = vunpack.c.h.b16 %v1359_v10  ;;  %v1125_v48 = vld [vmem:[%s1563_s1 + $0xf8] sm:$0xff]  ;;  %v473_v53 = vshrl.u32 %v1359_v10, 16 }
  0x1b   : > { %v392_v21 = vunpack.c.l.b16 %v380_v17  ;;  %v206_v24 = vrot.slane %v204_v15, 1  ;;  %v393_v25 = vunpack.c.l.b16 %v381_v20  ;;  %v1106_v35 = vld [vmem:[%s1563_s1 + $0x60] sm:$0xff]  ;;  %v1120_v50 = vld [vmem:[%s1563_s1 + $0xd0] sm:$0xff]  ;;  %v476_v54 = vshll.u32 %v1359_v10, 16  ;;  %v1095_v55 = vld [vmem:[%s1563_s1 + $0x8] sm:$0xff] }
  0x1c   : > { %253 = vmatpush.bf16.msra.mxu0 %v1099_v6  ;;  %1142 = vmatpush.bf16.msra.mxu1 %v1099_v6  ;;  %v1377_v23 = vpack.c.b16 %v197_v13, %v1363_v12  ;;  %v324_v29 = vpack.c.b16 %v1370_v18, %v323_v19  ;;  %v1111_v56 = vld [vmem:[%s1563_s1 + $0x88] sm:$0xff]  ;;  %v1124_v57 = vld [vmem:[%s1563_s1 + $0xf0] sm:$0xff]  ;;  %v475_v61 = vrot.slane %v473_v53, 3  ;;  %v1094_v63 = vld [vmem:[%s1563_s1] sm:$0xff]  ;;  %v541_v53 = vpack.c.b16 %v461_v26, %v461_v26 }
  0x1d   : > { %365 = vmatpush.bf16.msra.mxu2 %v1103_v7  ;;  %v394_v30 = vpack.c.b16 %v1370_v18, %v392_v21  ;;  %v207_v31 = vor.u32 %v206_v24, %v202_v14  ;;  %v1398_v38 = vpack.c.b16 %v393_v25, %v1363_v12  ;;  %v1119_v58 = vld [vmem:[%s1563_s1 + $0xc8] sm:$0xff]  ;;  %v478_v62 = vrot.slane %v476_v54, 4  ;;  %v1110_v0 = vld [vmem:[%s1563_s1 + $0x80] sm:$0xff]  ;;  %v1117_v1 = vld [vmem:[%s1563_s1 + $0xb8] sm:$0xff] }
  0x1e   : > { %436 = vmatpush.bf16.msra.mxu3 %v1107_v8  ;;  %v209_v32 = vshll.u32 %v1377_v23, 16  ;;  %v213_v33 = vshrl.u32 %v1377_v23, 16  ;;  %v327_v36 = vrot.slane %v1377_v23, 1  ;;  %v326_v37 = vrot.slane %v324_v29, 1  ;;  %v1129_v2 = vld [vmem:[%s1563_s1 + $0x118] sm:$0xff]  ;;  %v1123_v3 = vld [vmem:[%s1563_s1 + $0xe8] sm:$0xff] }
  0x1f   : > { %v397_v39 = vrot.slane %v394_v30, 3  ;;  %v398_v44 = vrot.slane %v1398_v38, 3  ;;  %v465_v51 = vshrl.u32 %v394_v30, 16  ;;  %v468_v52 = vshll.u32 %v394_v30, 16  ;;  %v593_v4 = vld [vmem:[%s1353_s28 + $0x4] sm:$0xc] }
  0x20   : > { %254 = vmatpush.bf16.msra.mxu0 %v1098_v22  ;;  %1143 = vmatpush.bf16.msra.mxu1 %v1098_v22  ;;  %v211_v41 = vrot.slane %v209_v32, 1  ;;  %v328_v43 = vsel %vm325_vm0, %v326_v37, %v327_v36  ;;  %v1457_v5 = vld [vmem:[%s1353_s28 + $0x8] sm:$0xff]   ;;  %v670_v6 = vld [vmem:[%s1353_s28 + $0x10] sm:$0x7]  ;;  %v479_v8 = vor.u32 %v478_v62, %v475_v61  ;;  %v1118_v11 = vld [vmem:[%s1563_s1 + $0xc0] sm:$0xff]  ;;  %v609_v16 = vunpack.c.l.b16 %v593_v4 }
  0x21   : > { %366 = vmatpush.bf16.msra.mxu2 %v1102_v28  ;;  %v399_v49 = vsel %vm396_vm3, %v397_v39, %v398_v44  ;;  %v467_v59 = vrot.slane %v465_v51, 3  ;;  %v470_v60 = vrot.slane %v468_v52, 4  ;;  %v1116_v13 = vld [vmem:[%s1563_s1 + $0xb0] sm:$0xff]  ;;  %v1137_v14 = vunpack.c.l.b16 %v1457_v5  ;;  %v1122_v19 = vld [vmem:[%s1563_s1 + $0xe0] sm:$0xff]  ;;  %v1115_v22 = vld [vmem:[%s1563_s1 + $0xa8] sm:$0xff] }
  0x22   : > { %v212_v45 = vsel %vm200_vm1, %v207_v31, %v211_v41  ;;  %v215_v46 = vor.u32 %v213_v33, %v211_v41  ;;  %437 = vmatpush.bf16.msra.mxu3 %v1106_v35  ;;  %v1138_v15 = vunpack.c.h.b16 %v1457_v5  ;;  %v680_v17 = vunpack.c.l.b16 %v670_v6  ;;  %v1128_v21 = vld [vmem:[%s1563_s1 + $0x110] sm:$0xff]  ;;  %v1127_v29 = vld [vmem:[%s1563_s1 + $0x108] sm:$0xff] }
  0x23   : > { %943 = vmatmul.msk.bf16.vlgmr.msra.gmra.mxu0 %vm240_vm2, %v212_v45  ;;  %v471_v7 = vor.u32 %v470_v60, %v467_v59  ;;  %v596_v24 = vld [vmem:[%s1353_s28 + $0x10] sm:$0x3]  ;;  %v613_v25 = vpack.c.b16 %v1137_v14, %v609_v16  ;;  %v751_v45 = vld [vmem:[%s1353_s28 + $0x4] sm:$0x8]  ;;  %v540_v51 = vpack.c.b16 %v1363_v12, %v1370_v18  ;;  %s161_s28 = sand.u32 1, %s1241_s13  }
  0x24   : > { %299 = vmatpush.bf16.msrb.mxu1 %v1097_v27  ;;  %515 = vmatpush.bf16.msrb.mxu0 %v1113_v34  ;;  %v681_v27 = vpack.c.b16 %v680_v17, %v1138_v15  ;;  %v612_v28 = vunpack.c.l.b16 %v596_v24  ;;  %v1126_v34 = vld [vmem:[%s1563_s1 + $0x100] sm:$0xff]  ;;  %s925_s7 = sshll.u32 %s161_s28, 4  ;;  %s844_s20 = scalar_lea.sflag [#allocation3], %s161_s28 }
  0x25   : > { %653 = vmatpush.bf16.msrb.mxu2 %v1121_v40  ;;  %944 = vmatmul.msk.bf16.vlgmr.msra.gmra.mxu1 %vm240_vm2, %v215_v46  ;;  %v480_v20 = vsel %vm463_vm4, %v471_v7, %v479_v8  ;;  %v684_v30 = vshrl.u32 %v613_v25, 16  ;;  %v687_v31 = vshll.u32 %v613_v25, 16  ;;  %v616_v39 = vrot.slane %v613_v25, 2  ;;  %s1521_s8 = scalar_lea.vmem [#allocation2], %s925_s7 }
  0x26   : > { %979 = vmatmul.msk.bf16.vlgmr.msra.gmra.mxu2 %vm240_vm2, %v328_v43  ;;  %997 = vmatmul.msk.bf16.vlgmr.msra.gmra.mxu3 %vm240_vm2, %v399_v49  ;;  %v692_v32 = vshrl.u32 %v681_v27, 16  ;;  %v695_v33 = vshll.u32 %v681_v27, 16  ;;  %v614_v23 = vpack.c.b16 %v612_v28, %v1138_v15  ;;  %v265_v43 = vpack.c.b16 %v1363_v12, %v1363_v12  ;;  %s856_s16 = sshll.u32 %s1521_s8, 4  ;;  %s857_s16 = int_to_ptr.vmem [resolvable:$true] %s856_s16 }
  0x27   : > { %734 = vmatpush.bf16.msrb.mxu3 %v1125_v48  ;;  %v686_v35 = vrot.slane %v684_v30, 2 }
  0x28   : > { %300 = vmatpush.bf16.msrb.mxu1 %v1096_v42  ;;  %516 = vmatpush.bf16.msrb.mxu0 %v1112_v47  ;;  %v694_v37 = vrot.slane %v692_v32, 2  ;;  %v697_v38 = vrot.slane %v695_v33, 3  ;;  %v617_v40 = vrot.slane %v614_v23, 2  ;;  %v761_v47 = vunpack.c.l.b16 %v751_v45 }
  0x29   : > { %654 = vmatpush.bf16.msrb.mxu2 %v1120_v50  ;;  %v764_v50 = vrot.slane %v681_v27, 3 }
  0x2a   : > { %v698_v42 = vor.u32 %v697_v38, %v694_v37  ;;  %v762_v48 = vpack.c.b16 %v1137_v14, %v761_v47 }
  0x2b   : > { %735 = vmatpush.bf16.msrb.mxu3 %v1124_v57 }
  0x2c   : > { %301 = vmatpush.bf16.msrb.mxu1 %v1095_v55  ;;  %517 = vmatpush.bf16.msrb.mxu0 %v1111_v56  ;;  %v763_v49 = vrot.slane %v762_v48, 3 }
  0x2d   : > { %655 = vmatpush.bf16.msrb.mxu2 %v1119_v58 }
  0x2e   : > { %v765_v52 = vsel %vm396_vm3, %v763_v49, %v764_v50 }
  0x2f   : > { %736 = vmatpush.bf16.msrb.mxu3 %v1123_v3 }
  0x30   : > { %302 = vmatpush.bf16.msrb.mxu1 %v1094_v63  ;;  %518 = vmatpush.bf16.msrb.mxu0 %v1110_v0 }
  0x31   : > { %656 = vmatpush.bf16.msrb.mxu2 %v1118_v11 }
  0x33   : > { %1015 = vmatmul.msk.bf16.vlgmr.msrb.gmra.mxu0 %vm240_vm2, %v480_v20  ;;  %737 = vmatpush.bf16.msrb.mxu3 %v1122_v19 }
  0x34   : > { %576 = vmatpush.bf16.msra.mxu1 %v1117_v1  ;;  %800 = vmatpush.bf16.msra.mxu0 %v1129_v2 }
  0x35   : > { %961 = vmatmul.msk.bf16.vlgmr.msrb.gmra.mxu1 %vm240_vm2, %v1356_v9  ;;  %v1114_v9 = vld [vmem:[%s1563_s1 + $0xa0] sm:$0xff] }
  0x36   : > { %980 = vmatmul.msk.bf16.gmra.mxu2 %vm240_vm2, %v327_v36  ;;  %998 = vmatmul.msk.bf16.gmra.mxu3 %vm240_vm2, %v398_v44  ;;  %v689_v36 = vrot.slane %v687_v31, 3  ;;  %v618_v44 = vsel %vm615_vm5, %v616_v39, %v617_v40 }
  0x38   : > { %577 = vmatpush.bf16.msra.mxu1 %v1116_v13  ;;  %801 = vmatpush.bf16.msra.mxu0 %v1128_v21  ;;  %v690_v41 = vor.u32 %v689_v36, %v686_v35 }
  0x3a   : > { %v699_v46 = vsel %vm682_vm6, %v690_v41, %v698_v42 }
  0x3c   : > { %578 = vmatpush.bf16.msra.mxu1 %v1115_v22  ;;  %802 = vmatpush.bf16.msra.mxu0 %v1127_v29  ;;  %v1186_v29 = vld [vmem:[%s1564_s2] ss:$0 sm:$0xff] }
  0x40   : > { %579 = vmatpush.bf16.msra.mxu1 %v1114_v9  ;;  %803 = vmatpush.bf16.msra.mxu0 %v1126_v34 }
  0x43   : > { %1016 = vmatmul.msk.bf16.gmra.mxu0 %vm240_vm2, %v479_v8 }
  0x45   : > { %962 = vmatmul.msk.bf16.gmra.mxu1 %vm240_vm2, %v265_v43 }
  0x46   : > { %1051 = vmatmul.msk.bf16.vlgmr.msrb.gmra.mxu2 %vm240_vm2, %v618_v44  ;;  %1069 = vmatmul.msk.bf16.vlgmr.msrb.gmra.mxu3 %vm240_vm2, %v699_v46 }
  0x53   : > { %1087 = vmatmul.msk.bf16.vlgmr.msra.gmra.mxu0 %vm240_vm2, %v765_v52 }
  0x55   : > { %1033 = vmatmul.msk.bf16.vlgmr.msra.gmra.mxu1 %vm240_vm2, %v540_v51 }
  0x56   : > { %1052 = vmatmul.msk.bf16.gmra.mxu2 %vm240_vm2, %v617_v40  ;;  %1070 = vmatmul.msk.bf16.gmra.mxu3 %vm240_vm2, %v698_v42 }
  0x63   : > { %1088 = vmatmul.msk.bf16.gmra.mxu0 %vm240_vm2, %v764_v50 }
  0x65   : > { %1034 = vmatmul.msk.bf16.gmra.mxu1 %vm240_vm2, %v541_v53 }
  0xa0   : > { %v256_v54 = vpop.f32.mrf.mxu0 }
  0xa2   : > { %v261_v12 = vpop.f32.mrf.mxu1 }
  0xa8   : > { %v258_v55 = vpop.f32.mrf.mxu0 }
  0xa9   : > { %v368_v18 = vpop.f32.mrf.mxu2  ;;  %v439_v56 = vpop.f32.mrf.mxu3 }
  0xaa   : > { %v263_v57 = vpop.f32.mrf.mxu1 }
  0xb0   : > { %v520_v59 = vpop.f32.mrf.mxu0 }
  0xb1   : > { %v370_v58 = vpop.f32.mrf.mxu2  ;;  %v441_v60 = vpop.f32.mrf.mxu3 }
  0xb2   : > { %v304_v61 = vpop.f32.mrf.mxu1 }
  0xb3   : > { %v305_v4 = vadd.f32 %v304_v61, %v256_v54 }
  0xb5   : > { %v377_v6 = vadd.f32 %v368_v18, %v305_v4 }
  0xb7   : > { %v448_v13 = vadd.f32 %v439_v56, %v377_v6 }
  0xb8   : > { %v522_v63 = vpop.f32.mrf.mxu0 }
  0xb9   : > { %v373_v62 = vpop.f32.mrf.mxu2  ;;  %v444_v0 = vpop.f32.mrf.mxu3  ;;  %v529_v16 = vadd.f32 %v520_v59, %v448_v13 }
  0xba   : > { %v306_v10 = vpop.f32.mrf.mxu1 }
  0xbb   : > { %v307_v14 = vadd.f32 %v306_v10, %v258_v55 }
  0xbd   : > { %v378_v17 = vadd.f32 %v370_v58, %v307_v14 }
  0xbf   : > { %v449_v24 = vadd.f32 %v441_v60, %v378_v17 }
  0xc0   : > { %v525_v26 = vpop.f32.mrf.mxu0 }
  0xc1   : > { %v375_v1 = vpop.f32.mrf.mxu2  ;;  %v446_v2 = vpop.f32.mrf.mxu3  ;;  %v530_v31 = vadd.f32 %v522_v63, %v449_v24 }
  0xc2   : > { %v309_v3 = vpop.f32.mrf.mxu1 }
  0xc3   : > { %v310_v25 = vadd.f32 %v309_v3, %v261_v12 }
  0xc5   : > { %v379_v32 = vadd.f32 %v373_v62, %v310_v25 }
  0xc7   : > { %v450_v37 = vadd.f32 %v444_v0, %v379_v32 }
  0xc8   : > { %v527_v7 = vpop.f32.mrf.mxu0 }
  0xc9   : > { %v658_v5 = vpop.f32.mrf.mxu2  ;;  %v739_v8 = vpop.f32.mrf.mxu3  ;;  %v531_v43 = vadd.f32 %v525_v26, %v450_v37 }
  0xca   : > { %v311_v11 = vpop.f32.mrf.mxu1 }
  0xd0   : > { %v805_v19 = vpop.f32.mrf.mxu0 }
  0xd1   : > { %v660_v15 = vpop.f32.mrf.mxu2  ;;  %v741_v20 = vpop.f32.mrf.mxu3 }
  0xd2   : > { %v581_v21 = vpop.f32.mrf.mxu1 }
  0xd3   : > { %v590_v22 = vadd.f32 %v581_v21, %v529_v16 }
  0xd5   : > { %v667_v27 = vadd.f32 %v658_v5, %v590_v22 }
  0xd7   : > { %v748_v28 = vadd.f32 %v739_v8, %v667_v27 }
  0xd8   : > { %v807_v9 = vpop.f32.mrf.mxu0 }
  0xd9   : > { %v663_v30 = vpop.f32.mrf.mxu2  ;;  %v814_v33 = vadd.f32 %v805_v19, %v748_v28  ;;  %v744_v23 = vpop.f32.mrf.mxu3 }
  0xda   : > { %v583_v34 = vpop.f32.mrf.mxu1 }
  0xdb   : > { %v821_v35 = vadd.f32 %v1186_v29, %v814_v33  ;;  %v591_v36 = vadd.f32 %v583_v34, %v530_v31 }
  0xdd   : > { %vm824_vm8 = vcmp.ge.f32.partialorder %v821_v35, 0.0  ;;  %v827_v38 = vmul.f32 0.1, %v821_v35  ;;  %v668_v39 = vadd.f32 %v660_v15, %v591_v36 }
  0xdf   : > { %v830_v40 = vsel %vm824_vm8, %v821_v35, %v827_v38  ;;  %v749_v41 = vadd.f32 %v741_v20, %v668_v39 }
  0xe0   : > { %834 = vst.msk [vmem:[%s1521_s8] sm:$0xf] %vm833_vm7, %v830_v40  ;;  %v810_v45 = vpop.f32.mrf.mxu0 }
  0xe1   : > { %v665_v42 = vpop.f32.mrf.mxu2  ;;  %836 = vst.msk [vmem:[%s1521_s8 - $0x2] sm:$0xc0] %vm835_vm9, %v830_v40  ;;  %v815_v44 = vadd.f32 %v807_v9, %v749_v41  ;;  %v746_v46 = vpop.f32.mrf.mxu3 }
  0xe2   : > { %v586_v47 = vpop.f32.mrf.mxu1 }
  0xe3   : > { %v822_v48 = vadd.f32 %v1186_v29, %v815_v44  ;;  %v592_v49 = vadd.f32 %v586_v47, %v531_v43 }
  0xe5   : > { %vm825_vm10 = vcmp.ge.f32.partialorder %v822_v48, 0.0  ;;  %v828_v50 = vmul.f32 0.1, %v822_v48  ;;  %v669_v51 = vadd.f32 %v663_v30, %v592_v49 }
  0xe7   : > { %v831_v52 = vsel %vm825_vm10, %v822_v48, %v828_v50  ;;  %v750_v53 = vadd.f32 %v744_v23, %v669_v51 }
  0xe8   : > { %838 = vst.msk [vmem:[%s1521_s8 + $0x6] sm:$0x3] %vm837_vm11, %v831_v52  ;;  %v812_v12 = vpop.f32.mrf.mxu0 }
  0xe9   : > { %840 = vst.msk [vmem:[%s1521_s8 + $0x4] sm:$0xf0] %vm839_vm12, %v831_v52  ;;  %v816_v54 = vadd.f32 %v810_v45, %v750_v53 }
  0xea   : > { %v588_v18 = vpop.f32.mrf.mxu1 }
  0xeb   : > { %v823_v55 = vadd.f32 %v1186_v29, %v816_v54 }
  0xed   : > { %vm826_vm13 = vcmp.ge.f32.partialorder %v823_v55, 0.0  ;;  %v829_v56 = vmul.f32 0.1, %v823_v55 }
  0xef   : > { %v832_v57 = vsel %vm826_vm13, %v823_v55, %v829_v56 }
  0xf0   : > { %842 = vst.msk [vmem:[%s1521_s8 + $0xa] sm:$0x3c] %vm841_vm14, %v832_v57 }
  0xf1   : > { %1214 = shalt.err (!%p1211_p3)
}
  0xf2   : > { %s1251_s28 = smov 128   ;;  %s1252_s5 = smov 8  }
  0xf3   : > { %1145 = dma.vmem_to_hbm [thread:$0]  (%p1311_p5), %s857_s16, 256, %s859_s19, %s844_s20, %s1251_s28, %s1251_s28, %s1252_s5  }
  0xf4 PF: > { %p1151_p4 = scmp.ge.s32.totalorder %s1249_s15, 2  ;;  %s873_s6 = sand.u32 1, %s1237_s12  }
  0xf5   : > { %s874_s7 = scalar_lea.sflag [#allocation3], %s873_s6 }
  0xf6   : > { %p1148_p7 = pnand %p1151_p4, %p1315_p6 }
  0xf8   : > { %p1149_p8 = pneg %p1148_p7 }
  0xfa   : > { %1232 = dma.done.wait (%p1149_p8), %s874_s7, 256  }
  0xfb   : > { %1234 = vsyncadd (%p1149_p8), %s874_s7, 4294967040  ;;  %p13_p9 = scmp.ge.s32.totalorder %s1298_s18, 4   ;;  %s1568_s12 = smov %s1241_s13 }
  0xfc   : > { %s1569_s13 = smov %s1245_s14  ;;  %s1570_s14 = smov %s1309_s21 }
  0xfd   : > { %s1571_s15 = smov %s1298_s18  ;;  %15 = sbr.rel (!%p13_p9) target bundleno = 3 (0x3), region = 67 }
 0x102   :  { %880 = vsyncpa [#allocation3], 1 }
 0x103   :  { %882 = vsyncpa [#allocation3 + $0x1], 1 }

// kernel: downsample_forward.3
= control target key start
LH: loop header
LB: loop body
LE: loop exit
PB: predicated region body
PF: predicated region fallthrough
CT: control target
= control target key end

     0   :  { %s6693_s12 = smov 0   ;;  %s8902_s0 = inlined_call_operand.vmem [shape: bf16[2,124,256], index: 0, kind: input, shape index: {}]   ;;  %s8903_s1 = inlined_call_operand.vmem [shape: bf16[4096,64], index: 1, kind: input, shape index: {}]   ;;  %s8904_s2 = inlined_call_operand.vmem [shape: f32[1,64], index: 2, kind: input, shape index: {}]   ;;  %s8905_s3 = inlined_call_operand.vmem [shape: bf16[2,64,64], index: 3, kind: output, shape index: {}]  }
   0x1 LB: > { %s5179_s13 = sadd.s32 4294967295, %s6671_s12   ;;  %p5183_p0 = scmp.ge.s32.totalorder %s6671_s12, 1  ;;  %s6671_s12 = sphi %s6693_s12, %s13_s12  }
   0x2   : > { %p137_p1 = scmp.lt.s32.totalorder %s6671_s12, 3 }
   0x4   : > { %p138_p2 = pnand %p5183_p0, %p137_p1 }
   0x5   : > { %p161_p3 = scmp.lt.s32.totalorder (!%p138_p2), %s5179_s13, 1 }
   0x6   : > { %141 = sbr.rel (%p138_p2) target bundleno = 946 (0x3b2), region = 32 }
   0xb   : > { %v6395_v0 = vld [vmem:[%s8903_s1 + $0xb8] sm:$0xff]  ;;  %v6394_v4 = vld [vmem:[%s8903_s1 + $0xb0] sm:$0xff]  ;;  %s8929_s13 = smov (!%p161_p3, %s5179_s13), 1  ;;  %v6393_v8 = vld [vmem:[%s8903_s1 + $0xa8] sm:$0xff]  ;;  %vm295_vm0 = vsmask.f32 7424 }
   0xc   : > { %v6403_v1 = vld [vmem:[%s8903_s1 + $0xf8] sm:$0xff]  ;;  %498 = vmatpush.bf16.msra.mxu0 %v6395_v0  ;;  %v6402_v5 = vld [vmem:[%s8903_s1 + $0xf0] sm:$0xff]  ;;  %s6362_s30 = sshll.u32 %s8929_s13, 7  ;;  %v6401_v9 = vld [vmem:[%s8903_s1 + $0xe8] sm:$0xff]  ;;  %vm798_vm1 = vcmask 1046528   ;;  %vm1747_vm3 = vcmask 1045504  }
   0xd   : > { %v6379_v2 = vld [vmem:[%s8903_s1 + $0x38] sm:$0xff]  ;;  %536 = vmatpush.bf16.msra.mxu1 %v6403_v1  ;;  %v6378_v6 = vld [vmem:[%s8903_s1 + $0x30] sm:$0xff]  ;;  %v6377_v10 = vld [vmem:[%s8903_s1 + $0x28] sm:$0xff]  ;;  %s6743_s16 = scalar_lea.vmem %s8902_s0, %s6362_s30  ;;  %vm1054_vm2 = vsmask.f32 6400  ;;  %vm2303_vm5 = vcmask 1044480  }
   0xe   : > { %v6387_v3 = vld [vmem:[%s8903_s1 + $0x78] sm:$0xff]  ;;  %684 = vmatpush.bf16.msra.mxu2 %v6379_v2  ;;  %v6386_v7 = vld [vmem:[%s8903_s1 + $0x70] sm:$0xff]  ;;  %v6385_v11 = vld [vmem:[%s8903_s1 + $0x68] sm:$0xff]  ;;  %vm2003_vm4 = vsmask.f32 5376  ;;  %s6363_s26 = sshll.u32 %s8929_s13, 5 }
   0xf   : > { %722 = vmatpush.bf16.msra.mxu3 %v6387_v3  ;;  %v6392_v12 = vld [vmem:[%s8903_s1 + $0xa0] sm:$0xff]  ;;  %v6759_v17 = vld [vmem:[%s6743_s16 + $0x8] sm:$0xff]  ;;  %v6391_v22 = vld [vmem:[%s8903_s1 + $0x98] sm:$0xff]  ;;  %vm2868_vm6 = vsmask.f32 4352  ;;  %s8861_s29 = scalar_lea.vmem %s8905_s3, %s6363_s26  ;;  %vm5006_vm7 = vcmask 519168  }
  0x10   : > { %499 = vmatpush.bf16.msra.mxu0 %v6394_v4  ;;  %v6400_v13 = vld [vmem:[%s8903_s1 + $0xe0] sm:$0xff]  ;;  %v261_v20 = vunpack.c.l.b16 %v6759_v17  ;;  %v262_v21 = vunpack.c.h.b16 %v6759_v17  ;;  %v6399_v23 = vld [vmem:[%s8903_s1 + $0xd8] sm:$0xff]  ;;  %v5190_v24 = vld [vmem:[%s6743_s16 + $0x10] sm:$0xf]  ;;  %vm5008_vm8 = vsmask.f32 2304 }
  0x11   : > { %537 = vmatpush.bf16.msra.mxu1 %v6402_v5  ;;  %v171_v14 = vld [vmem:[%s6743_s16] sm:$0xff]  ;;  %v6365_v25 = vld [vmem:[%s6743_s16 + $0x14] sm:$0xf0]  ;;  %v6364_v27 = vld [vmem:[%s6743_s16 + $0x14] sm:$0xf]  ;;  %vm5033_vm11 = vcmask 1040384  }
  0x12   : > { %685 = vmatpush.bf16.msra.mxu2 %v6378_v6  ;;  %v6376_v15 = vld [vmem:[%s8903_s1 + $0x20] sm:$0xff]  ;;  %v259_v18 = vunpack.c.l.b16 %v171_v14  ;;  %v260_v19 = vunpack.c.h.b16 %v171_v14  ;;  %v5192_v28 = vld [vmem:[%s6743_s16 + $0x18] sm:$0xf0]  ;;  %v6787_v32 = vor.u32 %v6365_v25, %v5190_v24  ;;  %v6390_v34 = vld [vmem:[%s8903_s1 + $0x90] sm:$0xff]  ;;  %vm5009_vm9 = vsmask.f32 6416 }
  0x13   : > { %723 = vmatpush.bf16.msra.mxu3 %v6386_v7  ;;  %v6384_v16 = vld [vmem:[%s8903_s1 + $0x60] sm:$0xff]  ;;  %v6375_v30 = vld [vmem:[%s8903_s1 + $0x18] sm:$0xff]  ;;  %v6789_v33 = vor.u32 %v6364_v27, %v5192_v28  ;;  %v6398_v35 = vld [vmem:[%s8903_s1 + $0xd0] sm:$0xff]  ;;  %vm5034_vm12 = vcmask 1044484   ;;  %vm5042_vm14 = vsmask.f32 3328 }
  0x14   : > { %500 = vmatpush.bf16.msra.mxu0 %v6393_v8  ;;  %v6773_v26 = vpack.c.b16 %v261_v20, %v259_v18  ;;  %v6779_v29 = vpack.c.b16 %v262_v21, %v260_v19  ;;  %v6383_v31 = vld [vmem:[%s8903_s1 + $0x58] sm:$0xff]  ;;  %v6374_v38 = vld [vmem:[%s8903_s1 + $0x10] sm:$0xff]  ;;  %v304_v40 = vshll.u32 %v6787_v32, 16  ;;  %v6389_v42 = vld [vmem:[%s8903_s1 + $0x88] sm:$0xff]  ;;  %vm5043_vm15 = vsmask.f32 7440 }
  0x15   : > { %538 = vmatpush.bf16.msra.mxu1 %v6401_v9  ;;  %v6382_v39 = vld [vmem:[%s8903_s1 + $0x50] sm:$0xff]  ;;  %v316_v41 = vshll.u32 %v6789_v33, 16  ;;  %v6397_v43 = vld [vmem:[%s8903_s1 + $0xc8] sm:$0xff]  ;;  %v6388_v50 = vld [vmem:[%s8903_s1 + $0x80] sm:$0xff]  ;;  %v328_v14 = vshrl.u32 %v6789_v33, 16 }
  0x16   : > { %686 = vmatpush.bf16.msra.mxu2 %v6377_v10  ;;  %v299_v36 = vshll.u32 %v6773_v26, 16  ;;  %v311_v37 = vshll.u32 %v6779_v29, 16  ;;  %v297_v44 = vshrl.u32 %v6773_v26, 16  ;;  %v309_v46 = vshrl.u32 %v6779_v29, 16  ;;  %v6373_v48 = vld [vmem:[%s8903_s1 + $0x8] sm:$0xff]  ;;  %v6396_v51 = vld [vmem:[%s8903_s1 + $0xc0] sm:$0xff]  ;;  %vm5010_vm10 = vmor %vm5008_vm8, %vm5009_vm9 }
  0x17   : > { %724 = vmatpush.bf16.msra.mxu3 %v6385_v11  ;;  %v6381_v49 = vld [vmem:[%s8903_s1 + $0x48] sm:$0xff]  ;;  %v306_v53 = vrot.slane %v304_v40, 1  ;;  %v318_v55 = vrot.slane %v316_v41, 1  ;;  %v6372_v56 = vld [vmem:[%s8903_s1] sm:$0xff]  ;;  %v6427_v58 = vld [vmem:[%s8903_s1 + $0x1b8] sm:$0xff]  ;;  %vm5092_vm8 = vcmask 1042432  }
  0x18   : > { %501 = vmatpush.bf16.msra.mxu0 %v6392_v12  ;;  %v301_v45 = vrot.slane %v299_v36, 1  ;;  %v313_v47 = vrot.slane %v311_v37, 1  ;;  %v6380_v57 = vld [vmem:[%s8903_s1 + $0x40] sm:$0xff]  ;;  %v6435_v59 = vld [vmem:[%s8903_s1 + $0x1f8] sm:$0xff]  ;;  %v6367_v1 = vld [vmem:[%s6743_s16 + $0x24] sm:$0xf0] }
  0x19   : > { %539 = vmatpush.bf16.msra.mxu1 %v6400_v13  ;;  %v6411_v62 = vld [vmem:[%s8903_s1 + $0x138] sm:$0xff]  ;;  %v5198_v0 = vld [vmem:[%s6743_s16 + $0x20] sm:$0xf]  ;;  %v6366_v2 = vld [vmem:[%s6743_s16 + $0x24] sm:$0xf]  ;;  %v320_v12 = vshrl.u32 %v6787_v32, 16  ;;  %v330_v25 = vor.u32 %v328_v14, %v318_v55 }
  0x1a   : > { %687 = vmatpush.bf16.msra.mxu2 %v6376_v15  ;;  %v302_v52 = vor.u32 %v301_v45, %v297_v44  ;;  %v314_v54 = vor.u32 %v313_v47, %v309_v46  ;;  %v6419_v63 = vld [vmem:[%s8903_s1 + $0x178] sm:$0xff]  ;;  %v5200_v3 = vld [vmem:[%s6743_s16 + $0x28] sm:$0xf0]  ;;  %v6426_v4 = vld [vmem:[%s8903_s1 + $0x1b0] sm:$0xff]  ;;  %v6863_v6 = vor.u32 %v6367_v1, %v5198_v0  ;;  %vm5093_vm9 = vcmask 1046532  }
  0x1b   : > { %725 = vmatpush.bf16.msra.mxu3 %v6384_v16  ;;  %v6434_v5 = vld [vmem:[%s8903_s1 + $0x1f0] sm:$0xff]  ;;  %v6865_v7 = vor.u32 %v6366_v2, %v5200_v3  ;;  %v6425_v10 = vld [vmem:[%s8903_s1 + $0x1a8] sm:$0xff]  ;;  %v6424_v19 = vld [vmem:[%s8903_s1 + $0x1a0] sm:$0xff] }
  0x1c   : > { %502 = vmatpush.bf16.msra.mxu0 %v6391_v22  ;;  %v307_v60 = vsel %vm295_vm0, %v302_v52, %v306_v53  ;;  %v319_v61 = vsel %vm295_vm0, %v314_v54, %v318_v55  ;;  %v6410_v8 = vld [vmem:[%s8903_s1 + $0x130] sm:$0xff]  ;;  %v6433_v11 = vld [vmem:[%s8903_s1 + $0x1e8] sm:$0xff]  ;;  %v324_v13 = vshll.u32 %v6863_v6, 16  ;;  %v6432_v22 = vld [vmem:[%s8903_s1 + $0x1e0] sm:$0xff]  ;;  %v336_v47 = vshrl.u32 %v6863_v6, 16 }
  0x1d   : > { %540 = vmatpush.bf16.msra.mxu1 %v6399_v23  ;;  %v6418_v9 = vld [vmem:[%s8903_s1 + $0x170] sm:$0xff]  ;;  %v332_v15 = vshll.u32 %v6865_v7, 16  ;;  %v6409_v16 = vld [vmem:[%s8903_s1 + $0x128] sm:$0xff]  ;;  %v322_v23 = vor.u32 %v320_v12, %v306_v53  ;;  %v6408_v27 = vld [vmem:[%s8903_s1 + $0x120] sm:$0xff] }
  0x1e   : > { %688 = vmatpush.bf16.msra.mxu2 %v6375_v30  ;;  %v6417_v18 = vld [vmem:[%s8903_s1 + $0x168] sm:$0xff]  ;;  %v326_v24 = vrot.slane %v324_v13, 1  ;;  %v6416_v28 = vld [vmem:[%s8903_s1 + $0x160] sm:$0xff]  ;;  %v5208_v36 = vld [vmem:[%s6743_s16 + $0x38] sm:$0xf0] }
  0x1f   : > { %726 = vmatpush.bf16.msra.mxu3 %v6383_v31  ;;  %v5206_v31 = vld [vmem:[%s6743_s16 + $0x30] sm:$0xf]  ;;  %v6415_v44 = vld [vmem:[%s8903_s1 + $0x158] sm:$0xff]  ;;  %v5214_v55 = vld [vmem:[%s6743_s16 + $0x40] sm:$0xf] }
  0x20   : > { %503 = vmatpush.bf16.msra.mxu0 %v6390_v34  ;;  %v6369_v34 = vld [vmem:[%s6743_s16 + $0x34] sm:$0xf0]  ;;  %v6422_v45 = vld [vmem:[%s8903_s1 + $0x190] sm:$0xff]  ;;  %v6421_v1 = vld [vmem:[%s8903_s1 + $0x188] sm:$0xff] }
  0x21   : > { %541 = vmatpush.bf16.msra.mxu1 %v6398_v35  ;;  %v6368_v35 = vld [vmem:[%s6743_s16 + $0x34] sm:$0xf]  ;;  %v6917_v37 = vor.u32 %v6369_v34, %v5206_v31  ;;  %v6429_v2 = vld [vmem:[%s8903_s1 + $0x1c8] sm:$0xff]  ;;  %v6420_v34 = vld [vmem:[%s8903_s1 + $0x180] sm:$0xff] }
  0x22   : > { %689 = vmatpush.bf16.msra.mxu2 %v6374_v38  ;;  %v6919_v38 = vor.u32 %v6368_v35, %v5208_v36  ;;  %v6430_v46 = vld [vmem:[%s8903_s1 + $0x1d0] sm:$0xff]  ;;  %v6405_v3 = vld [vmem:[%s8903_s1 + $0x108] sm:$0xff]  ;;  %v6428_v35 = vld [vmem:[%s8903_s1 + $0x1c0] sm:$0xff] }
  0x23   : > { %727 = vmatpush.bf16.msra.mxu3 %v6382_v39  ;;  %v6423_v39 = vld [vmem:[%s8903_s1 + $0x198] sm:$0xff]  ;;  %v6414_v0 = vld [vmem:[%s8903_s1 + $0x150] sm:$0xff]  ;;  %v6404_v36 = vld [vmem:[%s8903_s1 + $0x100] sm:$0xff] }
  0x24   : > { %504 = vmatpush.bf16.msra.mxu0 %v6389_v42  ;;  %v6431_v42 = vld [vmem:[%s8903_s1 + $0x1d8] sm:$0xff]  ;;  %vm5035_vm13 = vmor %vm5033_vm11, %vm5034_vm12  ;;  %vm5101_vm11 = vsmask.f32 1280  ;;  %vm5102_vm12 = vsmask.f32 5392 }
  0x25   : > { %542 = vmatpush.bf16.msra.mxu1 %v6397_v43  ;;  %v6407_v43 = vld [vmem:[%s8903_s1 + $0x118] sm:$0xff] }
  0x26   : > { %690 = vmatpush.bf16.msra.mxu2 %v6373_v48  ;;  %v340_v48 = vshll.u32 %v6917_v37, 16 }
  0x27   : > { %728 = vmatpush.bf16.msra.mxu3 %v6381_v49  ;;  %v344_v49 = vshrl.u32 %v6865_v7, 16 }
  0x28   : > { %505 = vmatpush.bf16.msra.mxu0 %v6388_v50  ;;  %v348_v50 = vshll.u32 %v6919_v38, 16  ;;  %v342_v52 = vrot.slane %v340_v48, 1 }
  0x29   : > { %543 = vmatpush.bf16.msra.mxu1 %v6396_v51  ;;  %v338_v51 = vor.u32 %v336_v47, %v326_v24 }
  0x2a   : > { %691 = vmatpush.bf16.msra.mxu2 %v6372_v56  ;;  %v350_v54 = vrot.slane %v348_v50, 1 }
  0x2b   : > { %729 = vmatpush.bf16.msra.mxu3 %v6380_v57  ;;  %506 = vmatmul.bf16.vlgmr.msra.gmra.mxu0 %v307_v60  ;;  %v343_v56 = vsel %vm295_vm0, %v338_v51, %v342_v52  ;;  %v5216_v60 = vld [vmem:[%s6743_s16 + $0x48] sm:$0xf0] }
  0x2c   : > { %544 = vmatmul.bf16.vlgmr.msra.gmra.mxu1 %v319_v61  ;;  %929 = vmatpush.bf16.msrb.mxu0 %v6411_v62 }
  0x2d   : > { %692 = vmatmul.bf16.vlgmr.msra.gmra.mxu2 %v6773_v26  ;;  %967 = vmatpush.bf16.msrb.mxu1 %v6419_v63  ;;  %v334_v26 = vrot.slane %v332_v15, 1  ;;  %v6406_v63 = vld [vmem:[%s8903_s1 + $0x110] sm:$0xff] }
  0x2e   : > { %1229 = vmatpush.bf16.msrb.mxu2 %v6427_v58  ;;  %730 = vmatmul.bf16.vlgmr.msra.gmra.mxu3 %v6779_v29  ;;  %v327_v29 = vsel %vm295_vm0, %v322_v23, %v326_v24  ;;  %v6371_v58 = vld [vmem:[%s6743_s16 + $0x44] sm:$0xf0]  ;;  %v214_v23 = vld [vmem:[%s6743_s16 + $0x58] sm:$0x11] }
  0x2f   : > { %1267 = vmatpush.bf16.msrb.mxu3 %v6435_v59  ;;  %v335_v30 = vsel %vm295_vm0, %v330_v25, %v334_v26  ;;  %v346_v53 = vor.u32 %v344_v49, %v334_v26  ;;  %v6370_v59 = vld [vmem:[%s6743_s16 + $0x44] sm:$0xf]  ;;  %v6957_v61 = vor.u32 %v6371_v58, %v5214_v55  ;;  %v6451_v58 = vld [vmem:[%s8903_s1 + $0x238] sm:$0xff] }
  0x30   : > { %930 = vmatpush.bf16.msrb.mxu0 %v6410_v8  ;;  %v6959_v62 = vor.u32 %v6370_v59, %v5216_v60  ;;  %v6459_v59 = vld [vmem:[%s8903_s1 + $0x278] sm:$0xff]  ;;  %v6466_v60 = vld [vmem:[%s8903_s1 + $0x2b0] sm:$0xff] }
  0x31   : > { %968 = vmatpush.bf16.msrb.mxu1 %v6418_v9  ;;  %v351_v57 = vsel %vm295_vm0, %v346_v53, %v350_v54  ;;  %v356_v8 = vshll.u32 %v6957_v61, 16  ;;  %v360_v9 = vshrl.u32 %v6919_v38, 16 }
  0x32   : > { %1230 = vmatpush.bf16.msrb.mxu2 %v6426_v4  ;;  %v6413_v4 = vld [vmem:[%s8903_s1 + $0x148] sm:$0xff] }
  0x33   : > { %1268 = vmatpush.bf16.msrb.mxu3 %v6434_v5  ;;  %v352_v5 = vshrl.u32 %v6917_v37, 16 }
  0x34   : > { %931 = vmatpush.bf16.msrb.mxu0 %v6409_v16  ;;  %v358_v16 = vrot.slane %v356_v8, 1 }
  0x35   : > { %969 = vmatpush.bf16.msrb.mxu1 %v6417_v18  ;;  %v362_v18 = vor.u32 %v360_v9, %v350_v54 }
  0x36   : > { %1231 = vmatpush.bf16.msrb.mxu2 %v6425_v10  ;;  %v364_v10 = vshll.u32 %v6959_v62, 16 }
  0x37   : > { %1269 = vmatpush.bf16.msrb.mxu3 %v6433_v11  ;;  %v354_v11 = vor.u32 %v352_v5, %v342_v52 }
  0x38   : > { %932 = vmatpush.bf16.msrb.mxu0 %v6408_v27  ;;  %v281_v27 = vunpack.c.l.b16 %v214_v23 }
  0x39   : > { %970 = vmatpush.bf16.msrb.mxu1 %v6416_v28  ;;  %v359_v24 = vsel %vm295_vm0, %v354_v11, %v358_v16 }
  0x3a   : > { %1232 = vmatpush.bf16.msrb.mxu2 %v6424_v19  ;;  %v366_v19 = vrot.slane %v364_v10, 1 }
  0x3b   : > { %1270 = vmatpush.bf16.msrb.mxu3 %v6432_v22  ;;  %511 = vmatmul.bf16.gmra.mxu0 %v327_v29  ;;  %v181_v22 = vld [vmem:[%s6743_s16 + $0x50] sm:$0xff]  ;;  %v282_v29 = vunpack.c.h.b16 %v214_v23 }
  0x3c   : > { %549 = vmatmul.bf16.gmra.mxu1 %v335_v30  ;;  %933 = vmatpush.bf16.msrb.mxu0 %v6407_v43  ;;  %v367_v25 = vsel %vm295_vm0, %v362_v18, %v366_v19  ;;  %v6997_v26 = vunpack.c.l.b16 %v181_v22  ;;  %v6999_v28 = vunpack.c.h.b16 %v181_v22 }
  0x3d   : > { %697 = vmatmul.bf16.gmra.mxu2 %v6787_v32  ;;  %971 = vmatpush.bf16.msrb.mxu1 %v6415_v44  ;;  %v376_v44 = vshrl.u32 %v6959_v62, 16 }
  0x3e   : > { %735 = vmatmul.bf16.gmra.mxu3 %v6789_v33  ;;  %1233 = vmatpush.bf16.msrb.mxu2 %v6423_v39  ;;  %v7004_v30 = vpack.c.b16 %v281_v27, %v6997_v26  ;;  %v7007_v31 = vpack.c.b16 %v282_v29, %v6999_v28  ;;  %v6412_v39 = vld [vmem:[%s8903_s1 + $0x140] sm:$0xff]  ;;  %v574_v18 = vpack.c.b16 %v6997_v26, %v6997_v26  ;;  %v6450_v27 = vld [vmem:[%s8903_s1 + $0x230] sm:$0xff] }
  0x3f   : > { %1271 = vmatpush.bf16.msrb.mxu3 %v6431_v42  ;;  %v368_v42 = vshrl.u32 %v6957_v61, 16  ;;  %v378_v52 = vor.u32 %v376_v44, %v366_v19  ;;  %v575_v19 = vpack.c.b16 %v6999_v28, %v6999_v28  ;;  %v6458_v29 = vld [vmem:[%s8903_s1 + $0x270] sm:$0xff] }
  0x40   : > { %934 = vmatpush.bf16.msrb.mxu0 %v6406_v63  ;;  %v372_v43 = vshll.u32 %v7004_v30, 16  ;;  %v6474_v63 = vld [vmem:[%s8903_s1 + $0x2f0] sm:$0xff] }
  0x41   : > { %972 = vmatpush.bf16.msrb.mxu1 %v6414_v0  ;;  %v760_v0 = vld [vmem:[%s6743_s16] sm:$0xee] }
  0x42   : > { %1234 = vmatpush.bf16.msrb.mxu2 %v6422_v45  ;;  %v380_v45 = vshll.u32 %v7007_v31, 16  ;;  %v374_v51 = vrot.slane %v372_v43, 1 }
  0x43   : > { %1272 = vmatpush.bf16.msrb.mxu3 %v6430_v46  ;;  %v370_v46 = vor.u32 %v368_v42, %v358_v16 }
  0x44   : > { %935 = vmatpush.bf16.msrb.mxu0 %v6405_v3  ;;  %v382_v53 = vrot.slane %v380_v45, 1  ;;  %v794_v3 = vunpack.c.l.b16 %v760_v0  ;;  %v1063_v45 = vrot.slane %v320_v12, 1  ;;  %v803_v12 = vrot.slane %v6789_v33, 1 }
  0x45   : > { %973 = vmatpush.bf16.msrb.mxu1 %v6413_v4  ;;  %v375_v54 = vsel %vm295_vm0, %v370_v46, %v374_v51  ;;  %v795_v4 = vunpack.c.h.b16 %v760_v0  ;;  %v1064_v46 = vrot.slane %v304_v40, 2  ;;  %v1080_v33 = vrot.slane %v324_v13, 2  ;;  %v6456_v13 = vld [vmem:[%s8903_s1 + $0x260] sm:$0xff] }
  0x46   : > { %1235 = vmatpush.bf16.msrb.mxu2 %v6421_v1  ;;  %v383_v55 = vsel %vm295_vm0, %v378_v52, %v382_v53  ;;  %v384_v1 = vshrl.u32 %v7004_v30, 16  ;;  %v796_v22 = vpack.c.b16 %v261_v20, %v794_v3  ;;  %v6465_v20 = vld [vmem:[%s8903_s1 + $0x2a8] sm:$0xff]  ;;  %v6464_v3 = vld [vmem:[%s8903_s1 + $0x2a0] sm:$0xff] }
  0x47   : > { %1273 = vmatpush.bf16.msrb.mxu3 %v6429_v2  ;;  %v387_v2 = vshrl.u32 %v7007_v31, 16  ;;  %v797_v23 = vpack.c.b16 %v262_v21, %v795_v4  ;;  %v6472_v4 = vld [vmem:[%s8903_s1 + $0x2e0] sm:$0xff] }
  0x48   : > { %936 = vmatpush.bf16.msrb.mxu0 %v6404_v36  ;;  %v386_v11 = vor.u32 %v384_v1, %v374_v51  ;;  %v6457_v36 = vld [vmem:[%s8903_s1 + $0x268] sm:$0xff]  ;;  %v1083_v1 = vrot.slane %v344_v49, 1  ;;  %v805_v49 = vrot.slane %v6863_v6, 1 }
  0x49   : > { %974 = vmatpush.bf16.msrb.mxu1 %v6412_v39  ;;  %v389_v16 = vor.u32 %v387_v2, %v382_v53  ;;  %v1068_v17 = vshrl.u32 %v797_v23, 16  ;;  %v1071_v21 = vshll.u32 %v797_v23, 16  ;;  %v1075_v53 = vrot.slane %v328_v14, 1 }
  0x4a   : > { %1236 = vmatpush.bf16.msrb.mxu2 %v6420_v34  ;;  %v6473_v34 = vld [vmem:[%s8903_s1 + $0x2e8] sm:$0xff]  ;;  %v1084_v2 = vrot.slane %v332_v15, 2  ;;  %v807_v15 = vrot.slane %v6865_v7, 1 }
  0x4b   : > { %516 = vmatmul.bf16.gmra.mxu0 %v343_v56  ;;  %1274 = vmatpush.bf16.msrb.mxu3 %v6428_v35  ;;  %v6467_v56 = vld [vmem:[%s8903_s1 + $0x2b8] sm:$0xff]  ;;  %v6449_v35 = vld [vmem:[%s8903_s1 + $0x228] sm:$0xff]  ;;  %v1070_v51 = vrot.slane %v1068_v17, 1  ;;  %v1073_v52 = vrot.slane %v1071_v21, 2  ;;  %v809_v21 = vrot.slane %v6917_v37, 1 }
  0x4c   : > { %554 = vmatmul.bf16.gmra.mxu1 %v351_v57  ;;  %v6475_v57 = vld [vmem:[%s8903_s1 + $0x2f8] sm:$0xff]  ;;  %1622 = vmatpush.bf16.msra.mxu0 %v6451_v58 }
  0x4d   : > { %702 = vmatmul.bf16.gmra.mxu2 %v6863_v6  ;;  %1660 = vmatpush.bf16.msra.mxu1 %v6459_v59  ;;  %v1065_v59 = vor.u32 %v1064_v46, %v1063_v45  ;;  %v1074_v40 = vor.u32 %v1073_v52, %v1070_v51  ;;  %v6463_v6 = vld [vmem:[%s8903_s1 + $0x298] sm:$0xff]  ;;  %v6446_v46 = vld [vmem:[%s8903_s1 + $0x210] sm:$0xff] }
  0x4e   : > { %740 = vmatmul.bf16.gmra.mxu3 %v6865_v7  ;;  %1878 = vmatpush.bf16.msra.mxu2 %v6467_v56  ;;  %v800_v56 = vrot.slane %v6787_v32, 1  ;;  %v1079_v32 = vrot.slane %v336_v47, 1  ;;  %v6448_v47 = vld [vmem:[%s8903_s1 + $0x220] sm:$0xff]  ;;  %v6471_v7 = vld [vmem:[%s8903_s1 + $0x2d8] sm:$0xff]  ;;  %v6454_v51 = vld [vmem:[%s8903_s1 + $0x250] sm:$0xff] }
  0x4f   : > { %1916 = vmatpush.bf16.msra.mxu3 %v6475_v57  ;;  %v802_v57 = vrot.slane %v797_v23, 1  ;;  %v6455_v17 = vld [vmem:[%s8903_s1 + $0x258] sm:$0xff] }
  0x50   : > { %1623 = vmatpush.bf16.msra.mxu0 %v6450_v27  ;;  %v1091_v27 = vrot.slane %v360_v9, 1 }
  0x51   : > { %1661 = vmatpush.bf16.msra.mxu1 %v6458_v29  ;;  %v804_v14 = vsel %vm798_vm1, %v802_v57, %v803_v12  ;;  %v1092_v29 = vrot.slane %v348_v50, 2  ;;  %v810_v50 = vsel %vm798_vm1, %v805_v49, %v809_v21  ;;  %v1095_v57 = vrot.slane %v368_v42, 1  ;;  %v6469_v42 = vld [vmem:[%s8903_s1 + $0x2c8] sm:$0xff] }
  0x52   : > { %1879 = vmatpush.bf16.msra.mxu2 %v6466_v60 }
  0x53   : > { %1917 = vmatpush.bf16.msra.mxu3 %v6474_v63 }
  0x54   : > { %1624 = vmatpush.bf16.msra.mxu0 %v6449_v35 }
  0x55   : > { %1662 = vmatpush.bf16.msra.mxu1 %v6457_v36 }
  0x56   : > { %1880 = vmatpush.bf16.msra.mxu2 %v6465_v20  ;;  %v6447_v20 = vld [vmem:[%s8903_s1 + $0x218] sm:$0xff] }
  0x57   : > { %1918 = vmatpush.bf16.msra.mxu3 %v6473_v34  ;;  %v1093_v34 = vor.u32 %v1092_v29, %v1091_v27 }
  0x58   : > { %1625 = vmatpush.bf16.msra.mxu0 %v6448_v47 }
  0x59   : > { %1663 = vmatpush.bf16.msra.mxu1 %v6456_v13 }
  0x5a   : > { %1881 = vmatpush.bf16.msra.mxu2 %v6464_v3 }
  0x5b   : > { %521 = vmatmul.bf16.gmra.mxu0 %v359_v24  ;;  %v1056_v24 = vshrl.u32 %v796_v22, 16  ;;  %1919 = vmatpush.bf16.msra.mxu3 %v6472_v4 }
  0x5c   : > { %559 = vmatmul.bf16.gmra.mxu1 %v367_v25  ;;  %v1059_v25 = vshll.u32 %v796_v22, 16  ;;  %1626 = vmatpush.bf16.msra.mxu0 %v6447_v20 }
  0x5d   : > { %707 = vmatmul.bf16.gmra.mxu2 %v6917_v37  ;;  %v1058_v39 = vrot.slane %v1056_v24, 1  ;;  %v1087_v24 = vrot.slane %v352_v5, 1  ;;  %v811_v5 = vrot.slane %v6919_v38, 1  ;;  %1664 = vmatpush.bf16.msra.mxu1 %v6455_v17  ;;  %v6462_v37 = vld [vmem:[%s8903_s1 + $0x290] sm:$0xff] }
  0x5e   : > { %745 = vmatmul.bf16.gmra.mxu3 %v6919_v38  ;;  %v1061_v43 = vrot.slane %v1059_v25, 2  ;;  %1882 = vmatpush.bf16.msra.mxu2 %v6463_v6  ;;  %v1088_v25 = vrot.slane %v340_v48, 2  ;;  %v6470_v38 = vld [vmem:[%s8903_s1 + $0x2d0] sm:$0xff] }
  0x5f   : > { %1920 = vmatpush.bf16.msra.mxu3 %v6471_v7  ;;  %v812_v36 = vsel %vm798_vm1, %v807_v15, %v811_v5 }
  0x60   : > { %v1062_v58 = vor.u32 %v1061_v43, %v1058_v39  ;;  %v1089_v48 = vor.u32 %v1088_v25, %v1087_v24  ;;  %1627 = vmatpush.bf16.msra.mxu0 %v6446_v46 }
  0x61   : > { %1665 = vmatpush.bf16.msra.mxu1 %v6454_v51 }
  0x62   : > { %1883 = vmatpush.bf16.msra.mxu2 %v6462_v37 }
  0x63   : > { %1921 = vmatpush.bf16.msra.mxu3 %v6470_v38 }
  0x67   : > { %1922 = vmatpush.bf16.msra.mxu3 %v6469_v42  ;;  %v1317_v42 = vld [vmem:[%s6743_s16 + $0x10] sm:$0xff] }
  0x6b   : > { %526 = vmatmul.bf16.gmra.mxu0 %v375_v54  ;;  %v1076_v54 = vrot.slane %v316_v41, 2  ;;  %v1066_v41 = vsel %vm1054_vm2, %v1062_v58, %v1065_v59  ;;  %v1096_v58 = vrot.slane %v356_v8, 2  ;;  %v815_v8 = vrot.slane %v6959_v62, 1 }
  0x6c   : > { %564 = vmatmul.bf16.gmra.mxu1 %v383_v55  ;;  %v799_v55 = vrot.slane %v796_v22, 1 }
  0x6d   : > { %712 = vmatmul.bf16.gmra.mxu2 %v6957_v61  ;;  %v1077_v60 = vor.u32 %v1076_v54, %v1075_v53  ;;  %v816_v13 = vsel %vm798_vm1, %v811_v5, %v815_v8 }
  0x6e   : > { %750 = vmatmul.bf16.gmra.mxu3 %v6959_v62  ;;  %v801_v63 = vsel %vm798_vm1, %v799_v55, %v800_v56 }
  0x6f   : > { %v1078_v0 = vsel %vm1054_vm2, %v1074_v40, %v1077_v60  ;;  %v1100_v40 = vrot.slane %v364_v10, 2 }
  0x7b   : > { %531 = vmatmul.bf16.gmra.mxu0 %v386_v11  ;;  %v1081_v11 = vor.u32 %v1080_v33, %v1079_v32 }
  0x7c   : > { %569 = vmatmul.bf16.gmra.mxu1 %v389_v16  ;;  %v1085_v16 = vor.u32 %v1084_v2, %v1083_v1 }
  0x7d   : > { %717 = vmatmul.bf16.gmra.mxu2 %v574_v18  ;;  %v806_v18 = vsel %vm798_vm1, %v800_v56, %v805_v49  ;;  %v1082_v22 = vsel %vm1054_vm2, %v1065_v59, %v1081_v11  ;;  %v1090_v43 = vsel %vm1054_vm2, %v1081_v11, %v1089_v48  ;;  %v1099_v59 = vrot.slane %v376_v44, 1 }
  0x7e   : > { %755 = vmatmul.bf16.gmra.mxu3 %v575_v19  ;;  %v808_v19 = vsel %vm798_vm1, %v803_v12, %v807_v15  ;;  %v1086_v23 = vsel %vm1054_vm2, %v1077_v60, %v1085_v16  ;;  %v1094_v45 = vsel %vm1054_vm2, %v1085_v16, %v1093_v34  ;;  %v1016_v60 = vld [vmem:[%s6743_s16 + $0x58] sm:$0x33]  ;;  %v1097_v44 = vor.u32 %v1096_v58, %v1095_v57 }
  0x7f   : > { %v1101_v10 = vor.u32 %v1100_v40, %v1099_v59  ;;  %v1051_v32 = vunpack.c.h.b16 %v1016_v60  ;;  %v6499_v58 = vld [vmem:[%s8903_s1 + $0x3b8] sm:$0xff] }
  0x80   : > { %v1098_v62 = vsel %vm1054_vm2, %v1089_v48, %v1097_v44  ;;  %v6507_v59 = vld [vmem:[%s8903_s1 + $0x3f8] sm:$0xff] }
  0x81   : > { %v1102_v15 = vsel %vm1054_vm2, %v1093_v34, %v1101_v10  ;;  %v1053_v11 = vpack.c.b16 %v1051_v32, %v6999_v28  ;;  %v6460_v34 = vld [vmem:[%s8903_s1 + $0x280] sm:$0xff] }
  0x83   : > { %v1116_v6 = vshll.u32 %v1053_v11, 16 }
  0x85   : > { %v1118_v5 = vrot.slane %v1116_v6, 2 }
  0x8b   : > { %937 = vmatmul.bf16.vlgmr.msrb.gmra.mxu0 %v801_v63 }
  0x8c   : > { %975 = vmatmul.bf16.vlgmr.msrb.gmra.mxu1 %v804_v14  ;;  %v6461_v14 = vld [vmem:[%s8903_s1 + $0x288] sm:$0xff] }
  0x8d   : > { %1237 = vmatmul.bf16.vlgmr.msrb.gmra.mxu2 %v1066_v41  ;;  %v813_v41 = vrot.slane %v6957_v61, 1 }
  0x8e   : > { %1275 = vmatmul.bf16.vlgmr.msrb.gmra.mxu3 %v1078_v0  ;;  %v1050_v0 = vunpack.c.l.b16 %v1016_v60  ;;  %1884 = vmatpush.bf16.msra.mxu2 %v6461_v14  ;;  %v1316_v14 = vld [vmem:[%s6743_s16 + $0x8] sm:$0xee] }
  0x8f   : > { %v814_v47 = vsel %vm798_vm1, %v809_v21, %v813_v41  ;;  %v1372_v32 = vunpack.c.l.b16 %v1316_v14 }
  0x90   : > { %v1052_v49 = vpack.c.b16 %v1050_v0, %v6997_v26 }
  0x92   : > { %v1104_v26 = vshrl.u32 %v1052_v49, 16  ;;  %1885 = vmatpush.bf16.msra.mxu2 %v6460_v34 }
  0x94   : > { %v1106_v29 = vrot.slane %v1104_v26, 1 }
  0x96   : > { %2434 = vmatpush.bf16.msrb.mxu2 %v6499_v58 }
  0x9b   : > { %942 = vmatmul.bf16.gmra.mxu0 %v806_v18  ;;  %v6445_v18 = vld [vmem:[%s8903_s1 + $0x208] sm:$0xff] }
  0x9c   : > { %980 = vmatmul.bf16.gmra.mxu1 %v808_v19  ;;  %v6453_v19 = vld [vmem:[%s8903_s1 + $0x248] sm:$0xff]  ;;  %1628 = vmatpush.bf16.msra.mxu0 %v6445_v18 }
  0x9d   : > { %1242 = vmatmul.bf16.gmra.mxu2 %v1082_v22  ;;  %v1107_v22 = vshll.u32 %v1052_v49, 16  ;;  %1666 = vmatpush.bf16.msra.mxu1 %v6453_v19  ;;  %v6436_v49 = vld [vmem:[%s6743_s16 + $0x1c] sm:$0xf] }
  0x9e   : > { %1280 = vmatmul.bf16.gmra.mxu3 %v1086_v23  ;;  %v1113_v23 = vshrl.u32 %v1053_v11, 16 }
  0x9f   : > { %v1109_v17 = vrot.slane %v1107_v22, 2 }
  0xa0   : > { %v1115_v21 = vrot.slane %v1113_v23, 1 }
  0xa8   : > { %v507_v9 = vpop.f32.mrf.mxu0 }
  0xa9   : > { %v545_v35 = vpop.f32.mrf.mxu1 }
  0xaa   : > { %v546_v39 = vadd.f32 %v545_v35, %v507_v9  ;;  %v6468_v9 = vld [vmem:[%s8903_s1 + $0x2c0] sm:$0xff] }
  0xab   : > { %947 = vmatmul.bf16.gmra.mxu0 %v810_v50  ;;  %v6444_v35 = vld [vmem:[%s8903_s1 + $0x200] sm:$0xff]  ;;  %1923 = vmatpush.bf16.msra.mxu3 %v6468_v9 }
  0xac   : > { %985 = vmatmul.bf16.gmra.mxu1 %v812_v36  ;;  %v6452_v50 = vld [vmem:[%s8903_s1 + $0x240] sm:$0xff]  ;;  %v817_v36 = vrot.slane %v7004_v30, 1  ;;  %1629 = vmatpush.bf16.msra.mxu0 %v6444_v35  ;;  %v6482_v30 = vld [vmem:[%s8903_s1 + $0x330] sm:$0xff] }
  0xad   : > { %1247 = vmatmul.bf16.gmra.mxu2 %v1090_v43  ;;  %v7207_v43 = vor.u32 %v1109_v17, %v1106_v29  ;;  %1667 = vmatpush.bf16.msra.mxu1 %v6452_v50  ;;  %v6498_v29 = vld [vmem:[%s8903_s1 + $0x3b0] sm:$0xff] }
  0xae   : > { %1285 = vmatmul.bf16.gmra.mxu3 %v1094_v45  ;;  %v7209_v45 = vor.u32 %v1118_v5, %v1115_v21  ;;  %2435 = vmatpush.bf16.msrb.mxu2 %v6498_v29 }
  0xaf   : > { %2472 = vmatpush.bf16.msrb.mxu3 %v6507_v59 }
  0xb0   : > { %v693_v52 = vpop.f32.mrf.mxu2  ;;  %v509_v55 = vpop.f32.mrf.mxu0  ;;  %v1120_v57 = vsel %vm1054_vm2, %v1101_v10, %v7209_v45 }
  0xb1   : > { %v731_v53 = vpop.f32.mrf.mxu3  ;;  %v694_v54 = vadd.f32 %v693_v52, %v546_v39  ;;  %v547_v56 = vpop.f32.mrf.mxu1  ;;  %v819_v39 = vrot.slane %v7007_v31, 1  ;;  %v6490_v31 = vld [vmem:[%s8903_s1 + $0x370] sm:$0xff] }
  0xb2   : > { %v548_v12 = vadd.f32 %v547_v56, %v509_v55  ;;  %v1111_v56 = vsel %vm1054_vm2, %v1097_v44, %v7207_v43 }
  0xb3   : > { %v7167_v63 = vadd.f32 %v731_v53, %v694_v54  ;;  %v818_v53 = vsel %vm798_vm1, %v813_v41, %v817_v36  ;;  %v820_v54 = vsel %vm798_vm1, %v815_v8, %v819_v39 }
  0xb8   : > { %v695_v33 = vpop.f32.mrf.mxu2  ;;  %v512_v3 = vpop.f32.mrf.mxu0 }
  0xb9   : > { %v733_v1 = vpop.f32.mrf.mxu3  ;;  %v696_v2 = vadd.f32 %v695_v33, %v548_v12  ;;  %v550_v4 = vpop.f32.mrf.mxu1  ;;  %v7233_v33 = vunpack.c.l.b16 %v1317_v42 }
  0xba   : > { %v551_v61 = vadd.f32 %v550_v4, %v512_v3  ;;  %v1373_v3 = vunpack.c.h.b16 %v1316_v14  ;;  %v7241_v4 = vunpack.c.h.b16 %v1317_v42  ;;  %v6497_v14 = vld [vmem:[%s8903_s1 + $0x3a8] sm:$0xff] }
  0xbb   : > { %v7183_v16 = vadd.f32 %v733_v1, %v696_v2  ;;  %952 = vmatmul.bf16.gmra.mxu0 %v814_v47  ;;  %v6483_v1 = vld [vmem:[%s8903_s1 + $0x338] sm:$0xff]  ;;  %v6505_v42 = vld [vmem:[%s8903_s1 + $0x3e8] sm:$0xff]  ;;  %2436 = vmatpush.bf16.msrb.mxu2 %v6497_v14  ;;  %v6488_v14 = vld [vmem:[%s8903_s1 + $0x360] sm:$0xff] }
  0xbc   : > { %990 = vmatmul.bf16.gmra.mxu1 %v816_v13  ;;  %v6491_v2 = vld [vmem:[%s8903_s1 + $0x378] sm:$0xff]  ;;  %v6437_v13 = vld [vmem:[%s6743_s16 + $0x1c] sm:$0xf0]  ;;  %2178 = vmatpush.bf16.msrb.mxu0 %v6483_v1  ;;  %v1397_v19 = vpack.c.b16 %v7241_v4, %v1373_v3  ;;  %v6439_v3 = vld [vmem:[%s6743_s16 + $0x2c] sm:$0xf0] }
  0xbd   : > { %1252 = vmatmul.bf16.gmra.mxu2 %v1098_v62  ;;  %v5478_v47 = vld [vmem:[%s6743_s16 + $0x18] sm:$0xf]  ;;  %2216 = vmatpush.bf16.msrb.mxu1 %v6491_v2  ;;  %v1396_v62 = vpack.c.b16 %v7233_v33, %v1372_v32  ;;  %v5486_v2 = vld [vmem:[%s6743_s16 + $0x28] sm:$0xf] }
  0xbe   : > { %1290 = vmatmul.bf16.gmra.mxu3 %v1102_v15  ;;  %v7248_v18 = vor.u32 %v6437_v13, %v5478_v47  ;;  %v1426_v5 = vshrl.u32 %v1397_v19, 16  ;;  %v1429_v34 = vshll.u32 %v1397_v19, 16  ;;  %v6481_v19 = vld [vmem:[%s8903_s1 + $0x328] sm:$0xff] }
  0xc0   : > { %v698_v28 = vpop.f32.mrf.mxu2  ;;  %v514_v25 = vpop.f32.mrf.mxu0  ;;  %v1417_v17 = vshrl.u32 %v7248_v18, 16  ;;  %v1420_v21 = vshll.u32 %v7248_v18, 16  ;;  %2179 = vmatpush.bf16.msrb.mxu0 %v6482_v30  ;;  %v1749_v1 = vrot.slane %v7248_v18, 2 }
  0xc1   : > { %v736_v7 = vpop.f32.mrf.mxu3  ;;  %v699_v24 = vadd.f32 %v698_v28, %v551_v61  ;;  %v552_v27 = vpop.f32.mrf.mxu1  ;;  %v5480_v61 = vld [vmem:[%s6743_s16 + $0x20] sm:$0xf0]  ;;  %2217 = vmatpush.bf16.msrb.mxu1 %v6490_v31 }
  0xc2   : > { %v553_v20 = vadd.f32 %v552_v27, %v514_v25  ;;  %v7251_v6 = vor.u32 %v6436_v49, %v5480_v61  ;;  %v1409_v25 = vshrl.u32 %v1396_v62, 16  ;;  %v1412_v27 = vshll.u32 %v1396_v62, 16  ;;  %v6438_v49 = vld [vmem:[%s6743_s16 + $0x2c] sm:$0xf]  ;;  %v5488_v61 = vld [vmem:[%s6743_s16 + $0x30] sm:$0xf0] }
  0xc3   : > { %v7191_v48 = vadd.f32 %v736_v7, %v699_v24  ;;  %v1709_v7 = vld [vmem:[%s6743_s16 + $0x8] sm:$0xcc] }
  0xc4   : > { %v1434_v9 = vshrl.u32 %v7251_v6, 16  ;;  %v1437_v35 = vshll.u32 %v7251_v6, 16  ;;  %v1743_v50 = vunpack.c.l.b16 %v1709_v7  ;;  %v1752_v13 = vrot.slane %v7251_v6, 2  ;;  %2180 = vmatpush.bf16.msrb.mxu0 %v6481_v19 }
  0xc6   : > { %v7287_v58 = vpack.c.b16 %v7233_v33, %v1743_v50 }
  0xc8   : > { %v700_v37 = vpop.f32.mrf.mxu2  ;;  %v517_v51 = vpop.f32.mrf.mxu0  ;;  %v1748_v32 = vrot.slane %v7287_v58, 2 }
  0xc9   : > { %v738_v38 = vpop.f32.mrf.mxu3  ;;  %v701_v46 = vadd.f32 %v700_v37, %v553_v20  ;;  %v555_v52 = vpop.f32.mrf.mxu1  ;;  %v6506_v20 = vld [vmem:[%s8903_s1 + $0x3f0] sm:$0xff] }
  0xca   : > { %v556_v55 = vadd.f32 %v555_v52, %v517_v51  ;;  %2473 = vmatpush.bf16.msrb.mxu3 %v6506_v20  ;;  %v1428_v51 = vrot.slane %v1426_v5, 1  ;;  %v1431_v52 = vrot.slane %v1429_v34, 2  ;;  %v1750_v20 = vsel %vm1747_vm3, %v1748_v32, %v1749_v1  ;;  %v6441_v32 = vld [vmem:[%s6743_s16 + $0x3c] sm:$0xf0] }
  0xcb   : > { %v7221_v12 = vadd.f32 %v738_v38, %v701_v46  ;;  %957 = vmatmul.bf16.gmra.mxu0 %v818_v53  ;;  %v1419_v38 = vrot.slane %v1417_v17, 1  ;;  %v1422_v46 = vrot.slane %v1420_v21, 2 }
  0xcc   : > { %995 = vmatmul.bf16.gmra.mxu1 %v820_v54 }
  0xcd   : > { %1257 = vmatmul.bf16.gmra.mxu2 %v1111_v56  ;;  %v1436_v56 = vrot.slane %v1434_v9, 1 }
  0xce   : > { %1295 = vmatmul.bf16.gmra.mxu3 %v1120_v57  ;;  %v1439_v57 = vrot.slane %v1437_v35, 2 }
  0xcf   : > { %2474 = vmatpush.bf16.msrb.mxu3 %v6505_v42 }
  0xd0   : > { %v703_v40 = vpop.f32.mrf.mxu2  ;;  %v519_v8 = vpop.f32.mrf.mxu0 }
  0xd1   : > { %v741_v60 = vpop.f32.mrf.mxu3  ;;  %v704_v41 = vadd.f32 %v703_v40, %v556_v55  ;;  %v557_v0 = vpop.f32.mrf.mxu1 }
  0xd2   : > { %v558_v44 = vadd.f32 %v557_v0, %v519_v8  ;;  %v7300_v8 = vor.u32 %v1422_v46, %v1419_v38  ;;  %v1432_v0 = vor.u32 %v1431_v52, %v1428_v51 }
  0xd3   : > { %v7231_v10 = vadd.f32 %v741_v60, %v704_v41 }
  0xd8   : > { %v705_v15 = vpop.f32.mrf.mxu2  ;;  %v522_v22 = vpop.f32.mrf.mxu0 }
  0xd9   : > { %v743_v11 = vpop.f32.mrf.mxu3  ;;  %v706_v26 = vadd.f32 %v705_v15, %v558_v44  ;;  %v560_v23 = vpop.f32.mrf.mxu1  ;;  %v7302_v44 = vor.u32 %v1439_v57, %v1436_v56  ;;  %v6496_v56 = vld [vmem:[%s8903_s1 + $0x3a0] sm:$0xff] }
  0xda   : > { %v561_v28 = vadd.f32 %v560_v23, %v522_v22  ;;  %v6504_v57 = vld [vmem:[%s8903_s1 + $0x3e0] sm:$0xff]  ;;  %2437 = vmatpush.bf16.msrb.mxu2 %v6496_v56 }
  0xdb   : > { %v7254_v24 = vadd.f32 %v743_v11, %v706_v26  ;;  %962 = vmatmul.bf16.gmra.mxu0 %v817_v36  ;;  %v1744_v36 = vunpack.c.h.b16 %v1709_v7  ;;  %v7312_v11 = vor.u32 %v6439_v3, %v5486_v2  ;;  %v6489_v26 = vld [vmem:[%s8903_s1 + $0x368] sm:$0xff]  ;;  %2475 = vmatpush.bf16.msrb.mxu3 %v6504_v57 }
  0xdc   : > { %1000 = vmatmul.bf16.gmra.mxu1 %v819_v39  ;;  %v1411_v39 = vrot.slane %v1409_v25, 1  ;;  %v1441_v25 = vsel %vm1054_vm2, %v1432_v0, %v7302_v44  ;;  %v5494_v0 = vld [vmem:[%s6743_s16 + $0x38] sm:$0xf] }
  0xdd   : > { %1262 = vmatmul.bf16.gmra.mxu2 %v7207_v43  ;;  %v1414_v43 = vrot.slane %v1412_v27, 2  ;;  %v7290_v40 = vpack.c.b16 %v7241_v4, %v1744_v36  ;;  %v7324_v27 = vor.u32 %v6438_v49, %v5488_v61  ;;  %2218 = vmatpush.bf16.msrb.mxu1 %v6489_v26  ;;  %v1443_v50 = vshrl.u32 %v7312_v11, 16  ;;  %v5496_v49 = vld [vmem:[%s6743_s16 + $0x40] sm:$0xf0] }
  0xde   : > { %1300 = vmatmul.bf16.gmra.mxu3 %v7209_v45  ;;  %v1446_v30 = vshll.u32 %v7312_v11, 16  ;;  %v1754_v2 = vrot.slane %v7312_v11, 2 }
  0xdf   : > { %v1415_v41 = vor.u32 %v1414_v43, %v1411_v39  ;;  %v1751_v47 = vrot.slane %v7290_v40, 2  ;;  %v1452_v31 = vshrl.u32 %v7324_v27, 16  ;;  %v1455_v36 = vshll.u32 %v7324_v27, 16 }
  0xe0   : > { %v708_v45 = vpop.f32.mrf.mxu2  ;;  %v524_v54 = vpop.f32.mrf.mxu0  ;;  %v1448_v51 = vrot.slane %v1446_v30, 2  ;;  %v1756_v3 = vrot.slane %v7324_v27, 2 }
  0xe1   : > { %v746_v37 = vpop.f32.mrf.mxu3  ;;  %v709_v53 = vadd.f32 %v708_v45, %v561_v28  ;;  %v562_v55 = vpop.f32.mrf.mxu1  ;;  %v1424_v7 = vsel %vm1054_vm2, %v1415_v41, %v7300_v8  ;;  %v1753_v5 = vsel %vm1747_vm3, %v1751_v47, %v1752_v13  ;;  %v1445_v45 = vrot.slane %v1443_v50, 1  ;;  %v6440_v47 = vld [vmem:[%s6743_s16 + $0x3c] sm:$0xf]  ;;  %2219 = vmatpush.bf16.msrb.mxu1 %v6488_v14 }
  0xe2   : > { %v563_v59 = vadd.f32 %v562_v55, %v524_v54  ;;  %v1454_v52 = vrot.slane %v1452_v31, 1  ;;  %v6487_v14 = vld [vmem:[%s8903_s1 + $0x358] sm:$0xff] }
  0xe3   : > { %v7292_v60 = vadd.f32 %v746_v37, %v709_v53  ;;  %v1457_v53 = vrot.slane %v1455_v36, 2  ;;  %v7360_v42 = vor.u32 %v1448_v51, %v1445_v45 }
  0xe5   : > { %v7362_v41 = vor.u32 %v1457_v53, %v1454_v52  ;;  %2220 = vmatpush.bf16.msrb.mxu1 %v6487_v14 }
  0xe8   : > { %v710_v62 = vpop.f32.mrf.mxu2  ;;  %v527_v23 = vpop.f32.mrf.mxu0 }
  0xe9   : > { %v748_v15 = vpop.f32.mrf.mxu3  ;;  %v711_v22 = vadd.f32 %v710_v62, %v563_v59  ;;  %v565_v28 = vpop.f32.mrf.mxu1  ;;  %v6480_v59 = vld [vmem:[%s8903_s1 + $0x320] sm:$0xff] }
  0xea   : > { %v566_v29 = vadd.f32 %v565_v28, %v527_v23  ;;  %2181 = vmatpush.bf16.msrb.mxu0 %v6480_v59  ;;  %v1450_v23 = vsel %vm1054_vm2, %v7300_v8, %v7360_v42  ;;  %v1459_v28 = vsel %vm1054_vm2, %v7302_v44, %v7362_v41  ;;  %v6479_v59 = vld [vmem:[%s8903_s1 + $0x318] sm:$0xff] }
  0xeb   : > { %v7332_v34 = vadd.f32 %v748_v15, %v711_v22  ;;  %1630 = vmatmul.bf16.vlgmr.msra.gmra.mxu0 %v1424_v7  ;;  %v7370_v15 = vor.u32 %v6441_v32, %v5494_v0  ;;  %v7378_v7 = vor.u32 %v6440_v47, %v5496_v49  ;;  %v5502_v47 = vld [vmem:[%s6743_s16 + $0x48] sm:$0xf]  ;;  %v6443_v49 = vld [vmem:[%s6743_s16 + $0x4c] sm:$0xf0] }
  0xec   : > { %1668 = vmatmul.bf16.vlgmr.msra.gmra.mxu1 %v1441_v25 }
  0xed   : > { %1886 = vmatmul.bf16.vlgmr.msra.gmra.mxu2 %v1750_v20  ;;  %v1757_v20 = vsel %vm1747_vm3, %v1752_v13, %v1756_v3  ;;  %v1461_v44 = vshrl.u32 %v7370_v15, 16  ;;  %v6503_v13 = vld [vmem:[%s8903_s1 + $0x3d8] sm:$0xff] }
  0xee   : > { %1924 = vmatmul.bf16.vlgmr.msra.gmra.mxu3 %v1753_v5  ;;  %v1464_v5 = vshll.u32 %v7370_v15, 16  ;;  %2182 = vmatpush.bf16.msrb.mxu0 %v6479_v59 }
  0xef   : > { %2476 = vmatpush.bf16.msrb.mxu3 %v6503_v13 }
  0xf0   : > { %v713_v39 = vpop.f32.mrf.mxu2  ;;  %v529_v38 = vpop.f32.mrf.mxu0  ;;  %v1466_v53 = vrot.slane %v1464_v5, 2 }
  0xf1   : > { %v751_v43 = vpop.f32.mrf.mxu3  ;;  %v714_v37 = vadd.f32 %v713_v39, %v566_v29  ;;  %v567_v46 = vpop.f32.mrf.mxu1  ;;  %v1755_v29 = vsel %vm1747_vm3, %v1749_v1, %v1754_v2  ;;  %v1470_v39 = vshrl.u32 %v7378_v7, 16  ;;  %v1473_v1 = vshll.u32 %v7378_v7, 16 }
  0xf2   : > { %v568_v54 = vadd.f32 %v567_v46, %v529_v38  ;;  %v1463_v38 = vrot.slane %v1461_v44, 1 }
  0xf3   : > { %v7346_v55 = vadd.f32 %v751_v43, %v714_v37  ;;  %v6495_v43 = vld [vmem:[%s8903_s1 + $0x398] sm:$0xff]  ;;  %v1475_v56 = vrot.slane %v1473_v1, 2 }
  0xf4   : > { %2438 = vmatpush.bf16.msrb.mxu2 %v6495_v43  ;;  %v7418_v0 = vor.u32 %v1466_v53, %v1463_v38  ;;  %v6478_v53 = vld [vmem:[%s8903_s1 + $0x310] sm:$0xff] }
  0xf5   : > { %2183 = vmatpush.bf16.msrb.mxu0 %v6478_v53 }
  0xf8   : > { %v715_v61 = vpop.f32.mrf.mxu2  ;;  %v532_v26 = vpop.f32.mrf.mxu0 }
  0xf9   : > { %v753_v62 = vpop.f32.mrf.mxu3  ;;  %v716_v19 = vadd.f32 %v715_v61, %v568_v54  ;;  %v570_v22 = vpop.f32.mrf.mxu1  ;;  %v1472_v54 = vrot.slane %v1470_v39, 1  ;;  %v1758_v61 = vrot.slane %v7370_v15, 2 }
  0xfa   : > { %v571_v25 = vadd.f32 %v570_v22, %v532_v26  ;;  %v5504_v26 = vld [vmem:[%s6743_s16 + $0x50] sm:$0xf0] }
  0xfb   : > { %v7390_v8 = vadd.f32 %v753_v62, %v716_v19  ;;  %1635 = vmatmul.bf16.gmra.mxu0 %v1450_v23  ;;  %v7420_v32 = vor.u32 %v1475_v56, %v1472_v54  ;;  %v1760_v62 = vrot.slane %v7378_v7, 2  ;;  %v6442_v19 = vld [vmem:[%s6743_s16 + $0x4c] sm:$0xf] }
  0xfc   : > { %1673 = vmatmul.bf16.gmra.mxu1 %v1459_v28  ;;  %v7428_v28 = vor.u32 %v6443_v49, %v5502_v47  ;;  %v7436_v13 = vor.u32 %v6442_v19, %v5504_v26 }
  0xfd   : > { %1891 = vmatmul.bf16.gmra.mxu2 %v1755_v29  ;;  %v1477_v43 = vsel %vm1054_vm2, %v7362_v41, %v7420_v32  ;;  %v1761_v38 = vsel %vm1747_vm3, %v1756_v3, %v1760_v62  ;;  %v6502_v41 = vld [vmem:[%s8903_s1 + $0x3d0] sm:$0xff] }
  0xfe   : > { %1929 = vmatmul.bf16.gmra.mxu3 %v1757_v20  ;;  %v1468_v20 = vsel %vm1054_vm2, %v7360_v42, %v7418_v0  ;;  %v6494_v42 = vld [vmem:[%s8903_s1 + $0x390] sm:$0xff]  ;;  %v1488_v3 = vshrl.u32 %v7436_v13, 16 }
  0xff   : > { %2439 = vmatpush.bf16.msrb.mxu2 %v6494_v42  ;;  %2477 = vmatpush.bf16.msrb.mxu3 %v6502_v41  ;;  %v6501_v42 = vld [vmem:[%s8903_s1 + $0x3c8] sm:$0xff] }
 0x100   : > { %v718_v45 = vpop.f32.mrf.mxu2  ;;  %v534_v51 = vpop.f32.mrf.mxu0  ;;  %v1490_v26 = vrot.slane %v1488_v3, 1 }
 0x101   : > { %v756_v37 = vpop.f32.mrf.mxu3  ;;  %v719_v46 = vadd.f32 %v718_v45, %v571_v25  ;;  %v572_v52 = vpop.f32.mrf.mxu1  ;;  %v1482_v51 = vshll.u32 %v7428_v28, 16 }
 0x102   : > { %v1491_v52 = vshll.u32 %v7436_v13, 16 }
 0x103   : > { %v7410_v57 = vadd.f32 %v756_v37, %v719_v46  ;;  %v1759_v37 = vsel %vm1747_vm3, %v1754_v2, %v1758_v61  ;;  %v1479_v2 = vshrl.u32 %v7428_v28, 16  ;;  %v1484_v19 = vrot.slane %v1482_v51, 2  ;;  %2478 = vmatpush.bf16.msrb.mxu3 %v6501_v42  ;;  %v6485_v42 = vld [vmem:[%s8903_s1 + $0x348] sm:$0xff] }
 0x105   : > { %v1481_v59 = vrot.slane %v1479_v2, 1 }
 0x107   : > { %v7487_v41 = vor.u32 %v1484_v19, %v1481_v59 }
 0x108   : > { %v720_v22 = vpop.f32.mrf.mxu2  ;;  %v938_v25 = vpop.f32.mrf.mxu0 }
 0x109   : > { %v758_v23 = vpop.f32.mrf.mxu3  ;;  %v976_v29 = vpop.f32.mrf.mxu1  ;;  %v1493_v22 = vrot.slane %v1491_v52, 2 }
 0x10a   : > { %v977_v45 = vadd.f32 %v976_v29, %v938_v25  ;;  %v7474_v23 = vld [vmem:[%s6743_s16 + $0x58] sm:$0xff]  ;;  %v1327_v25 = vld [vmem:[%s6743_s16 + $0x60] sm:$0x33] }
 0x10b   : > { %1640 = vmatmul.bf16.gmra.mxu0 %v1468_v20  ;;  %v7489_v53 = vor.u32 %v1493_v22, %v1490_v26  ;;  %v1486_v26 = vsel %vm1054_vm2, %v7418_v0, %v7487_v41 }
 0x10c   : > { %v1005_v46 = vadd.f32 %v977_v45, %v7167_v63  ;;  %1678 = vmatmul.bf16.gmra.mxu1 %v1477_v43  ;;  %v6486_v63 = vld [vmem:[%s8903_s1 + $0x350] sm:$0xff]  ;;  %v8907_v45 = vunpack.c.l.b16 %v7474_v23 }
 0x10d   : > { %1896 = vmatmul.bf16.gmra.mxu2 %v1759_v37  ;;  %2221 = vmatpush.bf16.msrb.mxu1 %v6486_v63  ;;  %v1394_v37 = vunpack.c.l.b16 %v1327_v25  ;;  %v1395_v63 = vunpack.c.h.b16 %v1327_v25  ;;  %v1495_v22 = vsel %vm1054_vm2, %v7420_v32, %v7489_v53  ;;  %v6477_v32 = vld [vmem:[%s8903_s1 + $0x308] sm:$0xff] }
 0x10e   : > { %1934 = vmatmul.bf16.gmra.mxu3 %v1761_v38  ;;  %v6493_v38 = vld [vmem:[%s8903_s1 + $0x388] sm:$0xff]  ;;  %2184 = vmatpush.bf16.msrb.mxu0 %v6477_v32  ;;  %v6500_v32 = vld [vmem:[%s8903_s1 + $0x3c0] sm:$0xff] }
 0x10f   : > { %2440 = vmatpush.bf16.msrb.mxu2 %v6493_v38  ;;  %2479 = vmatpush.bf16.msrb.mxu3 %v6500_v32 }
 0x110   : > { %v1238_v54 = vpop.f32.mrf.mxu2  ;;  %v940_v47 = vpop.f32.mrf.mxu0 }
 0x111   : > { %v1276_v56 = vpop.f32.mrf.mxu3  ;;  %v978_v49 = vpop.f32.mrf.mxu1  ;;  %2222 = vmatpush.bf16.msrb.mxu1 %v6485_v42 }
 0x112   : > { %v1277_v14 = vadd.f32 %v1276_v56, %v1238_v54  ;;  %v979_v29 = vadd.f32 %v978_v49, %v940_v47  ;;  %v1764_v54 = vrot.slane %v7436_v13, 2  ;;  %v7496_v47 = vpack.c.b16 %v1394_v37, %v8907_v45 }
 0x114   : > { %v7477_v20 = vadd.f32 %v1277_v14, %v1005_v46  ;;  %v1006_v43 = vadd.f32 %v979_v29, %v7183_v16  ;;  %v8906_v46 = vunpack.c.h.b16 %v7474_v23  ;;  %v1762_v16 = vrot.slane %v7428_v28, 2 }
 0x115   : > { %v1765_v0 = vsel %vm1747_vm3, %v1760_v62, %v1764_v54  ;;  %v1500_v62 = vshll.u32 %v7496_v47, 16 }
 0x116   : > { %v7506_v25 = vpack.c.b16 %v1395_v63, %v8906_v46  ;;  %v1763_v37 = vsel %vm1747_vm3, %v1758_v61, %v1762_v16  ;;  %v1497_v61 = vshrl.u32 %v7496_v47, 16 }
 0x118   : > { %v1240_v56 = vpop.f32.mrf.mxu2  ;;  %v943_v59 = vpop.f32.mrf.mxu0 }
 0x119   : > { %v1278_v14 = vpop.f32.mrf.mxu3  ;;  %v981_v19 = vpop.f32.mrf.mxu1 }
 0x11a   : > { %v1279_v49 = vadd.f32 %v1278_v14, %v1240_v56  ;;  %v982_v29 = vadd.f32 %v981_v19, %v943_v59  ;;  %v1509_v56 = vshll.u32 %v7506_v25, 16  ;;  %v1499_v59 = vrot.slane %v1497_v61, 1  ;;  %v6476_v61 = vld [vmem:[%s8903_s1 + $0x300] sm:$0xff] }
 0x11b   : > { %1645 = vmatmul.bf16.gmra.mxu0 %v1486_v26  ;;  %v1502_v26 = vrot.slane %v1500_v62, 2 }
 0x11c   : > { %v7518_v38 = vadd.f32 %v1279_v49, %v1006_v43  ;;  %v1007_v63 = vadd.f32 %v982_v29, %v7191_v48  ;;  %1683 = vmatmul.bf16.gmra.mxu1 %v1495_v22  ;;  %v1506_v43 = vshrl.u32 %v7506_v25, 16  ;;  %v1511_v29 = vrot.slane %v1509_v56, 2  ;;  %2185 = vmatpush.bf16.msrb.mxu0 %v6476_v61 }
 0x11d   : > { %1901 = vmatmul.bf16.gmra.mxu2 %v1763_v37  ;;  %v1768_v56 = vrot.slane %v7506_v25, 2 }
 0x11e   : > { %1939 = vmatmul.bf16.gmra.mxu3 %v1765_v0  ;;  %v1508_v22 = vrot.slane %v1506_v43, 1  ;;  %v6492_v0 = vld [vmem:[%s8903_s1 + $0x380] sm:$0xff]  ;;  %v1766_v43 = vrot.slane %v7496_v47, 2 }
 0x11f   : > { %2441 = vmatpush.bf16.msrb.mxu2 %v6492_v0  ;;  %v1769_v25 = vsel %vm1747_vm3, %v1764_v54, %v1768_v56 }
 0x120   : > { %v1243_v14 = vpop.f32.mrf.mxu2  ;;  %v945_v46 = vpop.f32.mrf.mxu0  ;;  %v1512_v62 = vor.u32 %v1511_v29, %v1508_v22  ;;  %v1767_v47 = vsel %vm1747_vm3, %v1762_v16, %v1766_v43 }
 0x121   : > { %v1281_v49 = vpop.f32.mrf.mxu3  ;;  %v983_v48 = vpop.f32.mrf.mxu1 }
 0x122   : > { %v1282_v19 = vadd.f32 %v1281_v49, %v1243_v14  ;;  %v984_v45 = vadd.f32 %v983_v48, %v945_v46  ;;  %v6484_v46 = vld [vmem:[%s8903_s1 + $0x340] sm:$0xff] }
 0x123   : > { %2223 = vmatpush.bf16.msrb.mxu1 %v6484_v46  ;;  %v6515_v46 = vld [vmem:[%s8903_s1 + $0x438] sm:$0xff] }
 0x124   : > { %v7531_v37 = vadd.f32 %v1282_v19, %v1007_v63  ;;  %v1008_v42 = vadd.f32 %v984_v45, %v7221_v12  ;;  %v1503_v63 = vor.u32 %v1502_v26, %v1499_v59  ;;  %v1513_v59 = vsel %vm1054_vm2, %v7489_v53, %v1512_v62  ;;  %v6539_v53 = vld [vmem:[%s8903_s1 + $0x4f8] sm:$0xff]  ;;  %2743 = vmatpush.bf16.msra.mxu0 %v6515_v46 }
 0x125   : > { %3121 = vmatpush.bf16.msra.mxu3 %v6539_v53 }
 0x126   : > { %v1504_v48 = vsel %vm1054_vm2, %v7487_v41, %v1503_v63  ;;  %v6531_v41 = vld [vmem:[%s8903_s1 + $0x4b8] sm:$0xff] }
 0x127   : > { %3083 = vmatpush.bf16.msra.mxu2 %v6531_v41  ;;  %v6530_v41 = vld [vmem:[%s8903_s1 + $0x4b0] sm:$0xff] }
 0x128   : > { %v1245_v14 = vpop.f32.mrf.mxu2  ;;  %v948_v49 = vpop.f32.mrf.mxu0 }
 0x129   : > { %v1283_v12 = vpop.f32.mrf.mxu3  ;;  %v986_v19 = vpop.f32.mrf.mxu1 }
 0x12a   : > { %v1284_v45 = vadd.f32 %v1283_v12, %v1245_v14  ;;  %v987_v26 = vadd.f32 %v986_v19, %v948_v49  ;;  %v6523_v14 = vld [vmem:[%s8903_s1 + $0x478] sm:$0xff] }
 0x12b   : > { %1650 = vmatmul.bf16.gmra.mxu0 %v1504_v48  ;;  %2781 = vmatpush.bf16.msra.mxu1 %v6523_v14 }
 0x12c   : > { %v7558_v22 = vadd.f32 %v1284_v45, %v1008_v42  ;;  %v1009_v29 = vadd.f32 %v987_v26, %v7231_v10  ;;  %1688 = vmatmul.bf16.gmra.mxu1 %v1513_v59  ;;  %3084 = vmatpush.bf16.msra.mxu2 %v6530_v41 }
 0x12d   : > { %1906 = vmatmul.bf16.gmra.mxu2 %v1767_v47 }
 0x12e   : > { %1944 = vmatmul.bf16.gmra.mxu3 %v1769_v25  ;;  %v2005_v25 = vshrl.u32 %v7287_v58, 16 }
 0x130   : > { %v1248_v16 = vpop.f32.mrf.mxu2  ;;  %v950_v32 = vpop.f32.mrf.mxu0 }
 0x131   : > { %v1286_v54 = vpop.f32.mrf.mxu3  ;;  %v988_v42 = vpop.f32.mrf.mxu1 }
 0x132   : > { %v1287_v0 = vadd.f32 %v1286_v54, %v1248_v16  ;;  %v989_v10 = vadd.f32 %v988_v42, %v950_v32  ;;  %v2008_v16 = vshll.u32 %v7287_v58, 16  ;;  %v2017_v54 = vshrl.u32 %v7290_v40, 16  ;;  %v6514_v32 = vld [vmem:[%s8903_s1 + $0x430] sm:$0xff] }
 0x133   : > { %v6522_v42 = vld [vmem:[%s8903_s1 + $0x470] sm:$0xff]  ;;  %2744 = vmatpush.bf16.msra.mxu0 %v6514_v32 }
 0x134   : > { %v7567_v61 = vadd.f32 %v1287_v0, %v1009_v29  ;;  %v1010_v12 = vadd.f32 %v989_v10, %v7254_v24  ;;  %v2265_v29 = vld [vmem:[%s6743_s16 + $0x8] sm:$0x88]  ;;  %v6538_v24 = vld [vmem:[%s8903_s1 + $0x4f0] sm:$0xff]  ;;  %v2020_v0 = vshll.u32 %v7290_v40, 16  ;;  %2782 = vmatpush.bf16.msra.mxu1 %v6522_v42  ;;  %v2012_v40 = vrot.slane %v1417_v17, 2 }
 0x135   : > { %v2299_v10 = vunpack.c.l.b16 %v2265_v29  ;;  %3122 = vmatpush.bf16.msra.mxu3 %v6538_v24  ;;  %v2019_v46 = vrot.slane %v2017_v54, 2  ;;  %v2308_v54 = vrot.slane %v7251_v6, 3  ;;  %v6521_v42 = vld [vmem:[%s8903_s1 + $0x468] sm:$0xff] }
 0x138   : > { %v1250_v45 = vpop.f32.mrf.mxu2  ;;  %v953_v48 = vpop.f32.mrf.mxu0  ;;  %2783 = vmatpush.bf16.msra.mxu1 %v6521_v42 }
 0x139   : > { %v1288_v49 = vpop.f32.mrf.mxu3  ;;  %v991_v59 = vpop.f32.mrf.mxu1 }
 0x13a   : > { %v1289_v19 = vadd.f32 %v1288_v49, %v1250_v45  ;;  %v992_v26 = vadd.f32 %v991_v59, %v953_v48  ;;  %v2022_v49 = vrot.slane %v2020_v0, 3  ;;  %v2025_v48 = vrot.slane %v1437_v35, 3 }
 0x13b   : > { %1655 = vmatmul.bf16.gmra.mxu0 %v1503_v63  ;;  %v2007_v63 = vrot.slane %v2005_v25, 2 }
 0x13c   : > { %v7576_v47 = vadd.f32 %v1289_v19, %v1010_v12  ;;  %v1011_v53 = vadd.f32 %v992_v26, %v7292_v60  ;;  %1693 = vmatmul.bf16.gmra.mxu1 %v1512_v62  ;;  %v2300_v60 = vunpack.c.h.b16 %v2265_v29  ;;  %v2024_v19 = vrot.slane %v1434_v9, 2  ;;  %v6537_v29 = vld [vmem:[%s8903_s1 + $0x4e8] sm:$0xff] }
 0x13d   : > { %1911 = vmatmul.bf16.gmra.mxu2 %v1766_v43  ;;  %v2010_v43 = vrot.slane %v2008_v16, 3  ;;  %v2301_v26 = vpack.c.b16 %v7233_v33, %v2299_v10  ;;  %v2023_v24 = vor.u32 %v2022_v49, %v2019_v46  ;;  %3123 = vmatpush.bf16.msra.mxu3 %v6537_v29 }
 0x13e   : > { %1949 = vmatmul.bf16.gmra.mxu3 %v1768_v56  ;;  %v2013_v56 = vrot.slane %v1420_v21, 3  ;;  %v2302_v25 = vpack.c.b16 %v7241_v4, %v2300_v60  ;;  %v6529_v21 = vld [vmem:[%s8903_s1 + $0x4a8] sm:$0xff]  ;;  %v2026_v16 = vor.u32 %v2025_v48, %v2024_v19  ;;  %v2305_v4 = vrot.slane %v7248_v18, 3 }
 0x13f   : > { %v2011_v41 = vor.u32 %v2010_v43, %v2007_v63  ;;  %3085 = vmatpush.bf16.msra.mxu2 %v6529_v21  ;;  %v2304_v33 = vrot.slane %v2301_v26, 3  ;;  %v2029_v48 = vrot.slane %v1446_v30, 3  ;;  %v6528_v21 = vld [vmem:[%s8903_s1 + $0x4a0] sm:$0xff] }
 0x140   : > { %v1253_v58 = vpop.f32.mrf.mxu2  ;;  %v955_v12 = vpop.f32.mrf.mxu0  ;;  %v2014_v35 = vor.u32 %v2013_v56, %v2012_v40  ;;  %v2027_v18 = vsel %vm2003_vm4, %v2023_v24, %v2026_v16  ;;  %v6512_v30 = vld [vmem:[%s8903_s1 + $0x420] sm:$0xff]  ;;  %v2312_v24 = vrot.slane %v7324_v27, 3  ;;  %v6527_v27 = vld [vmem:[%s8903_s1 + $0x498] sm:$0xff] }
 0x141   : > { %v1291_v62 = vpop.f32.mrf.mxu3  ;;  %v993_v45 = vpop.f32.mrf.mxu1  ;;  %v2306_v6 = vsel %vm2303_vm5, %v2304_v33, %v2305_v4 }
 0x142   : > { %v1292_v14 = vadd.f32 %v1291_v62, %v1253_v58  ;;  %v994_v59 = vadd.f32 %v993_v45, %v955_v12  ;;  %v2015_v58 = vsel %vm2003_vm4, %v2011_v41, %v2014_v35  ;;  %v2028_v12 = vrot.slane %v1443_v50, 2  ;;  %v6536_v50 = vld [vmem:[%s8903_s1 + $0x4e0] sm:$0xff] }
 0x143   : > { %3086 = vmatpush.bf16.msra.mxu2 %v6528_v21  ;;  %3124 = vmatpush.bf16.msra.mxu3 %v6536_v50  ;;  %v2310_v41 = vrot.slane %v7312_v11, 3 }
 0x144   : > { %v7606_v17 = vadd.f32 %v1292_v14, %v1011_v53  ;;  %v1012_v9 = vadd.f32 %v994_v59, %v7332_v34  ;;  %v2307_v53 = vrot.slane %v2302_v25, 3  ;;  %v6513_v34 = vld [vmem:[%s8903_s1 + $0x428] sm:$0xff]  ;;  %v2032_v59 = vrot.slane %v1452_v31, 2  ;;  %v6520_v31 = vld [vmem:[%s8903_s1 + $0x460] sm:$0xff] }
 0x145   : > { %2745 = vmatpush.bf16.msra.mxu0 %v6513_v34  ;;  %2784 = vmatpush.bf16.msra.mxu1 %v6520_v31  ;;  %v6518_v31 = vld [vmem:[%s8903_s1 + $0x450] sm:$0xff] }
 0x146   : > { %v2309_v43 = vsel %vm2303_vm5, %v2307_v53, %v2308_v54 }
 0x147   : > { %3087 = vmatpush.bf16.msra.mxu2 %v6527_v27  ;;  %v2320_v27 = vrot.slane %v7436_v13, 3  ;;  %v6583_v13 = vld [vmem:[%s8903_s1 + $0x5f8] sm:$0xff] }
 0x148   : > { %v1255_v0 = vpop.f32.mrf.mxu2  ;;  %v958_v60 = vpop.f32.mrf.mxu0 }
 0x149   : > { %v1293_v32 = vpop.f32.mrf.mxu3  ;;  %v996_v63 = vpop.f32.mrf.mxu1  ;;  %2746 = vmatpush.bf16.msra.mxu0 %v6512_v30  ;;  %v6510_v30 = vld [vmem:[%s8903_s1 + $0x410] sm:$0xff] }
 0x14a   : > { %v1294_v10 = vadd.f32 %v1293_v32, %v1255_v0  ;;  %v997_v62 = vadd.f32 %v996_v63, %v958_v60  ;;  %v2311_v60 = vsel %vm2303_vm5, %v2305_v4, %v2310_v41  ;;  %v2313_v63 = vsel %vm2303_vm5, %v2308_v54, %v2312_v24 }
 0x14b   : > { %2186 = vmatmul.bf16.vlgmr.msrb.gmra.mxu0 %v2015_v58  ;;  %v2036_v54 = vrot.slane %v1461_v44, 2  ;;  %v6519_v44 = vld [vmem:[%s8903_s1 + $0x458] sm:$0xff] }
 0x14c   : > { %v7627_v40 = vadd.f32 %v1294_v10, %v1012_v9  ;;  %v1013_v56 = vadd.f32 %v997_v62, %v7346_v55  ;;  %2224 = vmatmul.bf16.vlgmr.msrb.gmra.mxu1 %v2027_v18  ;;  %v2033_v55 = vrot.slane %v1455_v36, 3  ;;  %v2030_v36 = vor.u32 %v2029_v48, %v2028_v12 }
 0x14d   : > { %2442 = vmatmul.bf16.vlgmr.msrb.gmra.mxu2 %v2306_v6  ;;  %v2037_v6 = vrot.slane %v1464_v5, 3  ;;  %2785 = vmatpush.bf16.msra.mxu1 %v6519_v44  ;;  %v2314_v5 = vrot.slane %v7370_v15, 3  ;;  %v6534_v15 = vld [vmem:[%s8903_s1 + $0x4d0] sm:$0xff] }
 0x14e   : > { %2480 = vmatmul.bf16.vlgmr.msrb.gmra.mxu3 %v2309_v43  ;;  %v2034_v9 = vor.u32 %v2033_v55, %v2032_v59  ;;  %v2031_v34 = vsel %vm2003_vm4, %v2014_v35, %v2030_v36  ;;  %v6535_v35 = vld [vmem:[%s8903_s1 + $0x4d8] sm:$0xff]  ;;  %v2040_v43 = vrot.slane %v1470_v39, 2  ;;  %v2316_v39 = vrot.slane %v7378_v7, 3 }
 0x14f   : > { %3125 = vmatpush.bf16.msra.mxu3 %v6535_v35  ;;  %v2038_v12 = vor.u32 %v2037_v6, %v2036_v54  ;;  %v2315_v21 = vsel %vm2303_vm5, %v2310_v41, %v2314_v5 }
 0x150   : > { %v1258_v46 = vpop.f32.mrf.mxu2  ;;  %v960_v49 = vpop.f32.mrf.mxu0  ;;  %v2035_v42 = vsel %vm2003_vm4, %v2026_v16, %v2034_v9  ;;  %v2317_v50 = vsel %vm2303_vm5, %v2312_v24, %v2316_v39 }
 0x151   : > { %v1296_v14 = vpop.f32.mrf.mxu3  ;;  %v998_v19 = vpop.f32.mrf.mxu1  ;;  %v2039_v59 = vsel %vm2003_vm4, %v2030_v36, %v2038_v12  ;;  %2786 = vmatpush.bf16.msra.mxu1 %v6518_v31 }
 0x152   : > { %v1297_v45 = vadd.f32 %v1296_v14, %v1258_v46  ;;  %v999_v26 = vadd.f32 %v998_v19, %v960_v49  ;;  %v6511_v14 = vld [vmem:[%s8903_s1 + $0x418] sm:$0xff] }
 0x153   : > { %2747 = vmatpush.bf16.msra.mxu0 %v6511_v14  ;;  %3126 = vmatpush.bf16.msra.mxu3 %v6534_v15 }
 0x154   : > { %v7638_v25 = vadd.f32 %v1297_v45, %v1013_v56  ;;  %v1014_v29 = vadd.f32 %v999_v26, %v7390_v8  ;;  %v2041_v56 = vrot.slane %v1473_v1, 3 }
 0x156   : > { %v2042_v45 = vor.u32 %v2041_v56, %v2040_v43  ;;  %v8918_v43 = vunpack.c.h.b16 %v7474_v23 }
 0x157   : > { %2748 = vmatpush.bf16.msra.mxu0 %v6510_v30 }
 0x158   : > { %v1260_v33 = vpop.f32.mrf.mxu2  ;;  %v963_v0 = vpop.f32.mrf.mxu0  ;;  %v2043_v55 = vsel %vm2003_vm4, %v2034_v9, %v2042_v45 }
 0x159   : > { %v1298_v8 = vpop.f32.mrf.mxu3  ;;  %v1001_v32 = vpop.f32.mrf.mxu1 }
 0x15a   : > { %v1299_v53 = vadd.f32 %v1298_v8, %v1260_v33  ;;  %v1002_v10 = vadd.f32 %v1001_v32, %v963_v0  ;;  %v2045_v8 = vrot.slane %v1482_v51, 3  ;;  %v2049_v0 = vrot.slane %v1491_v52, 3  ;;  %v1965_v32 = vld [vmem:[%s6743_s16 + $0x60] sm:$0x77]  ;;  %v6533_v51 = vld [vmem:[%s8903_s1 + $0x4c8] sm:$0xff] }
 0x15b   : > { %2191 = vmatmul.bf16.gmra.mxu0 %v2031_v34  ;;  %v2000_v52 = vunpack.c.h.b16 %v1965_v32  ;;  %3127 = vmatpush.bf16.msra.mxu3 %v6533_v51 }
 0x15c   : > { %v7659_v58 = vadd.f32 %v1299_v53, %v1014_v29  ;;  %v1015_v11 = vadd.f32 %v1002_v10, %v7410_v57  ;;  %2229 = vmatmul.bf16.gmra.mxu1 %v2035_v42  ;;  %v6526_v29 = vld [vmem:[%s8903_s1 + $0x490] sm:$0xff]  ;;  %v2048_v53 = vrot.slane %v1488_v3, 2 }
 0x15d   : > { %2447 = vmatmul.bf16.gmra.mxu2 %v2311_v60  ;;  %v1999_v60 = vunpack.c.l.b16 %v1965_v32  ;;  %v7737_v56 = vpack.c.b16 %v2000_v52, %v8918_v43  ;;  %v7812_v43 = vld [vmem:[%s6743_s16 + $0x28] sm:$0xff] }
 0x15e   : > { %2485 = vmatmul.bf16.gmra.mxu3 %v2313_v63  ;;  %3088 = vmatpush.bf16.msra.mxu2 %v6526_v29  ;;  %v7723_v3 = vor.u32 %v2049_v0, %v2048_v53 }
 0x15f   : > { %v2324_v0 = vrot.slane %v7737_v56, 3 }
 0x160   : > { %v1263_v16 = vpop.f32.mrf.mxu2  ;;  %v965_v18 = vpop.f32.mrf.mxu0  ;;  %v2051_v6 = vsel %vm2003_vm4, %v2042_v45, %v7723_v3 }
 0x161   : > { %v1301_v4 = vpop.f32.mrf.mxu3  ;;  %v1003_v62 = vpop.f32.mrf.mxu1 }
 0x162   : > { %v1302_v57 = vadd.f32 %v1301_v4, %v1263_v16  ;;  %v8917_v16 = vunpack.c.l.b16 %v7474_v23  ;;  %v6517_v23 = vld [vmem:[%s8903_s1 + $0x448] sm:$0xff] }
 0x163   : > { %2787 = vmatpush.bf16.msra.mxu1 %v6517_v23 }
 0x164   : > { %v7676_v46 = vadd.f32 %v1302_v57, %v1015_v11  ;;  %v2318_v11 = vrot.slane %v7428_v28, 3  ;;  %v7729_v4 = vpack.c.b16 %v1999_v60, %v8917_v16  ;;  %v6575_v28 = vld [vmem:[%s8903_s1 + $0x5b8] sm:$0xff] }
 0x166   : > { %v2319_v44 = vsel %vm2303_vm5, %v2314_v5, %v2318_v11  ;;  %v2053_v5 = vshrl.u32 %v7729_v4, 16  ;;  %v2322_v53 = vrot.slane %v7729_v4, 3 }
 0x168   : > { %v1265_v49 = vpop.f32.mrf.mxu2  ;;  %v1631_v19 = vpop.f32.mrf.mxu0 }
 0x169   : > { %v1303_v1 = vpop.f32.mrf.mxu3  ;;  %v1669_v48 = vpop.f32.mrf.mxu1  ;;  %v2321_v49 = vsel %vm2303_vm5, %v2316_v39, %v2320_v27  ;;  %v2056_v39 = vshll.u32 %v7729_v4, 16 }
 0x16a   : > { %v1670_v26 = vadd.f32 %v1669_v48, %v1631_v19  ;;  %v2062_v19 = vshrl.u32 %v7737_v56, 16  ;;  %v2065_v48 = vshll.u32 %v7737_v56, 16 }
 0x16b   : > { %2196 = vmatmul.bf16.gmra.mxu0 %v2039_v59  ;;  %v2058_v29 = vrot.slane %v2056_v39, 3  ;;  %v2583_v39 = vunpack.c.l.b16 %v7812_v43 }
 0x16c   : > { %v1698_v7 = vadd.f32 %v1670_v26, %v7477_v20  ;;  %2234 = vmatmul.bf16.gmra.mxu1 %v2043_v55  ;;  %v2044_v20 = vrot.slane %v1479_v2, 2  ;;  %v6525_v2 = vld [vmem:[%s8903_s1 + $0x488] sm:$0xff]  ;;  %v2055_v26 = vrot.slane %v2053_v5, 2  ;;  %v2064_v15 = vrot.slane %v2062_v19, 2 }
 0x16d   : > { %2452 = vmatmul.bf16.gmra.mxu2 %v2315_v21 }
 0x16e   : > { %2490 = vmatmul.bf16.gmra.mxu3 %v2317_v50  ;;  %v7721_v63 = vor.u32 %v2045_v8, %v2044_v20  ;;  %3089 = vmatpush.bf16.msra.mxu2 %v6525_v2 }
 0x170   : > { %v1887_v36 = vpop.f32.mrf.mxu2  ;;  %v1633_v24 = vpop.f32.mrf.mxu0  ;;  %v2047_v62 = vsel %vm2003_vm4, %v2038_v12, %v7721_v63  ;;  %v6509_v12 = vld [vmem:[%s8903_s1 + $0x408] sm:$0xff] }
 0x171   : > { %v1925_v9 = vpop.f32.mrf.mxu3  ;;  %v1671_v33 = vpop.f32.mrf.mxu1  ;;  %2749 = vmatpush.bf16.msra.mxu0 %v6509_v12 }
 0x172   : > { %v1926_v41 = vadd.f32 %v1925_v9, %v1887_v36  ;;  %v1672_v34 = vadd.f32 %v1671_v33, %v1633_v24  ;;  %v6524_v36 = vld [vmem:[%s8903_s1 + $0x480] sm:$0xff]  ;;  %v7773_v33 = vor.u32 %v2058_v29, %v2055_v26 }
 0x173   : > { %v6532_v9 = vld [vmem:[%s8903_s1 + $0x4c0] sm:$0xff]  ;;  %3090 = vmatpush.bf16.msra.mxu2 %v6524_v36 }
 0x174   : > { %v7712_v42 = vadd.f32 %v1926_v41, %v1698_v7  ;;  %v1699_v10 = vadd.f32 %v1672_v34, %v7518_v38  ;;  %v2067_v7 = vrot.slane %v2065_v48, 3  ;;  %v6508_v41 = vld [vmem:[%s8903_s1 + $0x400] sm:$0xff]  ;;  %3128 = vmatpush.bf16.msra.mxu3 %v6532_v9  ;;  %v2060_v2 = vsel %vm2003_vm4, %v7721_v63, %v7773_v33 }
 0x175   : > { %v6516_v24 = vld [vmem:[%s8903_s1 + $0x440] sm:$0xff]  ;;  %2750 = vmatpush.bf16.msra.mxu0 %v6508_v41  ;;  %v6582_v41 = vld [vmem:[%s8903_s1 + $0x5f0] sm:$0xff] }
 0x176   : > { %v7775_v8 = vor.u32 %v2067_v7, %v2064_v15  ;;  %2788 = vmatpush.bf16.msra.mxu1 %v6516_v24 }
 0x177   : > { %3703 = vmatpush.bf16.msrb.mxu2 %v6575_v28 }
 0x178   : > { %v1889_v38 = vpop.f32.mrf.mxu2  ;;  %v1636_v57 = vpop.f32.mrf.mxu0  ;;  %v2069_v51 = vsel %vm2003_vm4, %v7723_v3, %v7775_v8  ;;  %3741 = vmatpush.bf16.msrb.mxu3 %v6583_v13  ;;  %vm5072_vm4 = vsmask.f32 256 }
 0x179   : > { %v1927_v35 = vpop.f32.mrf.mxu3  ;;  %v1674_v18 = vpop.f32.mrf.mxu1 }
 0x17a   : > { %v1928_v54 = vadd.f32 %v1927_v35, %v1889_v38  ;;  %v1675_v14 = vadd.f32 %v1674_v18, %v1636_v57  ;;  %v2323_v38 = vsel %vm2303_vm5, %v2318_v11, %v2322_v53  ;;  %v2325_v35 = vsel %vm2303_vm5, %v2320_v27, %v2324_v0  ;;  %v2521_v57 = vld [vmem:[%s6743_s16 + $0x10] sm:$0x88]  ;;  %v7806_v18 = vld [vmem:[%s6743_s16 + $0x18] sm:$0xff] }
 0x17b   : > { %2201 = vmatmul.bf16.gmra.mxu0 %v2047_v62  ;;  %v2577_v23 = vunpack.c.l.b16 %v2521_v57  ;;  %v2578_v19 = vunpack.c.h.b16 %v2521_v57  ;;  %v2580_v48 = vunpack.c.h.b16 %v7806_v18 }
 0x17c   : > { %v7745_v1 = vadd.f32 %v1928_v54, %v1699_v10  ;;  %v1700_v45 = vadd.f32 %v1675_v14, %v7531_v37  ;;  %2239 = vmatmul.bf16.gmra.mxu1 %v2051_v6  ;;  %v7809_v6 = vld [vmem:[%s6743_s16 + $0x20] sm:$0xff]  ;;  %3742 = vmatpush.bf16.msrb.mxu3 %v6582_v41 }
 0x17d   : > { %2457 = vmatmul.bf16.gmra.mxu2 %v2319_v44  ;;  %v6547_v44 = vld [vmem:[%s8903_s1 + $0x538] sm:$0xff]  ;;  %v2581_v5 = vunpack.c.l.b16 %v7809_v6  ;;  %v7841_v7 = vpack.c.b16 %v2580_v48, %v2578_v19 }
 0x17e   : > { %2495 = vmatmul.bf16.gmra.mxu3 %v2321_v49  ;;  %v6555_v49 = vld [vmem:[%s8903_s1 + $0x578] sm:$0xff]  ;;  %3322 = vmatpush.bf16.msrb.mxu0 %v6547_v44 }
 0x17f   : > { %3360 = vmatpush.bf16.msrb.mxu1 %v6555_v49  ;;  %v7837_v15 = vpack.c.b16 %v2583_v39, %v2581_v5  ;;  %v2890_v4 = vshll.u32 %v7841_v7, 16  ;;  %v6573_v49 = vld [vmem:[%s8903_s1 + $0x5a8] sm:$0xff] }
 0x180   : > { %v1892_v59 = vpop.f32.mrf.mxu2  ;;  %v1638_v50 = vpop.f32.mrf.mxu0 }
 0x181   : > { %v1930_v55 = vpop.f32.mrf.mxu3  ;;  %v1676_v37 = vpop.f32.mrf.mxu1  ;;  %v2614_v19 = vrot.slane %v7837_v15, 3 }
 0x182   : > { %v1931_v21 = vadd.f32 %v1930_v55, %v1892_v59  ;;  %v1677_v30 = vadd.f32 %v1676_v37, %v1638_v50  ;;  %v2582_v59 = vunpack.c.h.b16 %v7809_v6  ;;  %v2584_v55 = vunpack.c.h.b16 %v7812_v43  ;;  %v6611_v43 = vld [vmem:[%s8903_s1 + $0x698] sm:$0xff] }
 0x184   : > { %v7758_v31 = vadd.f32 %v1931_v21, %v1700_v45  ;;  %v1701_v20 = vadd.f32 %v1677_v30, %v7558_v22  ;;  %v2579_v45 = vunpack.c.l.b16 %v7806_v18  ;;  %v7847_v36 = vpack.c.b16 %v2584_v55, %v2582_v59 }
 0x186   : > { %v2898_v56 = vshll.u32 %v7847_v36, 16 }
 0x188   : > { %v1894_v22 = vpop.f32.mrf.mxu2  ;;  %v1641_v10 = vpop.f32.mrf.mxu0  ;;  %v2900_v57 = vrot.slane %v2898_v56, 4 }
 0x189   : > { %v1932_v32 = vpop.f32.mrf.mxu3  ;;  %v1679_v60 = vpop.f32.mrf.mxu1 }
 0x18a   : > { %v1933_v34 = vadd.f32 %v1932_v32, %v1894_v22  ;;  %v1680_v52 = vadd.f32 %v1679_v60, %v1641_v10  ;;  %v2881_v10 = vshll.u32 %v7837_v15, 16 }
 0x18b   : > { %2206 = vmatmul.bf16.gmra.mxu0 %v2060_v2 }
 0x18c   : > { %v7795_v16 = vadd.f32 %v1933_v34, %v1701_v20  ;;  %v1702_v63 = vadd.f32 %v1680_v52, %v7567_v61  ;;  %2244 = vmatmul.bf16.gmra.mxu1 %v2069_v51  ;;  %v6574_v20 = vld [vmem:[%s8903_s1 + $0x5b0] sm:$0xff]  ;;  %v2878_v34 = vshrl.u32 %v7837_v15, 16  ;;  %v2883_v28 = vrot.slane %v2881_v10, 4 }
 0x18d   : > { %2462 = vmatmul.bf16.gmra.mxu2 %v2323_v38 }
 0x18e   : > { %2500 = vmatmul.bf16.gmra.mxu3 %v2325_v35  ;;  %3704 = vmatpush.bf16.msrb.mxu2 %v6574_v20 }
 0x190   : > { %v1897_v3 = vpop.f32.mrf.mxu2  ;;  %v1643_v61 = vpop.f32.mrf.mxu0 }
 0x191   : > { %v1935_v11 = vpop.f32.mrf.mxu3  ;;  %v1681_v54 = vpop.f32.mrf.mxu1 }
 0x192   : > { %v1936_v27 = vadd.f32 %v1935_v11, %v1897_v3  ;;  %v1682_v62 = vadd.f32 %v1681_v54, %v1643_v61  ;;  %v7879_v3 = vld [vmem:[%s6743_s16 + $0x30] sm:$0xff]  ;;  %v7882_v11 = vld [vmem:[%s6743_s16 + $0x38] sm:$0xff]  ;;  %v2892_v61 = vrot.slane %v2890_v4, 4  ;;  %3705 = vmatpush.bf16.msrb.mxu2 %v6573_v49 }
 0x194   : > { %v7814_v14 = vadd.f32 %v1936_v27, %v1702_v63  ;;  %v1703_v12 = vadd.f32 %v1682_v62, %v7576_v47  ;;  %v7831_v47 = vpack.c.b16 %v2579_v45, %v2577_v23  ;;  %v2880_v63 = vrot.slane %v2878_v34, 3  ;;  %v6553_v34 = vld [vmem:[%s8903_s1 + $0x568] sm:$0xff] }
 0x196   : > { %v2870_v22 = vshrl.u32 %v7831_v47, 16  ;;  %v2873_v32 = vshll.u32 %v7831_v47, 16  ;;  %v2613_v44 = vrot.slane %v7831_v47, 3  ;;  %v2617_v47 = vrot.slane %v7847_v36, 3 }
 0x197   : > { %v7901_v20 = vor.u32 %v2883_v28, %v2880_v63 }
 0x198   : > { %v1899_v26 = vpop.f32.mrf.mxu2  ;;  %v1646_v37 = vpop.f32.mrf.mxu0  ;;  %v2872_v2 = vrot.slane %v2870_v22, 3  ;;  %v2875_v51 = vrot.slane %v2873_v32, 4  ;;  %v6545_v32 = vld [vmem:[%s8903_s1 + $0x528] sm:$0xff] }
 0x199   : > { %v1937_v21 = vpop.f32.mrf.mxu3  ;;  %v1684_v29 = vpop.f32.mrf.mxu1 }
 0x19a   : > { %v1938_v50 = vadd.f32 %v1937_v21, %v1899_v26  ;;  %v1685_v30 = vadd.f32 %v1684_v29, %v1646_v37  ;;  %v2585_v26 = vunpack.c.l.b16 %v7879_v3  ;;  %v2587_v21 = vunpack.c.l.b16 %v7882_v11 }
 0x19b   : > { %2211 = vmatmul.bf16.gmra.mxu0 %v7773_v33  ;;  %v6546_v33 = vld [vmem:[%s8903_s1 + $0x530] sm:$0xff]  ;;  %v2586_v37 = vunpack.c.h.b16 %v7879_v3  ;;  %v2588_v29 = vunpack.c.h.b16 %v7882_v11 }
 0x19c   : > { %v7849_v9 = vadd.f32 %v1938_v50, %v1703_v12  ;;  %v1704_v24 = vadd.f32 %v1685_v30, %v7606_v17  ;;  %2249 = vmatmul.bf16.gmra.mxu1 %v7775_v8  ;;  %v2887_v17 = vshrl.u32 %v7841_v7, 16  ;;  %v6554_v8 = vld [vmem:[%s8903_s1 + $0x570] sm:$0xff]  ;;  %3323 = vmatpush.bf16.msrb.mxu0 %v6546_v33  ;;  %v6581_v12 = vld [vmem:[%s8903_s1 + $0x5e8] sm:$0xff]  ;;  %v2616_v50 = vrot.slane %v7841_v7, 3 }
 0x19d   : > { %2467 = vmatmul.bf16.gmra.mxu2 %v2322_v53  ;;  %v2895_v53 = vshrl.u32 %v7847_v36, 16  ;;  %3361 = vmatpush.bf16.msrb.mxu1 %v6554_v8  ;;  %v2876_v30 = vor.u32 %v2875_v51, %v2872_v2  ;;  %v7909_v7 = vpack.c.b16 %v2587_v21, %v2585_v26  ;;  %v2615_v8 = vsel %vm2303_vm5, %v2613_v44, %v2614_v19  ;;  %v6618_v11 = vld [vmem:[%s8903_s1 + $0x6d0] sm:$0xff] }
 0x19e   : > { %2505 = vmatmul.bf16.gmra.mxu3 %v2324_v0  ;;  %v2889_v13 = vrot.slane %v2887_v17, 3  ;;  %v2618_v4 = vsel %vm2303_vm5, %v2616_v50, %v2617_v47 }
 0x19f   : > { %v2897_v54 = vrot.slane %v2895_v53, 3  ;;  %3743 = vmatpush.bf16.msrb.mxu3 %v6581_v12  ;;  %v7927_v53 = vpack.c.b16 %v2588_v29, %v2586_v37 }
 0x1a0   : > { %v1902_v0 = vpop.f32.mrf.mxu2  ;;  %v1648_v38 = vpop.f32.mrf.mxu0  ;;  %3324 = vmatpush.bf16.msrb.mxu0 %v6545_v32  ;;  %v6544_v32 = vld [vmem:[%s8903_s1 + $0x520] sm:$0xff] }
 0x1a1   : > { %v1940_v60 = vpop.f32.mrf.mxu3  ;;  %v1686_v35 = vpop.f32.mrf.mxu1  ;;  %v7903_v41 = vor.u32 %v2900_v57, %v2897_v54  ;;  %3362 = vmatpush.bf16.msrb.mxu1 %v6553_v34  ;;  %v2916_v63 = vshll.u32 %v7927_v53, 16  ;;  %v6552_v34 = vld [vmem:[%s8903_s1 + $0x560] sm:$0xff] }
 0x1a2   : > { %v1941_v52 = vadd.f32 %v1940_v60, %v1902_v0  ;;  %v1687_v27 = vadd.f32 %v1686_v35, %v1648_v38  ;;  %v2885_v0 = vsel %vm2868_vm6, %v2876_v30, %v7901_v20  ;;  %v2907_v38 = vshll.u32 %v7909_v7, 16  ;;  %v7946_v30 = vld [vmem:[%s6743_s16 + $0x48] sm:$0xff] }
 0x1a3   : > { %v2913_v35 = vshrl.u32 %v7927_v53, 16  ;;  %v2918_v49 = vrot.slane %v2916_v63, 4 }
 0x1a4   : > { %v7884_v62 = vadd.f32 %v1941_v52, %v1704_v24  ;;  %v1705_v23 = vadd.f32 %v1687_v27, %v7627_v40  ;;  %v2893_v40 = vor.u32 %v2892_v61, %v2889_v13  ;;  %v2904_v52 = vshrl.u32 %v7909_v7, 16  ;;  %3325 = vmatpush.bf16.msrb.mxu0 %v6544_v32 }
 0x1a5   : > { %v2909_v57 = vrot.slane %v2907_v38, 4  ;;  %v2915_v44 = vrot.slane %v2913_v35, 3  ;;  %3363 = vmatpush.bf16.msrb.mxu1 %v6552_v34 }
 0x1a6   : > { %v2902_v60 = vsel %vm2868_vm6, %v2893_v40, %v7903_v41  ;;  %v2906_v27 = vrot.slane %v2904_v52, 3  ;;  %v6572_v40 = vld [vmem:[%s8903_s1 + $0x5a0] sm:$0xff] }
 0x1a7   : > { %3706 = vmatpush.bf16.msrb.mxu2 %v6572_v40 }
 0x1a8   : > { %v1904_v24 = vpop.f32.mrf.mxu2  ;;  %v1651_v17 = vpop.f32.mrf.mxu0 }
 0x1a9   : > { %v1942_v22 = vpop.f32.mrf.mxu3  ;;  %v1689_v33 = vpop.f32.mrf.mxu1 }
 0x1aa   : > { %v1943_v10 = vadd.f32 %v1942_v22, %v1904_v24  ;;  %v1690_v56 = vadd.f32 %v1689_v33, %v1651_v17  ;;  %v6580_v24 = vld [vmem:[%s8903_s1 + $0x5e0] sm:$0xff]  ;;  %v2621_v17 = vrot.slane %v7927_v53, 3  ;;  %v7963_v33 = vor.u32 %v2909_v57, %v2906_v27 }
 0x1ab   : > { %2751 = vmatmul.bf16.vlgmr.msra.gmra.mxu0 %v2615_v8  ;;  %v7965_v8 = vor.u32 %v2918_v49, %v2915_v44  ;;  %3744 = vmatpush.bf16.msrb.mxu3 %v6580_v24 }
 0x1ac   : > { %v7933_v2 = vadd.f32 %v1943_v10, %v1705_v23  ;;  %v1706_v51 = vadd.f32 %v1690_v56, %v7638_v25  ;;  %2789 = vmatmul.bf16.vlgmr.msra.gmra.mxu1 %v2618_v4  ;;  %v7941_v23 = vld [vmem:[%s6743_s16 + $0x40] sm:$0xff]  ;;  %v2619_v10 = vrot.slane %v7909_v7, 3  ;;  %v8913_v4 = vunpack.c.l.b16 %v7946_v30 }
 0x1ad   : > { %3091 = vmatmul.bf16.vlgmr.msra.gmra.mxu2 %v2885_v0  ;;  %v8914_v56 = vunpack.c.h.b16 %v7941_v23  ;;  %v8911_v0 = vunpack.c.h.b16 %v7946_v30 }
 0x1ae   : > { %3129 = vmatmul.bf16.vlgmr.msra.gmra.mxu3 %v2902_v60  ;;  %v2620_v63 = vsel %vm2303_vm5, %v2614_v19, %v2619_v10 }
 0x1af   : > { %v7997_v36 = vpack.c.b16 %v8911_v0, %v8914_v56 }
 0x1b0   : > { %v1907_v28 = vpop.f32.mrf.mxu2  ;;  %v1653_v54 = vpop.f32.mrf.mxu0 }
 0x1b1   : > { %v1945_v13 = vpop.f32.mrf.mxu3  ;;  %v1691_v25 = vpop.f32.mrf.mxu1  ;;  %v2934_v57 = vshll.u32 %v7997_v36, 16 }
 0x1b2   : > { %v1946_v61 = vadd.f32 %v1945_v13, %v1907_v28  ;;  %v1692_v12 = vadd.f32 %v1691_v25, %v1653_v54  ;;  %v2622_v28 = vsel %vm2303_vm5, %v2617_v47, %v2621_v17  ;;  %v2911_v13 = vsel %vm2868_vm6, %v7901_v20, %v7963_v33  ;;  %v6571_v20 = vld [vmem:[%s8903_s1 + $0x598] sm:$0xff] }
 0x1b3   : > { %3707 = vmatpush.bf16.msrb.mxu2 %v6571_v20 }
 0x1b4   : > { %v7943_v50 = vadd.f32 %v1946_v61, %v1706_v51  ;;  %v1707_v22 = vadd.f32 %v1692_v12, %v7659_v58  ;;  %v2589_v58 = vunpack.c.l.b16 %v7941_v23  ;;  %v2920_v61 = vsel %vm2868_vm6, %v7903_v41, %v7965_v8  ;;  %v6579_v41 = vld [vmem:[%s8903_s1 + $0x5d8] sm:$0xff] }
 0x1b5   : > { %3745 = vmatpush.bf16.msrb.mxu3 %v6579_v41 }
 0x1b6   : > { %v7991_v15 = vpack.c.b16 %v8913_v4, %v2589_v58 }
 0x1b8   : > { %v1909_v60 = vpop.f32.mrf.mxu2  ;;  %v1656_v38 = vpop.f32.mrf.mxu0  ;;  %v2922_v54 = vshrl.u32 %v7991_v15, 16  ;;  %v2925_v25 = vshll.u32 %v7991_v15, 16 }
 0x1b9   : > { %v1947_v51 = vpop.f32.mrf.mxu3  ;;  %v1694_v35 = vpop.f32.mrf.mxu1 }
 0x1ba   : > { %v1948_v52 = vadd.f32 %v1947_v51, %v1909_v60  ;;  %v1695_v27 = vadd.f32 %v1694_v35, %v1656_v38  ;;  %v2927_v32 = vrot.slane %v2925_v25, 4  ;;  %v2936_v60 = vrot.slane %v2934_v57, 4  ;;  %v8013_v51 = vld [vmem:[%s6743_s16 + $0x50] sm:$0xff]  ;;  %v6543_v35 = vld [vmem:[%s8903_s1 + $0x518] sm:$0xff] }
 0x1bb   : > { %2756 = vmatmul.bf16.gmra.mxu0 %v2620_v63  ;;  %v6551_v63 = vld [vmem:[%s8903_s1 + $0x558] sm:$0xff]  ;;  %v8910_v41 = vunpack.c.h.b16 %v8013_v51 }
 0x1bc   : > { %v7999_v19 = vadd.f32 %v1948_v52, %v1707_v22  ;;  %v1708_v47 = vadd.f32 %v1695_v27, %v7676_v46  ;;  %2794 = vmatmul.bf16.gmra.mxu1 %v2622_v28  ;;  %v2931_v46 = vshrl.u32 %v7997_v36, 16  ;;  %v2924_v22 = vrot.slane %v2922_v54, 3  ;;  %v8016_v52 = vld [vmem:[%s6743_s16 + $0x58] sm:$0xff]  ;;  %3326 = vmatpush.bf16.msrb.mxu0 %v6543_v35 }
 0x1bd   : > { %3096 = vmatmul.bf16.gmra.mxu2 %v2911_v13  ;;  %v2623_v28 = vrot.slane %v7991_v15, 3  ;;  %v2625_v13 = vrot.slane %v7997_v36, 3  ;;  %v8912_v27 = vunpack.c.l.b16 %v8013_v51  ;;  %3364 = vmatpush.bf16.msrb.mxu1 %v6551_v63  ;;  %v8908_v54 = vunpack.c.h.b16 %v8016_v52  ;;  %v6541_v36 = vld [vmem:[%s8903_s1 + $0x508] sm:$0xff] }
 0x1be   : > { %3134 = vmatmul.bf16.gmra.mxu3 %v2920_v61  ;;  %v2933_v34 = vrot.slane %v2931_v46, 3  ;;  %v8909_v61 = vunpack.c.l.b16 %v8016_v52 }
 0x1bf   : > { %v8062_v53 = vpack.c.b16 %v8908_v54, %v8910_v41  ;;  %v2531_v54 = vld [vmem:[%s6743_s16 + $0x60] sm:$0xff] }
 0x1c0   : > { %v1912_v44 = vpop.f32.mrf.mxu2  ;;  %v1658_v40 = vpop.f32.mrf.mxu0  ;;  %v8032_v20 = vor.u32 %v2936_v60, %v2933_v34  ;;  %v6550_v34 = vld [vmem:[%s8903_s1 + $0x550] sm:$0xff] }
 0x1c1   : > { %v1950_v49 = vpop.f32.mrf.mxu3  ;;  %v1696_v24 = vpop.f32.mrf.mxu1  ;;  %v8050_v40 = vpack.c.b16 %v8909_v61, %v8912_v27  ;;  %v2949_v35 = vshrl.u32 %v8062_v53, 16  ;;  %3365 = vmatpush.bf16.msrb.mxu1 %v6550_v34  ;;  %v2830_v61 = vld [vmem:[%s6743_s16 + $0x68] sm:$0xff]  ;;  %v8094_v34 = vunpack.c.l.b16 %v2531_v54 }
 0x1c2   : > { %v1951_v12 = vadd.f32 %v1950_v49, %v1912_v44  ;;  %v2624_v49 = vsel %vm2303_vm5, %v2619_v10, %v2623_v28  ;;  %v2938_v7 = vsel %vm2868_vm6, %v7965_v8, %v8032_v20  ;;  %v6570_v10 = vld [vmem:[%s8903_s1 + $0x590] sm:$0xff] }
 0x1c3   : > { %v2940_v8 = vshrl.u32 %v8050_v40, 16  ;;  %v2943_v60 = vshll.u32 %v8050_v40, 16  ;;  %3708 = vmatpush.bf16.msrb.mxu2 %v6570_v10  ;;  %v6569_v10 = vld [vmem:[%s8903_s1 + $0x588] sm:$0xff] }
 0x1c4   : > { %v8018_v38 = vadd.f32 %v1951_v12, %v1708_v47  ;;  %v8030_v47 = vor.u32 %v2927_v32, %v2924_v22  ;;  %v2626_v12 = vsel %vm2303_vm5, %v2621_v17, %v2625_v13  ;;  %v6578_v17 = vld [vmem:[%s8903_s1 + $0x5d0] sm:$0xff] }
 0x1c5   : > { %v6542_v32 = vld [vmem:[%s8903_s1 + $0x510] sm:$0xff]  ;;  %3746 = vmatpush.bf16.msrb.mxu3 %v6578_v17  ;;  %v6577_v17 = vld [vmem:[%s8903_s1 + $0x5c8] sm:$0xff] }
 0x1c6   : > { %v2929_v22 = vsel %vm2868_vm6, %v7963_v33, %v8030_v47  ;;  %3327 = vmatpush.bf16.msrb.mxu0 %v6542_v32  ;;  %v2629_v32 = vrot.slane %v8062_v53, 3 }
 0x1c7   : > { %3709 = vmatpush.bf16.msrb.mxu2 %v6569_v10 }
 0x1c8   : > { %v1914_v25 = vpop.f32.mrf.mxu2  ;;  %v2187_v57 = vpop.f32.mrf.mxu0 }
 0x1c9   : > { %v1952_v46 = vpop.f32.mrf.mxu3  ;;  %v2225_v44 = vpop.f32.mrf.mxu1  ;;  %3747 = vmatpush.bf16.msrb.mxu3 %v6577_v17 }
 0x1ca   : > { %v2226_v24 = vadd.f32 %v2225_v44, %v2187_v57  ;;  %3328 = vmatpush.bf16.msrb.mxu0 %v6541_v36 }
 0x1cb   : > { %2761 = vmatmul.bf16.gmra.mxu0 %v2624_v49  ;;  %v2942_v49 = vrot.slane %v2940_v8, 3  ;;  %v2627_v8 = vrot.slane %v8050_v40, 3  ;;  %v6615_v40 = vld [vmem:[%s8903_s1 + $0x6b8] sm:$0xff] }
 0x1cc   : > { %v2254_v33 = vadd.f32 %v2226_v24, %v7712_v42  ;;  %2799 = vmatmul.bf16.gmra.mxu1 %v2626_v12  ;;  %v2952_v42 = vshll.u32 %v8062_v53, 16  ;;  %v2945_v24 = vrot.slane %v2943_v60, 4  ;;  %v8096_v60 = vunpack.c.l.b16 %v2830_v61  ;;  %v6623_v53 = vld [vmem:[%s8903_s1 + $0x6f8] sm:$0xff] }
 0x1cd   : > { %3101 = vmatmul.bf16.gmra.mxu2 %v2929_v22  ;;  %v2951_v22 = vrot.slane %v2949_v35, 3 }
 0x1ce   : > { %3139 = vmatmul.bf16.gmra.mxu3 %v2938_v7  ;;  %v2954_v7 = vrot.slane %v2952_v42, 4  ;;  %v8104_v42 = vunpack.c.h.b16 %v2830_v61  ;;  %v2630_v61 = vsel %vm2303_vm5, %v2625_v13, %v2629_v32  ;;  %v6549_v13 = vld [vmem:[%s8903_s1 + $0x548] sm:$0xff] }
 0x1cf   : > { %3366 = vmatpush.bf16.msrb.mxu1 %v6549_v13  ;;  %v6540_v13 = vld [vmem:[%s8903_s1 + $0x500] sm:$0xff] }
 0x1d0   : > { %v2443_v63 = vpop.f32.mrf.mxu2  ;;  %v2189_v57 = vpop.f32.mrf.mxu0  ;;  %v8100_v35 = vor.u32 %v2954_v7, %v2951_v22  ;;  %v2532_v22 = vld [vmem:[%s6743_s16 + $0x68] sm:$0x77]  ;;  %3329 = vmatpush.bf16.msrb.mxu0 %v6540_v13  ;;  %v6557_v13 = vld [vmem:[%s6743_s16 + $0x1c] sm:$0xf0] }
 0x1d1   : > { %v2481_v25 = vpop.f32.mrf.mxu3  ;;  %v2227_v44 = vpop.f32.mrf.mxu1  ;;  %v2600_v10 = vunpack.c.h.b16 %v2532_v22 }
 0x1d2   : > { %v2482_v46 = vadd.f32 %v2481_v25, %v2443_v63  ;;  %v2228_v12 = vadd.f32 %v2227_v44, %v2189_v57  ;;  %v2956_v15 = vsel %vm2868_vm6, %v8032_v20, %v8100_v35  ;;  %v2599_v20 = vunpack.c.l.b16 %v2532_v22  ;;  %v6568_v22 = vld [vmem:[%s8903_s1 + $0x580] sm:$0xff] }
 0x1d3   : > { %3710 = vmatpush.bf16.msrb.mxu2 %v6568_v22  ;;  %v6607_v22 = vld [vmem:[%s8903_s1 + $0x678] sm:$0xff] }
 0x1d4   : > { %v8083_v41 = vadd.f32 %v2482_v46, %v2254_v33  ;;  %v2255_v0 = vadd.f32 %v2228_v12, %v7745_v1  ;;  %v8098_v33 = vor.u32 %v2945_v24, %v2942_v49  ;;  %v8102_v1 = vunpack.c.h.b16 %v2531_v54 }
 0x1d5   : > { %v2628_v49 = vsel %vm2303_vm5, %v2623_v28, %v2627_v8  ;;  %v2866_v54 = vpack.c.b16 %v8096_v60, %v8094_v34  ;;  %v8137_v56 = vpack.c.b16 %v2599_v20, %v8094_v34 }
 0x1d6   : > { %v2947_v24 = vsel %vm2868_vm6, %v8030_v47, %v8098_v33  ;;  %v2867_v28 = vpack.c.b16 %v8104_v42, %v8102_v1 }
 0x1d7   : > { %v2958_v17 = vshrl.u32 %v2866_v54, 16  ;;  %4339 = vmatpush.bf16.msra.mxu2 %v6615_v40 }
 0x1d8   : > { %v2445_v63 = vpop.f32.mrf.mxu2  ;;  %v2192_v57 = vpop.f32.mrf.mxu0 }
 0x1d9   : > { %v2483_v25 = vpop.f32.mrf.mxu3  ;;  %v2230_v44 = vpop.f32.mrf.mxu1 }
 0x1da   : > { %v2484_v46 = vadd.f32 %v2483_v25, %v2445_v63  ;;  %v2231_v12 = vadd.f32 %v2230_v44, %v2192_v57  ;;  %v2961_v63 = vshll.u32 %v2866_v54, 16  ;;  %v2970_v25 = vshll.u32 %v2867_v28, 16 }
 0x1db   : > { %2766 = vmatmul.bf16.gmra.mxu0 %v2628_v49  ;;  %v2960_v49 = vrot.slane %v2958_v17, 3 }
 0x1dc   : > { %v8127_v7 = vadd.f32 %v2484_v46, %v2255_v0  ;;  %v2256_v47 = vadd.f32 %v2231_v12, %v7758_v31  ;;  %2804 = vmatmul.bf16.gmra.mxu1 %v2630_v61  ;;  %v2967_v0 = vshrl.u32 %v2867_v28, 16  ;;  %v8140_v31 = vpack.c.b16 %v2600_v10, %v8102_v1  ;;  %v6576_v28 = vld [vmem:[%s8903_s1 + $0x5c0] sm:$0xff] }
 0x1dd   : > { %3106 = vmatmul.bf16.gmra.mxu2 %v2947_v24  ;;  %v2963_v12 = vrot.slane %v2961_v63, 4  ;;  %v2972_v54 = vrot.slane %v2970_v25, 4  ;;  %3748 = vmatpush.bf16.msrb.mxu3 %v6576_v28 }
 0x1de   : > { %3144 = vmatmul.bf16.gmra.mxu3 %v2956_v15  ;;  %v2969_v24 = vrot.slane %v2967_v0, 3 }
 0x1df   : > { %v2964_v20 = vor.u32 %v2963_v12, %v2960_v49 }
 0x1e0   : > { %v2448_v46 = vpop.f32.mrf.mxu2  ;;  %v2194_v27 = vpop.f32.mrf.mxu0  ;;  %v2973_v10 = vor.u32 %v2972_v54, %v2969_v24  ;;  %v6599_v54 = vld [vmem:[%s8903_s1 + $0x638] sm:$0xff] }
 0x1e1   : > { %v2486_v57 = vpop.f32.mrf.mxu3  ;;  %v2232_v4 = vpop.f32.mrf.mxu1  ;;  %4377 = vmatpush.bf16.msra.mxu3 %v6623_v53  ;;  %4084 = vmatpush.bf16.msra.mxu0 %v6599_v54  ;;  %v5968_v53 = vld [vmem:[%s6743_s16 + $0x30] sm:$0xf0] }
 0x1e2   : > { %v2487_v44 = vadd.f32 %v2486_v57, %v2448_v46  ;;  %v2233_v61 = vadd.f32 %v2232_v4, %v2194_v27  ;;  %v6548_v4 = vld [vmem:[%s8903_s1 + $0x540] sm:$0xff]  ;;  %v2631_v27 = vrot.slane %v8137_v56, 3  ;;  %v6606_v54 = vld [vmem:[%s8903_s1 + $0x670] sm:$0xff] }
 0x1e3   : > { %3367 = vmatpush.bf16.msrb.mxu1 %v6548_v4  ;;  %v6556_v4 = vld [vmem:[%s6743_s16 + $0x1c] sm:$0xf] }
 0x1e4   : > { %v8142_v15 = vadd.f32 %v2487_v44, %v2256_v47  ;;  %v2257_v36 = vadd.f32 %v2233_v61, %v7795_v16  ;;  %v2633_v47 = vrot.slane %v8140_v31, 3  ;;  %v2632_v46 = vsel %vm2303_vm5, %v2627_v8, %v2631_v27 }
 0x1e5   : > { %v2965_v44 = vsel %vm2868_vm6, %v8098_v33, %v2964_v20  ;;  %v2974_v31 = vsel %vm2868_vm6, %v8100_v35, %v2973_v10 }
 0x1e6   : > { %v2634_v56 = vsel %vm2303_vm5, %v2629_v32, %v2633_v47  ;;  %vm5073_vm5 = vsmask.f32 4368 }
 0x1e7   : > { %4122 = vmatpush.bf16.msra.mxu1 %v6607_v22  ;;  %vm5074_vm6 = vmor %vm5072_vm4, %vm5073_vm5 }
 0x1e8   : > { %v2450_v17 = vpop.f32.mrf.mxu2  ;;  %v2197_v0 = vpop.f32.mrf.mxu0 }
 0x1e9   : > { %v2488_v16 = vpop.f32.mrf.mxu3  ;;  %v2235_v25 = vpop.f32.mrf.mxu1 }
 0x1ea   : > { %v2489_v63 = vadd.f32 %v2488_v16, %v2450_v17  ;;  %v2236_v57 = vadd.f32 %v2235_v25, %v2197_v0  ;;  %v5960_v17 = vld [vmem:[%s6743_s16 + $0x20] sm:$0xf0] }
 0x1eb   : > { %2771 = vmatmul.bf16.gmra.mxu0 %v2632_v46  ;;  %v5963_v40 = vor.u32 %v6556_v4, %v5960_v17  ;;  %4123 = vmatpush.bf16.msra.mxu1 %v6606_v54 }
 0x1ec   : > { %v8169_v49 = vadd.f32 %v2489_v63, %v2257_v36  ;;  %v2258_v61 = vadd.f32 %v2236_v57, %v7814_v14  ;;  %2809 = vmatmul.bf16.gmra.mxu1 %v2634_v56  ;;  %v5958_v36 = vld [vmem:[%s6743_s16 + $0x18] sm:$0xf] }
 0x1ed   : > { %3111 = vmatmul.bf16.gmra.mxu2 %v2965_v44  ;;  %v5959_v56 = vor.u32 %v6557_v13, %v5958_v36  ;;  %v5966_v44 = vld [vmem:[%s6743_s16 + $0x28] sm:$0xf] }
 0x1ee   : > { %3149 = vmatmul.bf16.gmra.mxu3 %v2974_v31  ;;  %v6559_v31 = vld [vmem:[%s6743_s16 + $0x2c] sm:$0xf0] }
 0x1ef   : > { %v3502_v36 = vshrl.u32 %v5959_v56, 16 }
 0x1f0   : > { %v2453_v8 = vpop.f32.mrf.mxu2  ;;  %v2199_v33 = vpop.f32.mrf.mxu0 }
 0x1f1   : > { %v2491_v14 = vpop.f32.mrf.mxu3  ;;  %v2237_v35 = vpop.f32.mrf.mxu1 }
 0x1f2   : > { %v2492_v32 = vadd.f32 %v2491_v14, %v2453_v8  ;;  %v2238_v12 = vadd.f32 %v2237_v35, %v2199_v33  ;;  %v6614_v8 = vld [vmem:[%s8903_s1 + $0x6b0] sm:$0xff]  ;;  %v8204_v33 = vor.u32 %v6559_v31, %v5966_v44  ;;  %v3504_v35 = vshll.u32 %v5959_v56, 16 }
 0x1f3   : > { %v6622_v14 = vld [vmem:[%s8903_s1 + $0x6f0] sm:$0xff]  ;;  %4340 = vmatpush.bf16.msra.mxu2 %v6614_v8 }
 0x1f4   : > { %v8178_v24 = vadd.f32 %v2492_v32, %v2258_v61  ;;  %v2259_v28 = vadd.f32 %v2238_v12, %v7849_v9  ;;  %v6558_v61 = vld [vmem:[%s6743_s16 + $0x2c] sm:$0xf]  ;;  %v6598_v12 = vld [vmem:[%s8903_s1 + $0x630] sm:$0xff]  ;;  %4378 = vmatpush.bf16.msra.mxu3 %v6622_v14  ;;  %v3506_v13 = vrot.slane %v3504_v35, 1  ;;  %v3509_v4 = vshll.u32 %v8204_v33, 16 }
 0x1f5   : > { %v8212_v22 = vor.u32 %v6558_v61, %v5968_v53  ;;  %4085 = vmatpush.bf16.msra.mxu0 %v6598_v12  ;;  %v3202_v14 = vpack.c.b16 %v2581_v5, %v2579_v45  ;;  %v6605_v35 = vld [vmem:[%s8903_s1 + $0x668] sm:$0xff]  ;;  %v5974_v5 = vld [vmem:[%s6743_s16 + $0x38] sm:$0xf] }
 0x1f6   : > { %v3507_v44 = vor.u32 %v3506_v13, %v3502_v36  ;;  %v3511_v31 = vrot.slane %v3509_v4, 1  ;;  %4124 = vmatpush.bf16.msra.mxu1 %v6605_v35 }
 0x1f8   : > { %v2455_v16 = vpop.f32.mrf.mxu2  ;;  %v2202_v25 = vpop.f32.mrf.mxu0  ;;  %v3512_v45 = vsel %vm295_vm0, %v3507_v44, %v3511_v31  ;;  %v6612_v44 = vld [vmem:[%s8903_s1 + $0x6a0] sm:$0xff] }
 0x1f9   : > { %v2493_v63 = vpop.f32.mrf.mxu3  ;;  %v2240_v46 = vpop.f32.mrf.mxu1 }
 0x1fa   : > { %v2494_v0 = vadd.f32 %v2493_v63, %v2455_v16  ;;  %v2241_v57 = vadd.f32 %v2240_v46, %v2202_v25  ;;  %v3514_v16 = vshrl.u32 %v5963_v40, 16  ;;  %v6613_v46 = vld [vmem:[%s8903_s1 + $0x6a8] sm:$0xff] }
 0x1fb   : > { %2776 = vmatmul.bf16.gmra.mxu0 %v2631_v27  ;;  %4341 = vmatpush.bf16.msra.mxu2 %v6613_v46 }
 0x1fc   : > { %v8194_v9 = vadd.f32 %v2494_v0, %v2259_v28  ;;  %v2260_v32 = vadd.f32 %v2241_v57, %v7884_v62  ;;  %2814 = vmatmul.bf16.gmra.mxu1 %v2633_v47  ;;  %v3516_v28 = vshll.u32 %v5963_v40, 16  ;;  %v3521_v0 = vshll.u32 %v8212_v22, 16  ;;  %v6621_v57 = vld [vmem:[%s8903_s1 + $0x6e8] sm:$0xff] }
 0x1fd   : > { %3116 = vmatmul.bf16.gmra.mxu2 %v2964_v20  ;;  %4379 = vmatpush.bf16.msra.mxu3 %v6621_v57 }
 0x1fe   : > { %3154 = vmatmul.bf16.gmra.mxu3 %v2973_v10  ;;  %v3518_v63 = vrot.slane %v3516_v28, 1  ;;  %v3523_v40 = vrot.slane %v3521_v0, 1 }
 0x1ff   : > { %4342 = vmatpush.bf16.msra.mxu2 %v6612_v44 }
 0x200   : > { %v2458_v62 = vpop.f32.mrf.mxu2  ;;  %v2204_v20 = vpop.f32.mrf.mxu0  ;;  %v3519_v61 = vor.u32 %v3518_v63, %v3514_v16  ;;  %v3525_v63 = vshrl.u32 %v8204_v33, 16  ;;  %v6596_v33 = vld [vmem:[%s8903_s1 + $0x620] sm:$0xff] }
 0x201   : > { %v2496_v27 = vpop.f32.mrf.mxu3  ;;  %v2242_v10 = vpop.f32.mrf.mxu1 }
 0x202   : > { %v2497_v47 = vadd.f32 %v2496_v27, %v2458_v62  ;;  %v2243_v17 = vadd.f32 %v2242_v10, %v2204_v20  ;;  %v3524_v18 = vsel %vm295_vm0, %v3519_v61, %v3523_v40  ;;  %v5976_v27 = vld [vmem:[%s6743_s16 + $0x40] sm:$0xf0] }
 0x203   : > { %v6620_v61 = vld [vmem:[%s8903_s1 + $0x6e0] sm:$0xff]  ;;  %4343 = vmatpush.bf16.msra.mxu2 %v6611_v43 }
 0x204   : > { %v8216_v25 = vadd.f32 %v2497_v47, %v2260_v32  ;;  %v2261_v56 = vadd.f32 %v2243_v17, %v7933_v2  ;;  %v3203_v2 = vpack.c.b16 %v2582_v59, %v2580_v48  ;;  %v6597_v32 = vld [vmem:[%s8903_s1 + $0x628] sm:$0xff]  ;;  %v6561_v48 = vld [vmem:[%s6743_s16 + $0x3c] sm:$0xf0]  ;;  %v6560_v59 = vld [vmem:[%s6743_s16 + $0x3c] sm:$0xf]  ;;  %4380 = vmatpush.bf16.msra.mxu3 %v6620_v61 }
 0x205   : > { %4086 = vmatpush.bf16.msra.mxu0 %v6597_v32  ;;  %v8248_v20 = vor.u32 %v6561_v48, %v5974_v5  ;;  %v8250_v10 = vor.u32 %v6560_v59, %v5976_v27  ;;  %v5982_v5 = vld [vmem:[%s6743_s16 + $0x48] sm:$0xf]  ;;  %v6563_v59 = vld [vmem:[%s6743_s16 + $0x4c] sm:$0xf0]  ;;  %v6562_v27 = vld [vmem:[%s6743_s16 + $0x4c] sm:$0xf] }
 0x206   : > { %v8294_v3 = vor.u32 %v6563_v59, %v5982_v5 }
 0x207   : > { %v3529_v46 = vshll.u32 %v8248_v20, 16  ;;  %v3537_v57 = vshll.u32 %v8250_v10, 16 }
 0x208   : > { %v2460_v53 = vpop.f32.mrf.mxu2  ;;  %v2207_v54 = vpop.f32.mrf.mxu0 }
 0x209   : > { %v2498_v8 = vpop.f32.mrf.mxu3  ;;  %v2245_v28 = vpop.f32.mrf.mxu1  ;;  %v3539_v32 = vrot.slane %v3537_v57, 1  ;;  %4087 = vmatpush.bf16.msra.mxu0 %v6596_v33  ;;  %v6603_v57 = vld [vmem:[%s8903_s1 + $0x658] sm:$0xff] }
 0x20a   : > { %v2499_v12 = vadd.f32 %v2498_v8, %v2460_v53  ;;  %v2246_v62 = vadd.f32 %v2245_v28, %v2207_v54  ;;  %v3527_v8 = vor.u32 %v3525_v63, %v3511_v31  ;;  %v3205_v31 = vpack.c.b16 %v2586_v37, %v2584_v55  ;;  %v6619_v55 = vld [vmem:[%s8903_s1 + $0x6d8] sm:$0xff] }
 0x20b   : > { %3330 = vmatmul.bf16.vlgmr.msrb.gmra.mxu0 %v3202_v14  ;;  %v3531_v14 = vrot.slane %v3529_v46, 1  ;;  %4381 = vmatpush.bf16.msra.mxu3 %v6619_v55  ;;  %v3549_v63 = vshrl.u32 %v8250_v10, 16 }
 0x20c   : > { %v8242_v6 = vadd.f32 %v2499_v12, %v2261_v56  ;;  %v2262_v47 = vadd.f32 %v2246_v62, %v7943_v50  ;;  %3368 = vmatmul.bf16.vlgmr.msrb.gmra.mxu1 %v3203_v2  ;;  %v3533_v50 = vshrl.u32 %v8212_v22, 16  ;;  %v6604_v22 = vld [vmem:[%s8903_s1 + $0x660] sm:$0xff]  ;;  %v3204_v12 = vpack.c.b16 %v2585_v26, %v2583_v39 }
 0x20d   : > { %3711 = vmatmul.bf16.vlgmr.msrb.gmra.mxu2 %v3512_v45  ;;  %4125 = vmatpush.bf16.msra.mxu1 %v6604_v22  ;;  %v3532_v45 = vsel %vm295_vm0, %v3527_v8, %v3531_v14  ;;  %v3551_v44 = vor.u32 %v3549_v63, %v3539_v32  ;;  %v3206_v22 = vpack.c.b16 %v2589_v58, %v2587_v21  ;;  %v8919_v8 = vunpack.c.h.b16 %v7941_v23  ;;  %v6610_v21 = vld [vmem:[%s8903_s1 + $0x690] sm:$0xff] }
 0x20e   : > { %3749 = vmatmul.bf16.vlgmr.msrb.gmra.mxu3 %v3524_v18  ;;  %v3535_v2 = vor.u32 %v3533_v50, %v3523_v40  ;;  %v6595_v50 = vld [vmem:[%s8903_s1 + $0x618] sm:$0xff]  ;;  %v6594_v23 = vld [vmem:[%s8903_s1 + $0x610] sm:$0xff]  ;;  %4344 = vmatpush.bf16.msra.mxu2 %v6610_v21 }
 0x20f   : > { %4088 = vmatpush.bf16.msra.mxu0 %v6595_v50  ;;  %v6602_v58 = vld [vmem:[%s8903_s1 + $0x650] sm:$0xff]  ;;  %4382 = vmatpush.bf16.msra.mxu3 %v6618_v11  ;;  %v8921_v50 = vunpack.c.l.b16 %v8013_v51 }
 0x210   : > { %v2463_v36 = vpop.f32.mrf.mxu2  ;;  %v2209_v17 = vpop.f32.mrf.mxu0  ;;  %v3540_v18 = vsel %vm295_vm0, %v3535_v2, %v3539_v32  ;;  %v3207_v2 = vpack.c.b16 %v8919_v8, %v2588_v29 }
 0x211   : > { %v2501_v13 = vpop.f32.mrf.mxu3  ;;  %v2247_v16 = vpop.f32.mrf.mxu1  ;;  %4126 = vmatpush.bf16.msra.mxu1 %v6603_v57 }
 0x212   : > { %v2502_v4 = vadd.f32 %v2501_v13, %v2463_v36  ;;  %v2248_v0 = vadd.f32 %v2247_v16, %v2209_v17  ;;  %v3541_v17 = vshrl.u32 %v8248_v20, 16  ;;  %v3545_v16 = vshll.u32 %v8294_v3, 16 }
 0x213   : > { %4089 = vmatpush.bf16.msra.mxu0 %v6594_v23 }
 0x214   : > { %v8256_v56 = vadd.f32 %v2502_v4, %v2262_v47  ;;  %v2263_v53 = vadd.f32 %v2248_v0, %v7999_v19  ;;  %v5984_v47 = vld [vmem:[%s6743_s16 + $0x50] sm:$0xf0]  ;;  %v3543_v20 = vor.u32 %v3541_v17, %v3531_v14  ;;  %v3547_v10 = vrot.slane %v3545_v16, 1 }
 0x215   : > { %v8296_v26 = vor.u32 %v6562_v27, %v5984_v47  ;;  %4127 = vmatpush.bf16.msra.mxu1 %v6602_v58  ;;  %v3557_v47 = vshrl.u32 %v8294_v3, 16 }
 0x216   : > { %v3548_v14 = vsel %vm295_vm0, %v3543_v20, %v3547_v10  ;;  %v8922_v20 = vunpack.c.h.b16 %v7946_v30 }
 0x217   : > { %v3553_v0 = vshll.u32 %v8296_v26, 16  ;;  %v3565_v55 = vshrl.u32 %v8296_v26, 16  ;;  %v3559_v3 = vor.u32 %v3557_v47, %v3547_v10  ;;  %v8923_v10 = vunpack.c.h.b16 %v8013_v51  ;;  %v6601_v51 = vld [vmem:[%s8903_s1 + $0x648] sm:$0xff]  ;;  %v6616_v47 = vld [vmem:[%s8903_s1 + $0x6c0] sm:$0xff] }
 0x218   : > { %v2465_v19 = vpop.f32.mrf.mxu2  ;;  %v2212_v40 = vpop.f32.mrf.mxu0 }
 0x219   : > { %v2503_v35 = vpop.f32.mrf.mxu3  ;;  %v2250_v28 = vpop.f32.mrf.mxu1  ;;  %v3555_v61 = vrot.slane %v3553_v0, 1  ;;  %v8920_v0 = vunpack.c.l.b16 %v7946_v30  ;;  %v6593_v30 = vld [vmem:[%s8903_s1 + $0x608] sm:$0xff]  ;;  %4128 = vmatpush.bf16.msra.mxu1 %v6601_v51 }
 0x21a   : > { %v2504_v54 = vadd.f32 %v2503_v35, %v2465_v19  ;;  %v2251_v62 = vadd.f32 %v2250_v28, %v2212_v40  ;;  %v6564_v40 = vld [vmem:[%s6743_s16 + $0x5c] sm:$0xf]  ;;  %v5992_v28 = vld [vmem:[%s6743_s16 + $0x60] sm:$0xf0]  ;;  %4090 = vmatpush.bf16.msra.mxu0 %v6593_v30 }
 0x21b   : > { %3335 = vmatmul.bf16.gmra.mxu0 %v3204_v12  ;;  %v3556_v32 = vsel %vm295_vm0, %v3551_v44, %v3555_v61  ;;  %v3567_v16 = vor.u32 %v3565_v55, %v3555_v61  ;;  %v3208_v57 = vpack.c.b16 %v8921_v50, %v8920_v0  ;;  %v3209_v44 = vpack.c.b16 %v8923_v10, %v8922_v20 }
 0x21c   : > { %v8282_v48 = vadd.f32 %v2504_v54, %v2263_v53  ;;  %v2264_v39 = vadd.f32 %v2251_v62, %v8018_v38  ;;  %3373 = vmatmul.bf16.gmra.mxu1 %v3205_v31  ;;  %v5990_v31 = vld [vmem:[%s6743_s16 + $0x58] sm:$0xf]  ;;  %v6565_v54 = vld [vmem:[%s6743_s16 + $0x5c] sm:$0xf0] }
 0x21d   : > { %3716 = vmatmul.bf16.gmra.mxu2 %v3532_v45  ;;  %v8337_v62 = vor.u32 %v6565_v54, %v5990_v31  ;;  %v8339_v45 = vor.u32 %v6564_v40, %v5992_v28 }
 0x21e   : > { %3754 = vmatmul.bf16.gmra.mxu3 %v3540_v18 }
 0x21f   : > { %v3561_v43 = vshll.u32 %v8337_v62, 16  ;;  %v3573_v58 = vshrl.u32 %v8337_v62, 16  ;;  %v6592_v62 = vld [vmem:[%s8903_s1 + $0x600] sm:$0xff] }
 0x220   : > { %v2468_v37 = vpop.f32.mrf.mxu2  ;;  %v2214_v13 = vpop.f32.mrf.mxu0  ;;  %4091 = vmatpush.bf16.msra.mxu0 %v6592_v62  ;;  %v6584_v62 = vld [vmem:[%s6743_s16 + $0x34] sm:$0xf] }
 0x221   : > { %v2506_v38 = vpop.f32.mrf.mxu3  ;;  %v2252_v4 = vpop.f32.mrf.mxu1  ;;  %v6609_v13 = vld [vmem:[%s8903_s1 + $0x688] sm:$0xff]  ;;  %v3563_v17 = vrot.slane %v3561_v43, 1 }
 0x222   : > { %v2507_v36 = vadd.f32 %v2506_v38, %v2468_v37  ;;  %v3569_v37 = vshll.u32 %v8339_v45, 16  ;;  %v6617_v4 = vld [vmem:[%s8903_s1 + $0x6c8] sm:$0xff]  ;;  %4345 = vmatpush.bf16.msra.mxu2 %v6609_v13 }
 0x223   : > { %4383 = vmatpush.bf16.msra.mxu3 %v6617_v4  ;;  %v3564_v8 = vsel %vm295_vm0, %v3559_v3, %v3563_v17  ;;  %v3575_v43 = vor.u32 %v3573_v58, %v3563_v17 }
 0x224   : > { %v8302_v46 = vadd.f32 %v2507_v36, %v2264_v39  ;;  %v3571_v26 = vrot.slane %v3569_v37, 1 }
 0x227   : > { %4384 = vmatpush.bf16.msra.mxu3 %v6616_v47 }
 0x228   : > { %v2470_v53 = vpop.f32.mrf.mxu2  ;;  %v2752_v19 = vpop.f32.mrf.mxu0 }
 0x229   : > { %v2508_v33 = vpop.f32.mrf.mxu3  ;;  %v2790_v35 = vpop.f32.mrf.mxu1 }
 0x22a   : > { %v2791_v12 = vadd.f32 %v2790_v35, %v2752_v19  ;;  %v5998_v19 = vld [vmem:[%s6743_s16 + $0x68] sm:$0xf]  ;;  %v6567_v35 = vld [vmem:[%s6743_s16 + $0x6c] sm:$0x10] }
 0x22b   : > { %3340 = vmatmul.bf16.gmra.mxu0 %v3206_v22  ;;  %v8377_v54 = vor.u32 %v6567_v35, %v5998_v19  ;;  %v6631_v19 = vld [vmem:[%s8903_s1 + $0x738] sm:$0xff] }
 0x22c   : > { %v2819_v29 = vadd.f32 %v2791_v12, %v8083_v41  ;;  %3378 = vmatmul.bf16.gmra.mxu1 %v3207_v2  ;;  %v3572_v2 = vsel %vm295_vm0, %v3567_v16, %v3571_v26  ;;  %v6566_v12 = vld [vmem:[%s6743_s16 + $0x6c] sm:$0xf]  ;;  %v8925_v16 = vunpack.c.h.b16 %v8016_v52  ;;  %v6639_v35 = vld [vmem:[%s8903_s1 + $0x778] sm:$0xff]  ;;  %4638 = vmatpush.bf16.msrb.mxu0 %v6631_v19 }
 0x22d   : > { %3721 = vmatmul.bf16.gmra.mxu2 %v3548_v14  ;;  %v3589_v51 = vshrl.u32 %v8377_v54, 16 }
 0x22e   : > { %3759 = vmatmul.bf16.gmra.mxu3 %v3556_v32  ;;  %v6000_v32 = vld [vmem:[%s6743_s16 + $0x70] sm:$0x10] }
 0x22f   : > { %v8379_v40 = vor.u32 %v6566_v12, %v6000_v32 }
 0x230   : > { %v3092_v41 = vpop.f32.mrf.mxu2  ;;  %v2754_v59 = vpop.f32.mrf.mxu0 }
 0x231   : > { %v3130_v18 = vpop.f32.mrf.mxu3  ;;  %v2792_v27 = vpop.f32.mrf.mxu1 }
 0x232   : > { %v3131_v5 = vadd.f32 %v3130_v18, %v3092_v41  ;;  %v2793_v39 = vadd.f32 %v2792_v27, %v2754_v59  ;;  %v3581_v18 = vshrl.u32 %v8339_v45, 16  ;;  %v6608_v27 = vld [vmem:[%s8903_s1 + $0x680] sm:$0xff] }
 0x233   : > { %v6600_v45 = vld [vmem:[%s8903_s1 + $0x640] sm:$0xff]  ;;  %4346 = vmatpush.bf16.msra.mxu2 %v6608_v27  ;;  %v6585_v27 = vld [vmem:[%s6743_s16 + $0x34] sm:$0xf0] }
 0x234   : > { %v8345_v38 = vadd.f32 %v3131_v5, %v2819_v29  ;;  %v2820_v36 = vadd.f32 %v2793_v39, %v8127_v7  ;;  %v3585_v5 = vshll.u32 %v8379_v40, 16  ;;  %v3583_v37 = vor.u32 %v3581_v18, %v3571_v26  ;;  %4129 = vmatpush.bf16.msra.mxu1 %v6600_v45  ;;  %v6072_v45 = vld [vmem:[%s6743_s16 + $0x38] sm:$0xf0] }
 0x238   : > { %v3094_v63 = vpop.f32.mrf.mxu2  ;;  %v2757_v33 = vpop.f32.mrf.mxu0  ;;  %4676 = vmatpush.bf16.msrb.mxu1 %v6639_v35 }
 0x239   : > { %v3132_v7 = vpop.f32.mrf.mxu3  ;;  %v2795_v61 = vpop.f32.mrf.mxu1 }
 0x23a   : > { %v3133_v53 = vadd.f32 %v3132_v7, %v3094_v63  ;;  %v2796_v22 = vadd.f32 %v2795_v61, %v2757_v33  ;;  %v3211_v63 = vpack.c.b16 %v8102_v1, %v8925_v16  ;;  %v6638_v16 = vld [vmem:[%s8903_s1 + $0x770] sm:$0xff] }
 0x23b   : > { %3345 = vmatmul.bf16.gmra.mxu0 %v3208_v57 }
 0x23c   : > { %v8367_v14 = vadd.f32 %v3133_v53, %v2820_v36  ;;  %v2821_v31 = vadd.f32 %v2796_v22, %v8142_v15  ;;  %3383 = vmatmul.bf16.gmra.mxu1 %v3209_v44  ;;  %v3577_v15 = vshll.u32 %v8377_v54, 16  ;;  %v3587_v36 = vrot.slane %v3585_v5, 1  ;;  %v3791_v22 = vld [vmem:[%s6743_s16 + $0x28] sm:$0xff]  ;;  %v6070_v5 = vld [vmem:[%s6743_s16 + $0x30] sm:$0xf] }
 0x23d   : > { %3726 = vmatmul.bf16.gmra.mxu2 %v3564_v8  ;;  %v8428_v30 = vunpack.c.l.b16 %v3791_v22  ;;  %v3213_v54 = vpack.c.b16 %v8104_v42, %v8104_v42  ;;  %v6646_v42 = vld [vmem:[%s8903_s1 + $0x7b0] sm:$0xff]  ;;  %4677 = vmatpush.bf16.msrb.mxu1 %v6638_v16 }
 0x23e   : > { %3764 = vmatmul.bf16.gmra.mxu3 %v3572_v2  ;;  %v3579_v55 = vrot.slane %v3577_v15, 1  ;;  %v3588_v26 = vsel %vm295_vm0, %v3583_v37, %v3587_v36  ;;  %v6654_v37 = vld [vmem:[%s8903_s1 + $0x7f0] sm:$0xff] }
 0x240   : > { %v3097_v28 = vpop.f32.mrf.mxu2  ;;  %v2759_v29 = vpop.f32.mrf.mxu0  ;;  %v3580_v17 = vsel %vm295_vm0, %v3575_v43, %v3579_v55  ;;  %v3591_v15 = vor.u32 %v3589_v51, %v3579_v55 }
 0x241   : > { %v3135_v21 = vpop.f32.mrf.mxu3  ;;  %v2797_v23 = vpop.f32.mrf.mxu1 }
 0x242   : > { %v3136_v11 = vadd.f32 %v3135_v21, %v3097_v28  ;;  %v2798_v41 = vadd.f32 %v2797_v23, %v2759_v29  ;;  %v8432_v21 = vunpack.c.h.b16 %v3791_v22  ;;  %v6645_v22 = vld [vmem:[%s8903_s1 + $0x7a8] sm:$0xff] }
 0x244   : > { %v8385_v59 = vadd.f32 %v3136_v11, %v2821_v31  ;;  %v2822_v39 = vadd.f32 %v2798_v41, %v8169_v49  ;;  %v8924_v49 = vunpack.c.l.b16 %v8016_v52  ;;  %v6647_v52 = vld [vmem:[%s8903_s1 + $0x7b8] sm:$0xff]  ;;  %v3592_v31 = vshrl.u32 %v8379_v40, 16 }
 0x245   : > { %4893 = vmatpush.bf16.msrb.mxu2 %v6647_v52 }
 0x246   : > { %v3210_v3 = vpack.c.b16 %v8094_v34, %v8924_v49  ;;  %v6655_v34 = vld [vmem:[%s8903_s1 + $0x7f8] sm:$0xff]  ;;  %v3594_v18 = vor.u32 %v3592_v31, %v3587_v36  ;;  %v8454_v36 = vor.u32 %v6585_v27, %v6070_v5  ;;  %v6078_v5 = vld [vmem:[%s6743_s16 + $0x40] sm:$0xf] }
 0x247   : > { %4931 = vmatpush.bf16.msrb.mxu3 %v6655_v34 }
 0x248   : > { %v3099_v13 = vpop.f32.mrf.mxu2  ;;  %v2762_v0 = vpop.f32.mrf.mxu0  ;;  %v3906_v16 = vshrl.u32 %v8454_v36, 16 }
 0x249   : > { %v3137_v4 = vpop.f32.mrf.mxu3  ;;  %v2800_v50 = vpop.f32.mrf.mxu1  ;;  %4894 = vmatpush.bf16.msrb.mxu2 %v6646_v42 }
 0x24a   : > { %v3138_v7 = vadd.f32 %v3137_v4, %v3099_v13  ;;  %v2801_v57 = vadd.f32 %v2800_v50, %v2762_v0  ;;  %v8456_v4 = vor.u32 %v6584_v62, %v6072_v45  ;;  %v6587_v62 = vld [vmem:[%s6743_s16 + $0x44] sm:$0xf0]  ;;  %v6586_v45 = vld [vmem:[%s6743_s16 + $0x44] sm:$0xf] }
 0x24b   : > { %3350 = vmatmul.bf16.gmra.mxu0 %v3210_v3  ;;  %v6630_v3 = vld [vmem:[%s8903_s1 + $0x730] sm:$0xff]  ;;  %4932 = vmatpush.bf16.msrb.mxu3 %v6654_v37 }
 0x24c   : > { %v8408_v20 = vadd.f32 %v3138_v7, %v2822_v39  ;;  %v2823_v10 = vadd.f32 %v2801_v57, %v8178_v24  ;;  %3388 = vmatmul.bf16.gmra.mxu1 %v3211_v63  ;;  %v3790_v24 = vld [vmem:[%s6743_s16 + $0x20] sm:$0xff]  ;;  %4639 = vmatpush.bf16.msrb.mxu0 %v6630_v3 }
 0x24d   : > { %3731 = vmatmul.bf16.gmra.mxu2 %v3580_v17  ;;  %v3846_v32 = vunpack.c.l.b16 %v3790_v24  ;;  %v3847_v28 = vunpack.c.h.b16 %v3790_v24  ;;  %v3890_v17 = vshll.u32 %v8454_v36, 16 }
 0x24e   : > { %3769 = vmatmul.bf16.gmra.mxu3 %v3588_v26  ;;  %4895 = vmatpush.bf16.msrb.mxu2 %v6645_v22 }
 0x24f   : > { %v3870_v23 = vpack.c.b16 %v8428_v30, %v3846_v32  ;;  %v3871_v47 = vpack.c.b16 %v8432_v21, %v3847_v28  ;;  %v4210_v28 = vrot.slane %v8454_v36, 1 }
 0x250   : > { %v3102_v1 = vpop.f32.mrf.mxu2  ;;  %v2764_v33 = vpop.f32.mrf.mxu0 }
 0x251   : > { %v3140_v44 = vpop.f32.mrf.mxu3  ;;  %v2802_v61 = vpop.f32.mrf.mxu1  ;;  %v3885_v13 = vshll.u32 %v3870_v23, 16  ;;  %v3897_v49 = vshll.u32 %v3871_v47, 16  ;;  %v3883_v50 = vshrl.u32 %v3870_v23, 16  ;;  %v3895_v34 = vshrl.u32 %v3871_v47, 16  ;;  %v6637_v23 = vld [vmem:[%s8903_s1 + $0x768] sm:$0xff] }
 0x252   : > { %v3141_v53 = vadd.f32 %v3140_v44, %v3102_v1  ;;  %v2803_v8 = vadd.f32 %v2802_v61, %v2764_v33  ;;  %v3902_v44 = vshll.u32 %v8456_v4, 16  ;;  %4678 = vmatpush.bf16.msrb.mxu1 %v6637_v23  ;;  %v6086_v23 = vld [vmem:[%s6743_s16 + $0x50] sm:$0xf] }
 0x253   : > { %v3887_v57 = vrot.slane %v3885_v13, 1  ;;  %v3899_v1 = vrot.slane %v3897_v49, 1 }
 0x254   : > { %v8419_v2 = vadd.f32 %v3141_v53, %v2823_v10  ;;  %v2824_v12 = vadd.f32 %v2803_v8, %v8194_v9  ;;  %v3212_v9 = vpack.c.b16 %v8096_v60, %v8096_v60  ;;  %v4171_v60 = vld [vmem:[%s6743_s16 + $0x20] sm:$0xee]  ;;  %v6653_v8 = vld [vmem:[%s8903_s1 + $0x7e8] sm:$0xff]  ;;  %v3904_v51 = vrot.slane %v3902_v44, 1 }
 0x255   : > { %v4205_v63 = vunpack.c.l.b16 %v4171_v60  ;;  %v3888_v35 = vor.u32 %v3887_v57, %v3883_v50  ;;  %v3900_v32 = vor.u32 %v3899_v1, %v3895_v34  ;;  %4933 = vmatpush.bf16.msrb.mxu3 %v6653_v8  ;;  %v3914_v50 = vshrl.u32 %v8456_v4, 16  ;;  %v6628_v1 = vld [vmem:[%s8903_s1 + $0x720] sm:$0xff] }
 0x257   : > { %v8467_v33 = vpack.c.b16 %v8428_v30, %v4205_v63 }
 0x258   : > { %v3104_v11 = vpop.f32.mrf.mxu2  ;;  %v2767_v58 = vpop.f32.mrf.mxu0 }
 0x259   : > { %v3142_v29 = vpop.f32.mrf.mxu3  ;;  %v2805_v41 = vpop.f32.mrf.mxu1  ;;  %v4209_v31 = vrot.slane %v8467_v33, 1 }
 0x25a   : > { %v3143_v40 = vadd.f32 %v3142_v29, %v3104_v11  ;;  %v2806_v39 = vadd.f32 %v2805_v41, %v2767_v58 }
 0x25b   : > { %3355 = vmatmul.bf16.gmra.mxu0 %v3212_v9  ;;  %v4211_v47 = vsel %vm798_vm1, %v4209_v31, %v4210_v28 }
 0x25c   : > { %v8444_v43 = vadd.f32 %v3143_v40, %v2824_v12  ;;  %v2825_v55 = vadd.f32 %v2806_v39, %v8216_v25  ;;  %3393 = vmatmul.bf16.gmra.mxu1 %v3213_v54  ;;  %v4206_v25 = vunpack.c.h.b16 %v4171_v60  ;;  %v3892_v12 = vrot.slane %v3890_v17, 1  ;;  %v6629_v54 = vld [vmem:[%s8903_s1 + $0x728] sm:$0xff] }
 0x25d   : > { %3736 = vmatmul.bf16.gmra.mxu2 %v3591_v15  ;;  %v6080_v60 = vld [vmem:[%s6743_s16 + $0x48] sm:$0xf0]  ;;  %4640 = vmatpush.bf16.msrb.mxu0 %v6629_v54 }
 0x25e   : > { %3774 = vmatmul.bf16.gmra.mxu3 %v3594_v18  ;;  %v8470_v61 = vpack.c.b16 %v8432_v21, %v4206_v25  ;;  %v3893_v15 = vsel %vm295_vm0, %v3888_v35, %v3892_v12  ;;  %v3905_v18 = vsel %vm295_vm0, %v3900_v32, %v3904_v51  ;;  %v8512_v13 = vor.u32 %v6586_v45, %v6080_v60 }
 0x25f   : > { %v3908_v22 = vor.u32 %v3906_v16, %v3892_v12 }
 0x260   : > { %v3107_v7 = vpop.f32.mrf.mxu2  ;;  %v2769_v10 = vpop.f32.mrf.mxu0  ;;  %v4212_v11 = vrot.slane %v8470_v61, 1  ;;  %v4217_v32 = vrot.slane %v8512_v13, 1 }
 0x261   : > { %v3145_v0 = vpop.f32.mrf.mxu3  ;;  %v2807_v52 = vpop.f32.mrf.mxu1  ;;  %4641 = vmatpush.bf16.msrb.mxu0 %v6628_v1 }
 0x262   : > { %v3146_v26 = vadd.f32 %v3145_v0, %v3107_v7  ;;  %v2808_v53 = vadd.f32 %v2807_v52, %v2769_v10  ;;  %v6644_v10 = vld [vmem:[%s8903_s1 + $0x7a0] sm:$0xff] }
 0x263   : > { %v6652_v52 = vld [vmem:[%s8903_s1 + $0x7e0] sm:$0xff]  ;;  %4896 = vmatpush.bf16.msrb.mxu2 %v6644_v10  ;;  %v6627_v10 = vld [vmem:[%s8903_s1 + $0x718] sm:$0xff] }
 0x264   : > { %v8472_v24 = vadd.f32 %v3146_v26, %v2825_v55  ;;  %v2826_v19 = vadd.f32 %v2808_v53, %v8242_v6  ;;  %v4213_v6 = vrot.slane %v8456_v4, 1  ;;  %v8510_v55 = vor.u32 %v6587_v62, %v6078_v5  ;;  %v6636_v53 = vld [vmem:[%s8903_s1 + $0x760] sm:$0xff]  ;;  %4934 = vmatpush.bf16.msrb.mxu3 %v6652_v52  ;;  %v6088_v5 = vld [vmem:[%s6743_s16 + $0x58] sm:$0xf0] }
 0x265   : > { %4679 = vmatpush.bf16.msrb.mxu1 %v6636_v53  ;;  %v6635_v52 = vld [vmem:[%s8903_s1 + $0x758] sm:$0xff]  ;;  %4642 = vmatpush.bf16.msrb.mxu0 %v6627_v10 }
 0x266   : > { %v4214_v39 = vsel %vm798_vm1, %v4212_v11, %v4213_v6  ;;  %v3910_v0 = vshll.u32 %v8510_v55, 16  ;;  %v4215_v35 = vrot.slane %v8510_v55, 1  ;;  %v3922_v60 = vshrl.u32 %v8510_v55, 16 }
 0x268   : > { %v3109_v29 = vpop.f32.mrf.mxu2  ;;  %v2772_v58 = vpop.f32.mrf.mxu0  ;;  %v3912_v8 = vrot.slane %v3910_v0, 1 }
 0x269   : > { %v3147_v9 = vpop.f32.mrf.mxu3  ;;  %v2810_v41 = vpop.f32.mrf.mxu1  ;;  %4680 = vmatpush.bf16.msrb.mxu1 %v6635_v52 }
 0x26a   : > { %v3148_v40 = vadd.f32 %v3147_v9, %v3109_v29  ;;  %v2811_v27 = vadd.f32 %v2810_v41, %v2772_v58  ;;  %v4216_v58 = vsel %vm798_vm1, %v4210_v28, %v4215_v35  ;;  %v4218_v41 = vsel %vm798_vm1, %v4213_v6, %v4217_v32  ;;  %v6643_v28 = vld [vmem:[%s8903_s1 + $0x798] sm:$0xff] }
 0x26b   : > { %4092 = vmatmul.bf16.vlgmr.msra.gmra.mxu0 %v3893_v15  ;;  %v6589_v15 = vld [vmem:[%s6743_s16 + $0x54] sm:$0xf0]  ;;  %4897 = vmatpush.bf16.msrb.mxu2 %v6643_v28 }
 0x26c   : > { %v8507_v42 = vadd.f32 %v3148_v40, %v2826_v19  ;;  %v2827_v37 = vadd.f32 %v2811_v27, %v8256_v56  ;;  %4130 = vmatmul.bf16.vlgmr.msra.gmra.mxu1 %v3905_v18  ;;  %v3918_v56 = vshll.u32 %v8512_v13, 16  ;;  %v3916_v19 = vor.u32 %v3914_v50, %v3904_v51  ;;  %v6588_v18 = vld [vmem:[%s6743_s16 + $0x54] sm:$0xf]  ;;  %v6651_v6 = vld [vmem:[%s8903_s1 + $0x7d8] sm:$0xff] }
 0x26d   : > { %4347 = vmatmul.bf16.vlgmr.msra.gmra.mxu2 %v4211_v47  ;;  %v3913_v51 = vsel %vm295_vm0, %v3908_v22, %v3912_v8  ;;  %v8560_v62 = vor.u32 %v6588_v18, %v6088_v5  ;;  %4935 = vmatpush.bf16.msrb.mxu3 %v6651_v6  ;;  %v6642_v18 = vld [vmem:[%s8903_s1 + $0x790] sm:$0xff] }
 0x26e   : > { %4385 = vmatmul.bf16.vlgmr.msra.gmra.mxu3 %v4214_v39  ;;  %v8558_v39 = vor.u32 %v6589_v15, %v6086_v23  ;;  %v6591_v23 = vld [vmem:[%s6743_s16 + $0x64] sm:$0xf0]  ;;  %v6650_v5 = vld [vmem:[%s8903_s1 + $0x7d0] sm:$0xff] }
 0x26f   : > { %4898 = vmatpush.bf16.msrb.mxu2 %v6642_v18 }
 0x270   : > { %v3112_v49 = vpop.f32.mrf.mxu2  ;;  %v2774_v25 = vpop.f32.mrf.mxu0 }
 0x271   : > { %v3150_v3 = vpop.f32.mrf.mxu3  ;;  %v2812_v7 = vpop.f32.mrf.mxu1  ;;  %4936 = vmatpush.bf16.msrb.mxu3 %v6650_v5 }
 0x272   : > { %v3151_v63 = vadd.f32 %v3150_v3, %v3112_v49  ;;  %v2813_v57 = vadd.f32 %v2812_v7, %v2774_v25  ;;  %v3930_v25 = vshrl.u32 %v8512_v13, 16  ;;  %v3934_v7 = vshll.u32 %v8560_v62, 16 }
 0x274   : > { %v8518_v26 = vadd.f32 %v3151_v63, %v2827_v37  ;;  %v2828_v34 = vadd.f32 %v2813_v57, %v8282_v48  ;;  %v3920_v48 = vrot.slane %v3918_v56, 1  ;;  %v3926_v63 = vshll.u32 %v8558_v39, 16 }
 0x275   : > { %v3936_v22 = vrot.slane %v3934_v7, 1 }
 0x276   : > { %v3921_v54 = vsel %vm295_vm0, %v3916_v19, %v3920_v48  ;;  %v3928_v1 = vrot.slane %v3926_v63, 1  ;;  %v3932_v53 = vor.u32 %v3930_v25, %v3920_v48  ;;  %v4219_v19 = vrot.slane %v8558_v39, 1  ;;  %v6590_v48 = vld [vmem:[%s6743_s16 + $0x64] sm:$0xf] }
 0x278   : > { %v3114_v12 = vpop.f32.mrf.mxu2  ;;  %v2777_v29 = vpop.f32.mrf.mxu0 }
 0x279   : > { %v3152_v31 = vpop.f32.mrf.mxu3  ;;  %v2815_v9 = vpop.f32.mrf.mxu1 }
 0x27a   : > { %v3153_v11 = vadd.f32 %v3152_v31, %v3114_v12  ;;  %v2816_v40 = vadd.f32 %v2815_v9, %v2777_v29  ;;  %v4221_v12 = vrot.slane %v8560_v62, 1 }
 0x27b   : > { %4097 = vmatmul.bf16.gmra.mxu0 %v3913_v51 }
 0x27c   : > { %v8555_v27 = vadd.f32 %v3153_v11, %v2828_v34  ;;  %v2829_v47 = vadd.f32 %v2816_v40, %v8302_v46  ;;  %4135 = vmatmul.bf16.gmra.mxu1 %v3921_v54  ;;  %v3924_v34 = vor.u32 %v3922_v60, %v3912_v8  ;;  %v6094_v8 = vld [vmem:[%s6743_s16 + $0x60] sm:$0xf]  ;;  %v3937_v54 = vsel %vm295_vm0, %v3932_v53, %v3936_v22  ;;  %v6096_v40 = vld [vmem:[%s6743_s16 + $0x68] sm:$0xf0] }
 0x27d   : > { %4352 = vmatmul.bf16.gmra.mxu2 %v4216_v58  ;;  %v4222_v15 = vsel %vm798_vm1, %v4217_v32, %v4221_v12  ;;  %v8609_v28 = vor.u32 %v6591_v23, %v6094_v8  ;;  %v8611_v6 = vor.u32 %v6590_v48, %v6096_v40  ;;  %v6634_v32 = vld [vmem:[%s8903_s1 + $0x750] sm:$0xff]  ;;  %v6649_v23 = vld [vmem:[%s8903_s1 + $0x7c8] sm:$0xff]  ;;  %v3801_v40 = vld [vmem:[%s6743_s16 + $0x78] sm:$0x11] }
 0x27e   : > { %4390 = vmatmul.bf16.gmra.mxu3 %v4218_v41  ;;  %v3929_v51 = vsel %vm295_vm0, %v3924_v34, %v3928_v1  ;;  %v4220_v41 = vsel %vm798_vm1, %v4215_v35, %v4219_v19  ;;  %v6626_v35 = vld [vmem:[%s8903_s1 + $0x710] sm:$0xff]  ;;  %4681 = vmatpush.bf16.msrb.mxu1 %v6634_v32  ;;  %v3868_v32 = vunpack.c.l.b16 %v3801_v40 }
 0x27f   : > { %4643 = vmatpush.bf16.msrb.mxu0 %v6626_v35  ;;  %v4225_v48 = vrot.slane %v8611_v6, 1  ;;  %4937 = vmatpush.bf16.msrb.mxu3 %v6649_v23 }
 0x280   : > { %v3117_v45 = vpop.f32.mrf.mxu2  ;;  %v2779_v49 = vpop.f32.mrf.mxu0 }
 0x281   : > { %v3155_v46 = vpop.f32.mrf.mxu3  ;;  %v2817_v3 = vpop.f32.mrf.mxu1  ;;  %v3946_v49 = vshrl.u32 %v8560_v62, 16 }
 0x282   : > { %v3156_v37 = vadd.f32 %v3155_v46, %v3117_v45  ;;  %v3950_v3 = vshll.u32 %v8611_v6, 16 }
 0x284   : > { %v8572_v57 = vadd.f32 %v3156_v37, %v2829_v47  ;;  %v3942_v37 = vshll.u32 %v8609_v28, 16 }
 0x288   : > { %v3119_v31 = vpop.f32.mrf.mxu2  ;;  %v3331_v29 = vpop.f32.mrf.mxu0 }
 0x289   : > { %v3157_v11 = vpop.f32.mrf.mxu3  ;;  %v3369_v9 = vpop.f32.mrf.mxu1 }
 0x28a   : > { %v3370_v58 = vadd.f32 %v3369_v9, %v3331_v29  ;;  %v3944_v29 = vrot.slane %v3942_v37, 1  ;;  %v3948_v9 = vor.u32 %v3946_v49, %v3936_v22 }
 0x28b   : > { %4102 = vmatmul.bf16.gmra.mxu0 %v3929_v51  ;;  %v3952_v51 = vrot.slane %v3950_v3, 1 }
 0x28c   : > { %v3398_v47 = vadd.f32 %v3370_v58, %v8345_v38  ;;  %4140 = vmatmul.bf16.gmra.mxu1 %v3937_v54  ;;  %v3938_v38 = vshrl.u32 %v8558_v39, 16  ;;  %v6641_v54 = vld [vmem:[%s8903_s1 + $0x788] sm:$0xff] }
 0x28d   : > { %4357 = vmatmul.bf16.gmra.mxu2 %v4220_v41 }
 0x28e   : > { %4395 = vmatmul.bf16.gmra.mxu3 %v4222_v15  ;;  %v3940_v11 = vor.u32 %v3938_v38, %v3928_v1  ;;  %v8641_v1 = vld [vmem:[%s6743_s16 + $0x70] sm:$0xff]  ;;  %4899 = vmatpush.bf16.msrb.mxu2 %v6641_v54  ;;  %v3953_v15 = vsel %vm295_vm0, %v3948_v9, %v3952_v51  ;;  %v6633_v9 = vld [vmem:[%s8903_s1 + $0x748] sm:$0xff] }
 0x28f   : > { %v8916_v18 = vunpack.c.l.b16 %v8641_v1  ;;  %4682 = vmatpush.bf16.msrb.mxu1 %v6633_v9 }
 0x290   : > { %v3712_v45 = vpop.f32.mrf.mxu2  ;;  %v3333_v52 = vpop.f32.mrf.mxu0  ;;  %v3945_v41 = vsel %vm295_vm0, %v3940_v11, %v3944_v29  ;;  %v6625_v11 = vld [vmem:[%s8903_s1 + $0x708] sm:$0xff] }
 0x291   : > { %v3750_v46 = vpop.f32.mrf.mxu3  ;;  %v3371_v34 = vpop.f32.mrf.mxu1  ;;  %4644 = vmatpush.bf16.msrb.mxu0 %v6625_v11 }
 0x292   : > { %v3751_v10 = vadd.f32 %v3750_v46, %v3712_v45  ;;  %v3372_v53 = vadd.f32 %v3371_v34, %v3333_v52  ;;  %v8915_v45 = vunpack.c.h.b16 %v8641_v1  ;;  %v3869_v46 = vunpack.c.h.b16 %v3801_v40 }
 0x293   : > { %v4226_v34 = vsel %vm798_vm1, %v4221_v12, %v4225_v48  ;;  %v3954_v40 = vshrl.u32 %v8609_v28, 16 }
 0x294   : > { %v8623_v31 = vadd.f32 %v3751_v10, %v3398_v47  ;;  %v3399_v8 = vadd.f32 %v3372_v53, %v8367_v14  ;;  %v4223_v14 = vrot.slane %v8609_v28, 1  ;;  %v8675_v12 = vpack.c.b16 %v3869_v46, %v8915_v45  ;;  %v6648_v46 = vld [vmem:[%s8903_s1 + $0x7c0] sm:$0xff] }
 0x295   : > { %v3956_v11 = vor.u32 %v3954_v40, %v3944_v29  ;;  %4938 = vmatpush.bf16.msrb.mxu3 %v6648_v46 }
 0x296   : > { %v4224_v52 = vsel %vm798_vm1, %v4219_v19, %v4223_v14  ;;  %v8671_v19 = vpack.c.b16 %v3868_v32, %v8916_v18  ;;  %v6640_v32 = vld [vmem:[%s8903_s1 + $0x780] sm:$0xff] }
 0x297   : > { %4900 = vmatpush.bf16.msrb.mxu2 %v6640_v32 }
 0x298   : > { %v3714_v22 = vpop.f32.mrf.mxu2  ;;  %v3336_v47 = vpop.f32.mrf.mxu0 }
 0x299   : > { %v3752_v58 = vpop.f32.mrf.mxu3  ;;  %v3374_v35 = vpop.f32.mrf.mxu1 }
 0x29a   : > { %v3753_v5 = vadd.f32 %v3752_v58, %v3714_v22  ;;  %v3375_v10 = vadd.f32 %v3374_v35, %v3336_v47 }
 0x29b   : > { %4107 = vmatmul.bf16.gmra.mxu0 %v3945_v41  ;;  %v3958_v41 = vshll.u32 %v8671_v19, 16 }
 0x29c   : > { %v8660_v53 = vadd.f32 %v3753_v5, %v3399_v8  ;;  %v3400_v54 = vadd.f32 %v3375_v10, %v8385_v59  ;;  %4145 = vmatmul.bf16.gmra.mxu1 %v3953_v15  ;;  %v3962_v15 = vshrl.u32 %v8611_v6, 16  ;;  %v3966_v5 = vshll.u32 %v8675_v12, 16 }
 0x29d   : > { %4362 = vmatmul.bf16.gmra.mxu2 %v4224_v52  ;;  %v6624_v52 = vld [vmem:[%s8903_s1 + $0x700] sm:$0xff]  ;;  %v3960_v9 = vrot.slane %v3958_v41, 1 }
 0x29e   : > { %4400 = vmatmul.bf16.gmra.mxu3 %v4226_v34  ;;  %v6632_v34 = vld [vmem:[%s8903_s1 + $0x740] sm:$0xff]  ;;  %4645 = vmatpush.bf16.msrb.mxu0 %v6624_v52 }
 0x29f   : > { %4683 = vmatpush.bf16.msrb.mxu1 %v6632_v34  ;;  %v3961_v29 = vsel %vm295_vm0, %v3956_v11, %v3960_v9 }
 0x2a0   : > { %v3717_v8 = vpop.f32.mrf.mxu2  ;;  %v3338_v59 = vpop.f32.mrf.mxu0 }
 0x2a1   : > { %v3755_v23 = vpop.f32.mrf.mxu3  ;;  %v3376_v58 = vpop.f32.mrf.mxu1 }
 0x2a2   : > { %v3756_v22 = vadd.f32 %v3755_v23, %v3717_v8  ;;  %v3377_v47 = vadd.f32 %v3376_v58, %v3338_v59  ;;  %v3968_v8 = vrot.slane %v3966_v5, 1  ;;  %v4229_v23 = vrot.slane %v8675_v12, 1 }
 0x2a4   : > { %v8681_v35 = vadd.f32 %v3756_v22, %v3400_v54  ;;  %v3401_v10 = vadd.f32 %v3377_v47, %v8408_v20  ;;  %v3964_v54 = vor.u32 %v3962_v15, %v3952_v51  ;;  %v4227_v20 = vrot.slane %v8671_v19, 1 }
 0x2a5   : > { %v4230_v5 = vsel %vm798_vm1, %v4225_v48, %v4229_v23  ;;  %v3970_v48 = vshrl.u32 %v8671_v19, 16  ;;  %v4468_v19 = vshll.u32 %v8467_v33, 16 }
 0x2a6   : > { %v3969_v41 = vsel %vm295_vm0, %v3964_v54, %v3968_v8  ;;  %v4228_v51 = vsel %vm798_vm1, %v4223_v14, %v4227_v20  ;;  %vm5044_vm0 = vmor %vm5042_vm14, %vm5043_vm15  ;;  %vm5063_vm1 = vcmask 1041408  }
 0x2a8   : > { %v3719_v22 = vpop.f32.mrf.mxu2  ;;  %v3341_v47 = vpop.f32.mrf.mxu0 }
 0x2a9   : > { %v3757_v59 = vpop.f32.mrf.mxu3  ;;  %v3379_v45 = vpop.f32.mrf.mxu1 }
 0x2aa   : > { %v3758_v58 = vadd.f32 %v3757_v59, %v3719_v22  ;;  %v3380_v18 = vadd.f32 %v3379_v45, %v3341_v47 }
 0x2ab   : > { %4112 = vmatmul.bf16.gmra.mxu0 %v3961_v29 }
 0x2ac   : > { %v8710_v32 = vadd.f32 %v3758_v58, %v3401_v10  ;;  %v3402_v46 = vadd.f32 %v3380_v18, %v8419_v2  ;;  %4150 = vmatmul.bf16.gmra.mxu1 %v3969_v41  ;;  %v3973_v10 = vshrl.u32 %v8675_v12, 16  ;;  %v3972_v58 = vor.u32 %v3970_v48, %v3960_v9 }
 0x2ad   : > { %4367 = vmatmul.bf16.gmra.mxu2 %v4228_v51  ;;  %v4477_v12 = vshrl.u32 %v8470_v61, 16  ;;  %v4480_v9 = vshll.u32 %v8470_v61, 16  ;;  %v4470_v48 = vrot.slane %v4468_v19, 2 }
 0x2ae   : > { %4405 = vmatmul.bf16.gmra.mxu3 %v4230_v5  ;;  %v3975_v47 = vor.u32 %v3973_v10, %v3968_v8 }
 0x2af   : > { %v4482_v61 = vrot.slane %v4480_v9, 2 }
 0x2b0   : > { %v3722_v52 = vpop.f32.mrf.mxu2  ;;  %v3343_v45 = vpop.f32.mrf.mxu0 }
 0x2b1   : > { %v3760_v34 = vpop.f32.mrf.mxu3  ;;  %v3381_v54 = vpop.f32.mrf.mxu1 }
 0x2b2   : > { %v3761_v11 = vadd.f32 %v3760_v34, %v3722_v52  ;;  %v3382_v22 = vadd.f32 %v3381_v54, %v3343_v45  ;;  %v4725_v34 = vld [vmem:[%s6743_s16 + $0x20] sm:$0xcc]  ;;  %v4472_v45 = vrot.slane %v3906_v16, 1 }
 0x2b3   : > { %v4759_v8 = vunpack.c.l.b16 %v4725_v34 }
 0x2b4   : > { %v8713_v14 = vadd.f32 %v3761_v11, %v3402_v46  ;;  %v3403_v59 = vadd.f32 %v3382_v22, %v8444_v43  ;;  %v4465_v43 = vshrl.u32 %v8467_v33, 16  ;;  %v4760_v11 = vunpack.c.h.b16 %v4725_v34 }
 0x2b5   : > { %v4473_v33 = vrot.slane %v3890_v17, 2  ;;  %v4761_v16 = vpack.c.b16 %v8428_v30, %v4759_v8 }
 0x2b7   : > { %v4763_v34 = vrot.slane %v4761_v16, 2 }
 0x2b8   : > { %v3724_v2 = vpop.f32.mrf.mxu2  ;;  %v3346_v41 = vpop.f32.mrf.mxu0 }
 0x2b9   : > { %v3762_v18 = vpop.f32.mrf.mxu3  ;;  %v3384_v51 = vpop.f32.mrf.mxu1 }
 0x2ba   : > { %v3763_v29 = vadd.f32 %v3762_v18, %v3724_v2  ;;  %v3385_v5 = vadd.f32 %v3384_v51, %v3346_v41  ;;  %v4479_v2 = vrot.slane %v4477_v12, 1  ;;  %v4485_v18 = vrot.slane %v3902_v44, 2 }
 0x2bb   : > { %4117 = vmatmul.bf16.gmra.mxu0 %v3972_v58  ;;  %v4474_v51 = vor.u32 %v4473_v33, %v4472_v45  ;;  %v4767_v12 = vrot.slane %v8456_v4, 2 }
 0x2bc   : > { %v8718_v52 = vadd.f32 %v3763_v29, %v3403_v59  ;;  %v3404_v46 = vadd.f32 %v3385_v5, %v8472_v24  ;;  %4155 = vmatmul.bf16.gmra.mxu1 %v3975_v47  ;;  %v4484_v24 = vrot.slane %v3914_v50, 1  ;;  %v4467_v59 = vrot.slane %v4465_v43, 1 }
 0x2bd   : > { %4372 = vmatmul.bf16.gmra.mxu2 %v4227_v20  ;;  %v4762_v50 = vpack.c.b16 %v8432_v21, %v4760_v11  ;;  %v4483_v17 = vor.u32 %v4482_v61, %v4479_v2  ;;  %v4764_v43 = vrot.slane %v8454_v36, 2 }
 0x2be   : > { %4410 = vmatmul.bf16.gmra.mxu3 %v4229_v23  ;;  %v4471_v41 = vor.u32 %v4470_v48, %v4467_v59  ;;  %v4486_v5 = vor.u32 %v4485_v18, %v4484_v24  ;;  %v4488_v59 = vrot.slane %v3922_v60, 1  ;;  %v4769_v60 = vrot.slane %v8510_v55, 2 }
 0x2bf   : > { %v4766_v19 = vrot.slane %v4762_v50, 2  ;;  %v4765_v11 = vsel %vm1747_vm3, %v4763_v34, %v4764_v43  ;;  %v4771_v50 = vrot.slane %v8512_v13, 2 }
 0x2c0   : > { %v3727_v54 = vpop.f32.mrf.mxu2  ;;  %v3348_v23 = vpop.f32.mrf.mxu0  ;;  %v4475_v21 = vsel %vm1054_vm2, %v4471_v41, %v4474_v51 }
 0x2c1   : > { %v3765_v22 = vpop.f32.mrf.mxu3  ;;  %v3386_v10 = vpop.f32.mrf.mxu1  ;;  %v4768_v45 = vsel %vm1747_vm3, %v4766_v19, %v4767_v12 }
 0x2c2   : > { %v3766_v20 = vadd.f32 %v3765_v22, %v3727_v54  ;;  %v3387_v58 = vadd.f32 %v3386_v10, %v3348_v23  ;;  %v4489_v23 = vrot.slane %v3910_v0, 2  ;;  %v4492_v10 = vrot.slane %v3930_v25, 1 }
 0x2c4   : > { %v8736_v47 = vadd.f32 %v3766_v20, %v3404_v46  ;;  %v3405_v29 = vadd.f32 %v3387_v58, %v8507_v42  ;;  %v4487_v46 = vsel %vm1054_vm2, %v4483_v17, %v4486_v5  ;;  %v4490_v58 = vor.u32 %v4489_v23, %v4488_v59 }
 0x2c6   : > { %v4491_v25 = vsel %vm1054_vm2, %v4474_v51, %v4490_v58  ;;  %v4496_v51 = vrot.slane %v3938_v38, 1  ;;  %v4775_v38 = vrot.slane %v8560_v62, 2 }
 0x2c8   : > { %v3729_v44 = vpop.f32.mrf.mxu2  ;;  %v3351_v30 = vpop.f32.mrf.mxu0 }
 0x2c9   : > { %v3767_v9 = vpop.f32.mrf.mxu3  ;;  %v3389_v8 = vpop.f32.mrf.mxu1 }
 0x2ca   : > { %v3768_v54 = vadd.f32 %v3767_v9, %v3729_v44  ;;  %v3390_v42 = vadd.f32 %v3389_v8, %v3351_v30  ;;  %v4770_v44 = vsel %vm1747_vm3, %v4764_v43, %v4769_v60  ;;  %v4497_v43 = vrot.slane %v3926_v63, 2 }
 0x2cb   : > { %4646 = vmatmul.bf16.vlgmr.msrb.gmra.mxu0 %v4475_v21 }
 0x2cc   : > { %v8745_v24 = vadd.f32 %v3768_v54, %v3405_v29  ;;  %v3406_v36 = vadd.f32 %v3390_v42, %v8518_v26  ;;  %4684 = vmatmul.bf16.vlgmr.msrb.gmra.mxu1 %v4487_v46  ;;  %v4493_v26 = vrot.slane %v3918_v56, 2  ;;  %v4498_v46 = vor.u32 %v4497_v43, %v4496_v51 }
 0x2cd   : > { %4901 = vmatmul.bf16.vlgmr.msrb.gmra.mxu2 %v4765_v11  ;;  %v4773_v11 = vrot.slane %v8558_v39, 2 }
 0x2ce   : > { %4939 = vmatmul.bf16.vlgmr.msrb.gmra.mxu3 %v4768_v45  ;;  %v4494_v16 = vor.u32 %v4493_v26, %v4492_v10  ;;  %v4499_v63 = vsel %vm1054_vm2, %v4490_v58, %v4498_v46  ;;  %v4426_v58 = vld [vmem:[%s6743_s16 + $0x78] sm:$0x33] }
 0x2d0   : > { %v3732_v4 = vpop.f32.mrf.mxu2  ;;  %v3353_v33 = vpop.f32.mrf.mxu0  ;;  %v4495_v56 = vsel %vm1054_vm2, %v4486_v5, %v4494_v16 }
 0x2d1   : > { %v3770_v22 = vpop.f32.mrf.mxu3  ;;  %v3391_v20 = vpop.f32.mrf.mxu1 }
 0x2d2   : > { %v3771_v48 = vadd.f32 %v3770_v22, %v3732_v4  ;;  %v3392_v2 = vadd.f32 %v3391_v20, %v3353_v33  ;;  %v4504_v20 = vrot.slane %v3954_v40, 1 }
 0x2d4   : > { %v8756_v61 = vadd.f32 %v3771_v48, %v3406_v36  ;;  %v3407_v18 = vadd.f32 %v3392_v2, %v8555_v27  ;;  %v4772_v27 = vsel %vm1747_vm3, %v4767_v12, %v4771_v50  ;;  %v4500_v12 = vrot.slane %v3946_v49, 1 }
 0x2d5   : > { %v4774_v48 = vsel %vm1747_vm3, %v4769_v60, %v4773_v11  ;;  %v4505_v2 = vrot.slane %v3942_v37, 2  ;;  %v4779_v37 = vrot.slane %v8611_v6, 2 }
 0x2d7   : > { %v4506_v40 = vor.u32 %v4505_v2, %v4504_v20 }
 0x2d8   : > { %v3734_v29 = vpop.f32.mrf.mxu2  ;;  %v3356_v17 = vpop.f32.mrf.mxu0 }
 0x2d9   : > { %v3772_v41 = vpop.f32.mrf.mxu3  ;;  %v3394_v34 = vpop.f32.mrf.mxu1 }
 0x2da   : > { %v3773_v0 = vadd.f32 %v3772_v41, %v3734_v29  ;;  %v3395_v19 = vadd.f32 %v3394_v34, %v3356_v17  ;;  %v4460_v29 = vunpack.c.l.b16 %v4426_v58  ;;  %v4777_v17 = vrot.slane %v8609_v28, 2 }
 0x2db   : > { %4651 = vmatmul.bf16.gmra.mxu0 %v4491_v25 }
 0x2dc   : > { %v8765_v9 = vadd.f32 %v3773_v0, %v3407_v18  ;;  %v3408_v55 = vadd.f32 %v3395_v19, %v8572_v57  ;;  %4689 = vmatmul.bf16.gmra.mxu1 %v4495_v56  ;;  %v4501_v57 = vrot.slane %v3934_v7, 2  ;;  %v4776_v7 = vsel %vm1747_vm3, %v4771_v50, %v4775_v38 }
 0x2dd   : > { %4906 = vmatmul.bf16.gmra.mxu2 %v4770_v44  ;;  %v4508_v18 = vrot.slane %v3962_v15, 1  ;;  %v4461_v0 = vunpack.c.h.b16 %v4426_v58  ;;  %v8926_v15 = vunpack.c.l.b16 %v8641_v1  ;;  %v4778_v6 = vsel %vm1747_vm3, %v4773_v11, %v4777_v17 }
 0x2de   : > { %4944 = vmatmul.bf16.gmra.mxu3 %v4772_v27  ;;  %v4502_v42 = vor.u32 %v4501_v57, %v4500_v12  ;;  %v4507_v27 = vsel %vm1054_vm2, %v4498_v46, %v4506_v40 }
 0x2df   : > { %v8801_v56 = vpack.c.b16 %v4460_v29, %v8926_v15 }
 0x2e0   : > { %v3737_v13 = vpop.f32.mrf.mxu2  ;;  %v3358_v5 = vpop.f32.mrf.mxu0  ;;  %v4503_v59 = vsel %vm1054_vm2, %v4494_v16, %v4502_v42 }
 0x2e1   : > { %v3775_v54 = vpop.f32.mrf.mxu3  ;;  %v3396_v8 = vpop.f32.mrf.mxu1  ;;  %v4513_v5 = vshrl.u32 %v8801_v56, 16 }
 0x2e2   : > { %v3776_v30 = vadd.f32 %v3775_v54, %v3737_v13  ;;  %v4780_v54 = vsel %vm1747_vm3, %v4775_v38, %v4779_v37  ;;  %v4516_v8 = vshll.u32 %v8801_v56, 16 }
 0x2e3   : > { %v4515_v46 = vrot.slane %v4513_v5, 1 }
 0x2e4   : > { %v8776_v21 = vadd.f32 %v3776_v30, %v3408_v55  ;;  %v8927_v55 = vunpack.c.h.b16 %v8641_v1 }
 0x2e6   : > { %v8807_v13 = vpack.c.b16 %v4461_v0, %v8927_v55 }
 0x2e8   : > { %v3739_v45 = vpop.f32.mrf.mxu2  ;;  %v4093_v4 = vpop.f32.mrf.mxu0  ;;  %v4522_v1 = vshrl.u32 %v8807_v13, 16  ;;  %v4525_v43 = vshll.u32 %v8807_v13, 16 }
 0x2e9   : > { %v3777_v36 = vpop.f32.mrf.mxu3  ;;  %v4131_v22 = vpop.f32.mrf.mxu1  ;;  %v4518_v45 = vrot.slane %v4516_v8, 2 }
 0x2ea   : > { %v4132_v49 = vadd.f32 %v4131_v22, %v4093_v4  ;;  %v4527_v36 = vrot.slane %v4525_v43, 2 }
 0x2eb   : > { %4656 = vmatmul.bf16.gmra.mxu0 %v4499_v63 }
 0x2ec   : > { %v4160_v33 = vadd.f32 %v4132_v49, %v8623_v31  ;;  %4694 = vmatmul.bf16.gmra.mxu1 %v4503_v59  ;;  %v4509_v31 = vrot.slane %v3950_v3, 2  ;;  %v4519_v59 = vor.u32 %v4518_v45, %v4515_v46 }
 0x2ed   : > { %4911 = vmatmul.bf16.gmra.mxu2 %v4774_v48  ;;  %v4781_v48 = vrot.slane %v8801_v56, 2 }
 0x2ee   : > { %4949 = vmatmul.bf16.gmra.mxu3 %v4776_v7  ;;  %v4510_v41 = vor.u32 %v4509_v31, %v4508_v18  ;;  %v4783_v7 = vrot.slane %v8807_v13, 2 }
 0x2ef   : > { %v4782_v18 = vsel %vm1747_vm3, %v4777_v17, %v4781_v48 }
 0x2f0   : > { %v4348_v39 = vpop.f32.mrf.mxu2  ;;  %v4095_v10 = vpop.f32.mrf.mxu0 }
 0x2f1   : > { %v4386_v62 = vpop.f32.mrf.mxu3  ;;  %v4133_v26 = vpop.f32.mrf.mxu1 }
 0x2f2   : > { %v4387_v23 = vadd.f32 %v4386_v62, %v4348_v39  ;;  %v4134_v16 = vadd.f32 %v4133_v26, %v4095_v10  ;;  %v4520_v10 = vsel %vm1054_vm2, %v4506_v40, %v4519_v59 }
 0x2f4   : > { %v8794_v60 = vadd.f32 %v4387_v23, %v4160_v33  ;;  %v4161_v50 = vadd.f32 %v4134_v16, %v8660_v53  ;;  %v4511_v53 = vsel %vm1054_vm2, %v4502_v42, %v4510_v41 }
 0x2f8   : > { %v4350_v34 = vpop.f32.mrf.mxu2  ;;  %v4098_v19 = vpop.f32.mrf.mxu0 }
 0x2f9   : > { %v4388_v25 = vpop.f32.mrf.mxu3  ;;  %v4136_v44 = vpop.f32.mrf.mxu1 }
 0x2fa   : > { %v4389_v3 = vadd.f32 %v4388_v25, %v4350_v34  ;;  %v4137_v28 = vadd.f32 %v4136_v44, %v4098_v19 }
 0x2fb   : > { %4661 = vmatmul.bf16.gmra.mxu0 %v4507_v27 }
 0x2fc   : > { %v8811_v51 = vadd.f32 %v4389_v3, %v4161_v50  ;;  %v4162_v30 = vadd.f32 %v4137_v28, %v8681_v35  ;;  %4699 = vmatmul.bf16.gmra.mxu1 %v4511_v53  ;;  %v4524_v35 = vrot.slane %v4522_v1, 1 }
 0x2fd   : > { %4916 = vmatmul.bf16.gmra.mxu2 %v4778_v6 }
 0x2fe   : > { %4954 = vmatmul.bf16.gmra.mxu3 %v4780_v54  ;;  %v4528_v49 = vor.u32 %v4527_v36, %v4524_v35 }
 0x300   : > { %v4353_v12 = vpop.f32.mrf.mxu2  ;;  %v4100_v11 = vpop.f32.mrf.mxu0  ;;  %v4529_v26 = vsel %vm1054_vm2, %v4510_v41, %v4528_v49  ;;  %vm5064_vm2 = vcmask 1045508  }
 0x301   : > { %v4391_v57 = vpop.f32.mrf.mxu3  ;;  %v4138_v38 = vpop.f32.mrf.mxu1 }
 0x302   : > { %v4392_v42 = vadd.f32 %v4391_v57, %v4353_v12  ;;  %v4139_v4 = vadd.f32 %v4138_v38, %v4100_v11 }
 0x304   : > { %v8818_v22 = vadd.f32 %v4392_v42, %v4162_v30  ;;  %v4163_v63 = vadd.f32 %v4139_v4, %v8710_v32  ;;  %v4784_v32 = vsel %vm1747_vm3, %v4779_v37, %v4783_v7  ;;  %vm5065_vm3 = vmor %vm5063_vm1, %vm5064_vm2 }
 0x308   : > { %v4355_v33 = vpop.f32.mrf.mxu2  ;;  %v4103_v20 = vpop.f32.mrf.mxu0 }
 0x309   : > { %v4393_v39 = vpop.f32.mrf.mxu3  ;;  %v4141_v23 = vpop.f32.mrf.mxu1 }
 0x30a   : > { %v4394_v62 = vadd.f32 %v4393_v39, %v4355_v33  ;;  %v4142_v2 = vadd.f32 %v4141_v23, %v4103_v20 }
 0x30b   : > { %4666 = vmatmul.bf16.gmra.mxu0 %v4520_v10 }
 0x30c   : > { %v8827_v31 = vadd.f32 %v4394_v62, %v4163_v63  ;;  %v4164_v58 = vadd.f32 %v4142_v2, %v8713_v14  ;;  %4704 = vmatmul.bf16.gmra.mxu1 %v4529_v26 }
 0x30d   : > { %4921 = vmatmul.bf16.gmra.mxu2 %v4782_v18 }
 0x30e   : > { %4959 = vmatmul.bf16.gmra.mxu3 %v4784_v32 }
 0x310   : > { %v4358_v16 = vpop.f32.mrf.mxu2  ;;  %v4105_v0 = vpop.f32.mrf.mxu0 }
 0x311   : > { %v4396_v50 = vpop.f32.mrf.mxu3  ;;  %v4143_v40 = vpop.f32.mrf.mxu1 }
 0x312   : > { %v4397_v29 = vadd.f32 %v4396_v50, %v4358_v16  ;;  %v4144_v34 = vadd.f32 %v4143_v40, %v4105_v0 }
 0x314   : > { %v8830_v41 = vadd.f32 %v4397_v29, %v4164_v58  ;;  %v4165_v17 = vadd.f32 %v4144_v34, %v8718_v52 }
 0x318   : > { %v4360_v25 = vpop.f32.mrf.mxu2  ;;  %v4108_v56 = vpop.f32.mrf.mxu0 }
 0x319   : > { %v4398_v37 = vpop.f32.mrf.mxu3  ;;  %v4146_v3 = vpop.f32.mrf.mxu1 }
 0x31a   : > { %v4399_v15 = vadd.f32 %v4398_v37, %v4360_v25  ;;  %v4147_v14 = vadd.f32 %v4146_v3, %v4108_v56 }
 0x31b   : > { %4671 = vmatmul.bf16.gmra.mxu0 %v4519_v59 }
 0x31c   : > { %v8833_v19 = vadd.f32 %v4399_v15, %v4165_v17  ;;  %v4166_v44 = vadd.f32 %v4147_v14, %v8736_v47  ;;  %4709 = vmatmul.bf16.gmra.mxu1 %v4528_v49 }
 0x31d   : > { %4926 = vmatmul.bf16.gmra.mxu2 %v4781_v48 }
 0x31e   : > { %4964 = vmatmul.bf16.gmra.mxu3 %v4783_v7 }
 0x320   : > { %v4363_v27 = vpop.f32.mrf.mxu2  ;;  %v4110_v13 = vpop.f32.mrf.mxu0 }
 0x321   : > { %v4401_v53 = vpop.f32.mrf.mxu3  ;;  %v4148_v28 = vpop.f32.mrf.mxu1 }
 0x322   : > { %v4402_v55 = vadd.f32 %v4401_v53, %v4363_v27  ;;  %v4149_v52 = vadd.f32 %v4148_v28, %v4110_v13 }
 0x324   : > { %v8836_v6 = vadd.f32 %v4402_v55, %v4166_v44  ;;  %v4167_v54 = vadd.f32 %v4149_v52, %v8745_v24 }
 0x328   : > { %v4365_v30 = vpop.f32.mrf.mxu2  ;;  %v4113_v1 = vpop.f32.mrf.mxu0 }
 0x329   : > { %v4403_v5 = vpop.f32.mrf.mxu3  ;;  %v4151_v43 = vpop.f32.mrf.mxu1 }
 0x32a   : > { %v4404_v8 = vadd.f32 %v4403_v5, %v4365_v30  ;;  %v4152_v47 = vadd.f32 %v4151_v43, %v4113_v1 }
 0x32c   : > { %v8839_v12 = vadd.f32 %v4404_v8, %v4167_v54  ;;  %v4168_v57 = vadd.f32 %v4152_v47, %v8756_v61 }
 0x330   : > { %v4368_v46 = vpop.f32.mrf.mxu2  ;;  %v4115_v38 = vpop.f32.mrf.mxu0 }
 0x331   : > { %v4406_v42 = vpop.f32.mrf.mxu3  ;;  %v4153_v45 = vpop.f32.mrf.mxu1 }
 0x332   : > { %v4407_v11 = vadd.f32 %v4406_v42, %v4368_v46  ;;  %v4154_v35 = vadd.f32 %v4153_v45, %v4115_v38 }
 0x334   : > { %v8842_v36 = vadd.f32 %v4407_v11, %v4168_v57  ;;  %v4169_v24 = vadd.f32 %v4154_v35, %v8765_v9 }
 0x338   : > { %v4370_v4 = vpop.f32.mrf.mxu2  ;;  %v4118_v49 = vpop.f32.mrf.mxu0 }
 0x339   : > { %v4408_v63 = vpop.f32.mrf.mxu3  ;;  %v4156_v48 = vpop.f32.mrf.mxu1 }
 0x33a   : > { %v4409_v59 = vadd.f32 %v4408_v63, %v4370_v4  ;;  %v4157_v7 = vadd.f32 %v4156_v48, %v4118_v49 }
 0x33c   : > { %v8845_v33 = vadd.f32 %v4409_v59, %v4169_v24  ;;  %v4170_v61 = vadd.f32 %v4157_v7, %v8776_v21  ;;  %v8854_v21 = vld [vmem:[%s8904_s2] ss:$0 sm:$0xff] }
 0x340   : > { %v4373_v39 = vpop.f32.mrf.mxu2  ;;  %v4120_v23 = vpop.f32.mrf.mxu0 }
 0x341   : > { %v4411_v62 = vpop.f32.mrf.mxu3  ;;  %v4158_v10 = vpop.f32.mrf.mxu1 }
 0x342   : > { %v4412_v20 = vadd.f32 %v4411_v62, %v4373_v39 }
 0x344   : > { %v8848_v26 = vadd.f32 %v4412_v20, %v4170_v61 }
 0x348   : > { %v4375_v2 = vpop.f32.mrf.mxu2  ;;  %v4647_v18 = vpop.f32.mrf.mxu0 }
 0x349   : > { %v4413_v9 = vpop.f32.mrf.mxu3  ;;  %v4685_v32 = vpop.f32.mrf.mxu1 }
 0x34a   : > { %v4686_v58 = vadd.f32 %v4685_v32, %v4647_v18 }
 0x34c   : > { %v4714_v29 = vadd.f32 %v4686_v58, %v8794_v60 }
 0x350   : > { %v4902_v16 = vpop.f32.mrf.mxu2  ;;  %v4649_v40 = vpop.f32.mrf.mxu0 }
 0x351   : > { %v4940_v50 = vpop.f32.mrf.mxu3  ;;  %v4687_v34 = vpop.f32.mrf.mxu1 }
 0x352   : > { %v4941_v0 = vadd.f32 %v4940_v50, %v4902_v16  ;;  %v4688_v37 = vadd.f32 %v4687_v34, %v4649_v40 }
 0x354   : > { %v4969_v17 = vadd.f32 %v4941_v0, %v4714_v29  ;;  %v4715_v3 = vadd.f32 %v4688_v37, %v8811_v51 }
 0x356   : > { %v4984_v25 = vadd.f32 %v8854_v21, %v4969_v17 }
 0x358   : > { %v4995_v60 = vpack.c.bf16 %v4984_v25, %v4984_v25  ;;  %v4904_v15 = vpop.f32.mrf.mxu2  ;;  %v4652_v44 = vpop.f32.mrf.mxu0 }
 0x359   : > { %v4942_v56 = vpop.f32.mrf.mxu3  ;;  %v4690_v27 = vpop.f32.mrf.mxu1 }
 0x35a   : > { %5007 = vst.msk [vmem:[%s8861_s29] sm:$0xf] %vm5006_vm7, %v4995_v60  ;;  %v4943_v14 = vadd.f32 %v4942_v56, %v4904_v15  ;;  %v4691_v13 = vadd.f32 %v4690_v27, %v4652_v44 }
 0x35c   : > { %v4970_v53 = vadd.f32 %v4943_v14, %v4715_v3  ;;  %v4716_v8 = vadd.f32 %v4691_v13, %v8818_v22 }
 0x35e   : > { %v4985_v55 = vadd.f32 %v8854_v21, %v4970_v53 }
 0x360   : > { %v4996_v28 = vpack.c.bf16 %v4985_v55, %v4985_v55  ;;  %v4907_v52 = vpop.f32.mrf.mxu2  ;;  %v4654_v43 = vpop.f32.mrf.mxu0 }
 0x361   : > { %v4945_v54 = vpop.f32.mrf.mxu3  ;;  %v4692_v47 = vpop.f32.mrf.mxu1 }
 0x362   : > { %v5012_v30 = vshrl.u32 %v4996_v28, 16  ;;  %v5015_v5 = vshll.u32 %v4996_v28, 16  ;;  %v4946_v1 = vadd.f32 %v4945_v54, %v4907_v52  ;;  %v4693_v46 = vadd.f32 %v4692_v47, %v4654_v43 }
 0x364   : > { %v4971_v57 = vadd.f32 %v4946_v1, %v4716_v8  ;;  %v5014_v51 = vrot.slane %v5012_v30, 5  ;;  %v5017_v42 = vrot.slane %v5015_v5, 6  ;;  %v4717_v45 = vadd.f32 %v4693_v46, %v8827_v31 }
 0x366   : > { %v4986_v11 = vadd.f32 %v8854_v21, %v4971_v57  ;;  %v5018_v4 = vor.u32 %v5017_v42, %v5014_v51 }
 0x368   : > { %v4997_v38 = vpack.c.bf16 %v4986_v11, %v4986_v11  ;;  %v4909_v35 = vpop.f32.mrf.mxu2  ;;  %v4657_v49 = vpop.f32.mrf.mxu0  ;;  %v5019_v62 = vrot.slane %v5018_v4, 4 }
 0x369   : > { %v4947_v24 = vpop.f32.mrf.mxu3  ;;  %v4695_v48 = vpop.f32.mrf.mxu1 }
 0x36a   : > { %v5021_v63 = vshrl.u32 %v4997_v38, 16  ;;  %v5024_v59 = vshll.u32 %v4997_v38, 16  ;;  %v4948_v22 = vadd.f32 %v4947_v24, %v4909_v35  ;;  %v4696_v31 = vadd.f32 %v4695_v48, %v4657_v49 }
 0x36b   : > { %v6356_v32 = vrot.slane %v4997_v38, 11 }
 0x36c   : > { %v5023_v7 = vrot.slane %v5021_v63, 5  ;;  %v5026_v61 = vrot.slane %v5024_v59, 6  ;;  %v4972_v39 = vadd.f32 %v4948_v22, %v4717_v45  ;;  %v4718_v16 = vadd.f32 %v4696_v31, %v8830_v41 }
 0x36e   : > { %v5027_v20 = vor.u32 %v5026_v61, %v5023_v7  ;;  %v4987_v23 = vadd.f32 %v8854_v21, %v4972_v39 }
 0x370   : > { %v5028_v10 = vsel %vm5010_vm10, %v5019_v62, %v5027_v20  ;;  %v4998_v2 = vpack.c.bf16 %v4987_v23, %v4987_v23  ;;  %v4912_v9 = vpop.f32.mrf.mxu2  ;;  %v4659_v29 = vpop.f32.mrf.mxu0  ;;  %vm5094_vm10 = vmor %vm5092_vm8, %vm5093_vm9 }
 0x371   : > { %5030 = vst.msk [vmem:[%s8861_s29 + $0x4] sm:$0xf] %vm5006_vm7, %v5028_v10  ;;  %v4950_v18 = vpop.f32.mrf.mxu3  ;;  %v4697_v0 = vpop.f32.mrf.mxu1 }
 0x372   : > { %v5038_v58 = vrot.slane %v4998_v2, 7  ;;  %v4951_v50 = vadd.f32 %v4950_v18, %v4912_v9  ;;  %v4698_v25 = vadd.f32 %v4697_v0, %v4659_v29 }
 0x374   : > { %v5039_v40 = vsel %vm5035_vm13, %v6356_v32, %v5038_v58  ;;  %v4973_v34 = vadd.f32 %v4951_v50, %v4718_v16  ;;  %v4719_v14 = vadd.f32 %v4698_v25, %v8833_v19  ;;  %vm5103_vm13 = vmor %vm5101_vm11, %vm5102_vm12 }
 0x375   : > { %5041 = vst.msk [vmem:[%s8861_s29 + $0x8] sm:$0xf] %vm5006_vm7, %v5039_v40 }
 0x376   : > { %v4988_v17 = vadd.f32 %v8854_v21, %v4973_v34 }
 0x378   : > { %v4999_v37 = vpack.c.bf16 %v4988_v17, %v4988_v17  ;;  %v4914_v60 = vpop.f32.mrf.mxu2  ;;  %v4662_v27 = vpop.f32.mrf.mxu0 }
 0x379   : > { %v4952_v15 = vpop.f32.mrf.mxu3  ;;  %v4700_v41 = vpop.f32.mrf.mxu1 }
 0x37a   : > { %v5046_v56 = vshrl.u32 %v4999_v37, 16  ;;  %v5049_v3 = vshll.u32 %v4999_v37, 16  ;;  %v4953_v44 = vadd.f32 %v4952_v15, %v4914_v60  ;;  %v4701_v52 = vadd.f32 %v4700_v41, %v4662_v27 }
 0x37c   : > { %v5048_v53 = vrot.slane %v5046_v56, 4  ;;  %v5051_v55 = vrot.slane %v5049_v3, 5  ;;  %v4974_v13 = vadd.f32 %v4953_v44, %v4719_v14  ;;  %v4720_v43 = vadd.f32 %v4701_v52, %v8836_v6 }
 0x37e   : > { %v4989_v28 = vadd.f32 %v8854_v21, %v4974_v13  ;;  %v5052_v54 = vor.u32 %v5051_v55, %v5048_v53 }
 0x380   : > { %v5000_v30 = vpack.c.bf16 %v4989_v28, %v4989_v28  ;;  %v4917_v5 = vpop.f32.mrf.mxu2  ;;  %v4664_v47 = vpop.f32.mrf.mxu0  ;;  %v5053_v46 = vrot.slane %v5052_v54, 4 }
 0x381   : > { %v4955_v8 = vpop.f32.mrf.mxu3  ;;  %v4702_v57 = vpop.f32.mrf.mxu1 }
 0x382   : > { %v5055_v1 = vshll.u32 %v5000_v30, 16  ;;  %v4956_v19 = vadd.f32 %v4955_v8, %v4917_v5  ;;  %v4703_v45 = vadd.f32 %v4702_v57, %v4664_v47  ;;  %v6357_v4 = vrot.slane %v5000_v30, 10 }
 0x384   : > { %v5057_v51 = vrot.slane %v5055_v1, 5  ;;  %v4975_v42 = vadd.f32 %v4956_v19, %v4720_v43  ;;  %v4721_v59 = vadd.f32 %v4703_v45, %v8839_v12 }
 0x386   : > { %v5058_v11 = vsel %vm5044_vm0, %v5053_v46, %v5057_v51  ;;  %v4990_v38 = vadd.f32 %v8854_v21, %v4975_v42 }
 0x387   : > { %5060 = vst.msk [vmem:[%s8861_s29 + $0xc] sm:$0xf] %vm5006_vm7, %v5058_v11 }
 0x388   : > { %v5001_v35 = vpack.c.bf16 %v4990_v38, %v4990_v38  ;;  %v4919_v24 = vpop.f32.mrf.mxu2  ;;  %v4667_v49 = vpop.f32.mrf.mxu0 }
 0x389   : > { %v4957_v6 = vpop.f32.mrf.mxu3  ;;  %v4705_v48 = vpop.f32.mrf.mxu1 }
 0x38a   : > { %v5068_v63 = vrot.slane %v5001_v35, 6  ;;  %v4958_v22 = vadd.f32 %v4957_v6, %v4919_v24  ;;  %v4706_v62 = vadd.f32 %v4705_v48, %v4667_v49  ;;  %v5076_v10 = vshrl.u32 %v5001_v35, 16 }
 0x38c   : > { %v5069_v7 = vsel %vm5065_vm3, %v6357_v4, %v5068_v63  ;;  %v4976_v61 = vadd.f32 %v4958_v22, %v4721_v59  ;;  %v4722_v32 = vadd.f32 %v4706_v62, %v8842_v36  ;;  %v6358_v29 = vrot.slane %v5076_v10, 11 }
 0x38d   : > { %5071 = vst.msk [vmem:[%s8861_s29 + $0x10] sm:$0xf] %vm5006_vm7, %v5069_v7 }
 0x38e   : > { %v4991_v39 = vadd.f32 %v8854_v21, %v4976_v61 }
 0x390   : > { %v5002_v20 = vpack.c.bf16 %v4991_v39, %v4991_v39  ;;  %v4922_v23 = vpop.f32.mrf.mxu2  ;;  %v4669_v12 = vpop.f32.mrf.mxu0 }
 0x391   : > { %v4960_v31 = vpop.f32.mrf.mxu3  ;;  %v4707_v18 = vpop.f32.mrf.mxu1 }
 0x392   : > { %v5081_v2 = vshrl.u32 %v5002_v20, 16  ;;  %v4961_v9 = vadd.f32 %v4960_v31, %v4922_v23  ;;  %v5084_v16 = vshll.u32 %v5002_v20, 16  ;;  %v4708_v40 = vadd.f32 %v4707_v18, %v4669_v12 }
 0x394   : > { %v5083_v58 = vrot.slane %v5081_v2, 7  ;;  %v4977_v50 = vadd.f32 %v4961_v9, %v4722_v32  ;;  %v4723_v60 = vadd.f32 %v4708_v40, %v8845_v33 }
 0x396   : > { %v5086_v0 = vor.u32 %v5084_v16, %v5083_v58  ;;  %v4992_v17 = vadd.f32 %v8854_v21, %v4977_v50 }
 0x398   : > { %v5087_v34 = vsel %vm5074_vm6, %v6358_v29, %v5086_v0  ;;  %v4924_v25 = vpop.f32.mrf.mxu2  ;;  %v4672_v56 = vpop.f32.mrf.mxu0  ;;  %v5003_v14 = vpack.c.bf16 %v4992_v17, %v4992_v17 }
 0x399   : > { %5089 = vst.msk [vmem:[%s8861_s29 + $0x14] sm:$0xf] %vm5006_vm7, %v5087_v34  ;;  %v4962_v37 = vpop.f32.mrf.mxu3  ;;  %v4710_v3 = vpop.f32.mrf.mxu1 }
 0x39a   : > { %v4963_v15 = vadd.f32 %v4962_v37, %v4924_v25  ;;  %v4711_v44 = vadd.f32 %v4710_v3, %v4672_v56  ;;  %v6359_v53 = vrot.slane %v5003_v14, 9 }
 0x39c   : > { %v4978_v36 = vadd.f32 %v4963_v15, %v4723_v60  ;;  %v4724_v55 = vadd.f32 %v4711_v44, %v8848_v26 }
 0x39e   : > { %v4993_v27 = vadd.f32 %v8854_v21, %v4978_v36 }
 0x3a0   : > { %v5004_v41 = vpack.c.bf16 %v4993_v27, %v4993_v27  ;;  %v4927_v13 = vpop.f32.mrf.mxu2  ;;  %v4674_v5 = vpop.f32.mrf.mxu0 }
 0x3a1   : > { %v4965_v28 = vpop.f32.mrf.mxu3  ;;  %v4712_v8 = vpop.f32.mrf.mxu1 }
 0x3a2   : > { %v5097_v52 = vrot.slane %v5004_v41, 5  ;;  %v5105_v33 = vshrl.u32 %v5004_v41, 16  ;;  %v5108_v54 = vshll.u32 %v5004_v41, 16  ;;  %v4966_v30 = vadd.f32 %v4965_v28, %v4927_v13 }
 0x3a4   : > { %v5098_v1 = vsel %vm5094_vm10, %v6359_v53, %v5097_v52  ;;  %v4979_v43 = vadd.f32 %v4966_v30, %v4724_v55  ;;  %v5107_v19 = vrot.slane %v5105_v33, 6  ;;  %v5110_v47 = vrot.slane %v5108_v54, 7 }
 0x3a5   : > { %5100 = vst.msk [vmem:[%s8861_s29 + $0x18] sm:$0xf] %vm5006_vm7, %v5098_v1 }
 0x3a6   : > { %v4994_v57 = vadd.f32 %v8854_v21, %v4979_v43  ;;  %v5111_v42 = vor.u32 %v5110_v47, %v5107_v19 }
 0x3a8   : > { %v5005_v46 = vpack.c.bf16 %v4994_v57, %v4994_v57  ;;  %v4929_v26 = vpop.f32.mrf.mxu2  ;;  %v5112_v24 = vrot.slane %v5111_v42, 4 }
 0x3a9   : > { %v4967_v51 = vpop.f32.mrf.mxu3 }
 0x3aa   : > { %v5114_v11 = vshrl.u32 %v5005_v46, 16  ;;  %v5117_v38 = vshll.u32 %v5005_v46, 16 }
 0x3ac   : > { %v5116_v45 = vrot.slane %v5114_v11, 6  ;;  %v5119_v35 = vrot.slane %v5117_v38, 7 }
 0x3ae   : > { %v5120_v6 = vor.u32 %v5119_v35, %v5116_v45 }
 0x3b0   : > { %v5121_v4 = vsel %vm5103_vm13, %v5112_v24, %v5120_v6 }
 0x3b1   : > { %5123 = vst.msk [vmem:[%s8861_s29 + $0x1c] sm:$0xf] %vm5006_vm7, %v5121_v4 }
 0x3b2 PF: > { %s13_s12 = sadd.s32 1, %s6671_s12  }
 0x3b3   : > { %p10_p4 = scmp.ge.s32.totalorder %s13_s12, 4  }
 0x3b5   :  { %12 = sbr.rel (!%p10_p4) target bundleno = 1 (0x1), region = 62 }

</bundles_post_ra>
